<compile_context>
chip_gen: v5e
topology: v5e:2x2
jax: 0.10.0
libtpu: 0.0.40
codegen_flags: <defaults>
</compile_context>

<pallas_src>
import functools

import jax
import jax.numpy as jnp
from jax import lax
from jax.experimental import pallas as pl
from jax.experimental.pallas import tpu as pltpu


def _attn_kernel(x_ref, wqT_ref, bq_ref, wkvT_ref, bkv_ref, wpT_ref, bp_ref,
                 o_ref, kv_scratch, *, n_heads, head_size):
    f32 = jnp.float32
    TQ = x_ref.shape[1]                     # query-tile length
    hs = head_size
    H = n_heads * hs
    cdt = x_ref.dtype                       # MXU operand dtype (f32 or bf16)
    qi = pl.program_id(1)                   # query-tile index (sequential)
    mask_val = jnp.finfo(f32).min
    scale = 1.0 / (hs ** 0.5)

    x_tile = x_ref[0]                                                # (TQ, H)
    diag_start = pl.multiple_of(qi * TQ, TQ)

    # ---- Project K/V for the NEW chunk only; older chunks of this batch are
    #      already resident in kv_scratch (persists across qi steps). --------
    kv = jnp.dot(x_tile, wkvT_ref[...], preferred_element_type=f32) + bkv_ref[...]
    kv = kv.astype(kv_scratch.dtype)
    for h in range(n_heads):
        s0 = h * hs
        kv_scratch[0, h, pl.ds(diag_start, TQ), :] = kv[:, s0:s0 + hs]
        kv_scratch[1, h, pl.ds(diag_start, TQ), :] = kv[:, H + s0:H + s0 + hs]

    # ---- Q projection for this tile (1/sqrt(hs) folded in once). ----------
    q = jnp.dot(x_tile, wqT_ref[...], preferred_element_type=f32) + bq_ref[...]
    q = (q * scale).astype(cdt)

    # Local lower-triangular mask, used ONLY on the diagonal chunk (hoisted).
    rows = lax.broadcasted_iota(jnp.int32, (TQ, TQ), 0)
    cols = lax.broadcasted_iota(jnp.int32, (TQ, TQ), 1)
    tri = cols <= rows

    out_acc = jnp.zeros((TQ, H), dtype=f32)

    # TODO(synk): with many heads (12-25) a lax.fori_loop over heads using
    # aligned pl.ds slices would shrink codegen; kept unrolled per review
    # ("modest, measure first").
    for h in range(n_heads):
        s0 = h * hs
        qh = q[:, s0:s0 + hs]                                        # (TQ, hs)

        # -- Diagonal (masked) chunk initializes the online-softmax state. --
        k_d = kv_scratch[0, h, pl.ds(diag_start, TQ), :]             # (TQ, hs)
        v_d = kv_scratch[1, h, pl.ds(diag_start, TQ), :]
        sc = lax.dot_general(qh, k_d, (((1,), (1,)), ((), ())),
                             preferred_element_type=f32)             # (TQ, TQ)
        sc = jnp.where(tri, sc, mask_val)
        m0 = jnp.max(sc, axis=-1, keepdims=True)
        p0 = jnp.exp(sc - m0)
        l0 = jnp.sum(p0, axis=-1, keepdims=True)
        acc0 = jnp.dot(p0.astype(cdt), v_d, preferred_element_type=f32)

        # -- Strictly-below-diagonal chunks: no mask work at all. -----------
        def body(kt, carry, qh=qh, h=h):
            m_prev, l_prev, acc_prev = carry
            start = pl.multiple_of(kt * TQ, TQ)
            k_blk = kv_scratch[0, h, pl.ds(start, TQ), :]
            v_blk = kv_scratch[1, h, pl.ds(start, TQ), :]
            s = lax.dot_general(qh, k_blk, (((1,), (1,)), ((), ())),
                                preferred_element_type=f32)
            m_new = jnp.maximum(m_prev, jnp.max(s, axis=-1, keepdims=True))
            alpha = jnp.exp(m_prev - m_new)
            p = jnp.exp(s - m_new)
            l_new = alpha * l_prev + jnp.sum(p, axis=-1, keepdims=True)
            acc_new = alpha * acc_prev + jnp.dot(p.astype(cdt), v_blk,
                                                 preferred_element_type=f32)
            return m_new, l_new, acc_new

        _, l_f, acc_f = lax.fori_loop(0, qi, body, (m0, l0, acc0))

        # EUP reciprocal (free slot); negligible accuracy impact after f32 acc.
        ctx_h = acc_f * pl.reciprocal(l_f, approx=True)

        # Project this head's context immediately with the matching sublane
        # slice of Wproj^T and accumulate (no lane-offset context stores).
        out_acc = out_acc + jnp.dot(ctx_h.astype(cdt), wpT_ref[s0:s0 + hs, :],
                                    preferred_element_type=f32)

    o_ref[0] = (out_acc + bp_ref[...]).astype(o_ref.dtype)


def _pick_tq(T, target):
    """Largest query-tile length <= target that divides T (multiple of 8)."""
    if T <= target:
        return T
    for tq in range(target, 7, -1):
        if T % tq == 0 and tq % 8 == 0:
            return tq
    return T


def _vmem_limit_bytes():
    """Per-generation VMEM budget with ~16 MiB headroom (capped at 96 MiB)."""
    try:
        cap = int(pltpu.get_tpu_info().vmem_capacity_bytes)
    except Exception:
        cap = 64 * 1024 * 1024            # conservative (v7x-sized) fallback
    return max(32 * 1024 * 1024, min(96 * 1024 * 1024, cap - 16 * 1024 * 1024))


def gpt2_attention_pallas(x, wq, bq, wk, bk, wv, bv, wp, bp, *, n_heads,
                          q_tile=None):
    B, T, H = x.shape
    head_size = H // n_heads
    dt = x.dtype

    # Pre-transpose (and fuse K/V) once outside the kernel so the kernel never
    # transposes a weight tile.
    wqT = wq.T.astype(dt)                                    # (H, H)
    wkvT = jnp.concatenate([wk, wv], axis=0).T.astype(dt)    # (H, 2H)
    wpT = wp.T.astype(dt)                                    # (H, H)
    bq2 = bq.reshape(1, H).astype(jnp.float32)
    bkv2 = jnp.concatenate([bk, bv]).reshape(1, 2 * H).astype(jnp.float32)
    bp2 = bp.reshape(1, H).astype(jnp.float32)

    vmem_limit = _vmem_limit_bytes()
    if q_tile is None:
        # Larger tiles on big-VMEM parts (v5e/v6e) amortize per-step overhead
        # and softmax epilogue per MXU op; 256 target on v7x (64 MiB VMEM).
        target = 512 if vmem_limit >= 96 * 1024 * 1024 else 256
        TQ = _pick_tq(T, target)
    else:
        TQ = q_tile
    assert T % TQ == 0, "query tile must divide sequence length"
    nQ = T // TQ

    kernel = functools.partial(_attn_kernel, n_heads=n_heads,
                               head_size=head_size)

    def build(single_buffer_weights):
        # Grid-invariant weight/bias blocks never change index; single-buffer
        # them (pl.Buffered(1)) so the second copy is not dead VMEM.
        extra = {"pipeline_mode": pl.Buffered(1)} if single_buffer_weights else {}

        def const(shape):
            return pl.BlockSpec(shape, lambda b, qi: (0,) * len(shape), **extra)

        return pl.pallas_call(
            kernel,
            out_shape=jax.ShapeDtypeStruct((B, T, H), x.dtype),
            grid_spec=pltpu.PrefetchScalarGridSpec(
                num_scalar_prefetch=0,
                grid=(B, nQ),
                in_specs=[
                    pl.BlockSpec((1, TQ, H), lambda b, qi: (b, qi, 0)),  # x tile
                    const((H, H)),        # Wq^T
                    const((1, H)),        # bq
                    const((H, 2 * H)),    # [Wk;Wv]^T (fused)
                    const((1, 2 * H)),    # [bk;bv]
                    const((H, H)),        # Wproj^T
                    const((1, H)),        # bproj
                ],
                out_specs=pl.BlockSpec((1, TQ, H), lambda b, qi: (b, qi, 0)),
                scratch_shapes=[
                    # Head-major persistent K/V prefix for the current batch:
                    # [K|V, head, position, head_dim].  Persists across qi
                    # steps (qi axis is "arbitrary", b-outer / qi-inner order).
                    pltpu.VMEM((2, n_heads, T, head_size), dt),
                ],
            ),
            compiler_params=pltpu.CompilerParams(
                # qi must be sequential (scratch carries K/V across qi steps);
                # batch stays parallel for the v7x 2-TC split.
                dimension_semantics=("parallel", "arbitrary"),
                vmem_limit_bytes=vmem_limit,
            ),
        )

    args = (x, wqT, bq2, wkvT, bkv2, wpT, bp2)
    try:
        return build(True)(*args)
    except Exception:
        # pipeline_mode=pl.Buffered(1) not supported by this jax version:
        # fall back to default double-buffered weight blocks.
        return build(False)(*args)


def gpt2_attention_reference(x, wq, bq, wk, bk, wv, bv, wp, bp, *, n_heads):
    """Pure-JAX reference mirroring the PyTorch forward (dropout in eval)."""
    B, T, H = x.shape
    hs = H // n_heads

    def part(w, b):
        y = x @ w.T + b                      # (B, T, H)
        y = y.reshape(B, T, n_heads, hs)
        return y.swapaxes(1, 2)              # (B, nH, T, hs)

    q = part(wq, bq)
    k = part(wk, bk)
    v = part(wv, bv)

    aw = q @ k.swapaxes(2, 3)                # (B, nH, T, T)
    aw = aw * (1.0 / hs ** 0.5)
    col = jnp.tile(jnp.arange(T), (T, 1))
    row = col.swapaxes(0, 1)
    mask = col <= row
    aw = jnp.where(mask, aw, jnp.finfo(aw.dtype).min)
    aw = jax.nn.softmax(aw, axis=3)
    attn = aw @ v                            # (B, nH, T, hs)
    attn = attn.swapaxes(1, 2).reshape(B, T, H)
    return attn @ wp.T + bp


if __name__ == "__main__":
    # T=16 with q_tile=8 exercises the persistent-KV multi-tile path
    # (diagonal masked chunk + unmasked below-diagonal chunk) at small shapes.
    B, T, H, n_heads = 2, 16, 32, 4

    key = jax.random.PRNGKey(0)
    keys = jax.random.split(key, 9)
    scale = 0.02
    x = jax.random.normal(keys[0], (B, T, H), dtype=jnp.float32)
    wq = scale * jax.random.normal(keys[1], (H, H), dtype=jnp.float32)
    wk = scale * jax.random.normal(keys[2], (H, H), dtype=jnp.float32)
    wv = scale * jax.random.normal(keys[3], (H, H), dtype=jnp.float32)
    wp = scale * jax.random.normal(keys[4], (H, H), dtype=jnp.float32)
    bq = scale * jax.random.normal(keys[5], (H,), dtype=jnp.float32)
    bk = scale * jax.random.normal(keys[6], (H,), dtype=jnp.float32)
    bv = scale * jax.random.normal(keys[7], (H,), dtype=jnp.float32)
    bp = scale * jax.random.normal(keys[8], (H,), dtype=jnp.float32)

    out = gpt2_attention_pallas(x, wq, bq, wk, bk, wv, bv, wp, bp,
                                n_heads=n_heads, q_tile=8)
    out = jax.block_until_ready(out)

    ref = gpt2_attention_reference(x, wq, bq, wk, bk, wv, bv, wp, bp,
                                   n_heads=n_heads)
    # Tolerance loosened slightly (1e-4) for the EUP approx reciprocal.
    assert jnp.allclose(out, ref, atol=1e-4, rtol=1e-4), "mismatch vs reference"

    print("KERNEL_OK")
</pallas_src>

<mosaic_0001>
module attributes {stable_mosaic.version = 11 : i64} {
  func.func @_attn_kernel(%arg0: i32, %arg1: i32, %arg2: memref<1x8x32xf32, #tpu.memory_space<vmem>>, %arg3: memref<32x32xf32, #tpu.memory_space<vmem>>, %arg4: memref<1x32xf32, #tpu.memory_space<vmem>>, %arg5: memref<32x64xf32, #tpu.memory_space<vmem>>, %arg6: memref<1x64xf32, #tpu.memory_space<vmem>>, %arg7: memref<32x32xf32, #tpu.memory_space<vmem>>, %arg8: memref<1x32xf32, #tpu.memory_space<vmem>>, %arg9: memref<1x8x32xf32, #tpu.memory_space<vmem>>, %arg10: memref<2x4x16x8xf32, #tpu.memory_space<vmem>>) attributes {dimension_semantics = [#tpu.dimension_semantics<parallel>, #tpu.dimension_semantics<arbitrary>], iteration_bounds = array<i64: 2, 2>, scalar_prefetch = 0 : i64, scratch_operands = 1 : i64, tpu.core_type = #tpu.core_type<tc>, window_params = [{transform_indices = @transform_0, window_bounds = array<i64: 1, 8, 32>}, {pipeline_mode = #tpu.pipeline_mode<synchronous>, transform_indices = @transform_1, window_bounds = array<i64: 32, 32>}, {pipeline_mode = #tpu.pipeline_mode<synchronous>, transform_indices = @transform_2, window_bounds = array<i64: 1, 32>}, {pipeline_mode = #tpu.pipeline_mode<synchronous>, transform_indices = @transform_3, window_bounds = array<i64: 32, 64>}, {pipeline_mode = #tpu.pipeline_mode<synchronous>, transform_indices = @transform_4, window_bounds = array<i64: 1, 64>}, {pipeline_mode = #tpu.pipeline_mode<synchronous>, transform_indices = @transform_5, window_bounds = array<i64: 32, 32>}, {pipeline_mode = #tpu.pipeline_mode<synchronous>, transform_indices = @transform_6, window_bounds = array<i64: 1, 32>}, {transform_indices = @transform_7, window_bounds = array<i64: 1, 8, 32>}]} {
    %c0 = arith.constant 0 : index
    %c0_0 = arith.constant 0 : index
    %c0_1 = arith.constant 0 : index
    %0 = vector.load %arg2[%c0, %c0_0, %c0_1] : memref<1x8x32xf32, #tpu.memory_space<vmem>>, vector<1x8x32xf32>
    %1 = vector.shape_cast %0 : vector<1x8x32xf32> to vector<8x32xf32>
    %c8_i32 = arith.constant 8 : i32
    %2 = arith.muli %arg1, %c8_i32 : i32
    %3 = tpu.assume_multiple %2, 8 : i32
    %c0_2 = arith.constant 0 : index
    %c0_3 = arith.constant 0 : index
    %4 = vector.load %arg5[%c0_2, %c0_3] : memref<32x64xf32, #tpu.memory_space<vmem>>, vector<32x64xf32>
    %cst = arith.constant dense<0.000000e+00> : vector<8x64xf32>
    %5 = tpu.matmul %1, %4, %cst {dimension_numbers = #tpu.dot_dimension_numbers<[1], [0], [0], [1], [0, 0, 1, 1], [], []>} : vector<8x32xf32>, vector<32x64xf32>, vector<8x64xf32> -> vector<8x64xf32>
    %c0_4 = arith.constant 0 : index
    %c0_5 = arith.constant 0 : index
    %6 = vector.load %arg6[%c0_4, %c0_5] : memref<1x64xf32, #tpu.memory_space<vmem>>, vector<1x64xf32>
    %7 = vector.broadcast %6 : vector<1x64xf32> to vector<8x64xf32>
    %8 = arith.addf %5, %7 : vector<8x64xf32>
    %9 = vector.extract_strided_slice %8 {offsets = [0, 0], sizes = [8, 8], strides = [1, 1]} : vector<8x64xf32> to vector<8x8xf32>
    %c0_6 = arith.constant 0 : index
    %c0_7 = arith.constant 0 : index
    %10 = arith.index_cast %3 : i32 to index
    %c0_8 = arith.constant 0 : index
    %11 = vector.load %arg10[%c0_6, %c0_7, %10, %c0_8] : memref<2x4x16x8xf32, #tpu.memory_space<vmem>>, vector<1x1x8x8xf32>
    %12 = vector.shape_cast %11 : vector<1x1x8x8xf32> to vector<8x8xf32>
    %13 = vector.shape_cast %9 : vector<8x8xf32> to vector<1x1x8x8xf32>
    tpu.vector_store %arg10[%c0_6, %c0_7, %10, %c0_8], %13 {strides = array<i32>} : memref<2x4x16x8xf32, #tpu.memory_space<vmem>>, vector<1x1x8x8xf32>,
    %14 = vector.extract_strided_slice %8 {offsets = [0, 32], sizes = [8, 8], strides = [1, 1]} : vector<8x64xf32> to vector<8x8xf32>
    %c1 = arith.constant 1 : index
    %c0_9 = arith.constant 0 : index
    %15 = arith.index_cast %3 : i32 to index
    %c0_10 = arith.constant 0 : index
    %16 = vector.load %arg10[%c1, %c0_9, %15, %c0_10] : memref<2x4x16x8xf32, #tpu.memory_space<vmem>>, vector<1x1x8x8xf32>
    %17 = vector.shape_cast %16 : vector<1x1x8x8xf32> to vector<8x8xf32>
    %18 = vector.shape_cast %14 : vector<8x8xf32> to vector<1x1x8x8xf32>
    tpu.vector_store %arg10[%c1, %c0_9, %15, %c0_10], %18 {strides = array<i32>} : memref<2x4x16x8xf32, #tpu.memory_space<vmem>>, vector<1x1x8x8xf32>,
    %19 = vector.extract_strided_slice %8 {offsets = [0, 8], sizes = [8, 8], strides = [1, 1]} : vector<8x64xf32> to vector<8x8xf32>
    %c0_11 = arith.constant 0 : index
    %c1_12 = arith.constant 1 : index
    %20 = arith.index_cast %3 : i32 to index
    %c0_13 = arith.constant 0 : index
    %21 = vector.load %arg10[%c0_11, %c1_12, %20, %c0_13] : memref<2x4x16x8xf32, #tpu.memory_space<vmem>>, vector<1x1x8x8xf32>
    %22 = vector.shape_cast %21 : vector<1x1x8x8xf32> to vector<8x8xf32>
    %23 = vector.shape_cast %19 : vector<8x8xf32> to vector<1x1x8x8xf32>
    tpu.vector_store %arg10[%c0_11, %c1_12, %20, %c0_13], %23 {strides = array<i32>} : memref<2x4x16x8xf32, #tpu.memory_space<vmem>>, vector<1x1x8x8xf32>,
    %24 = vector.extract_strided_slice %8 {offsets = [0, 40], sizes = [8, 8], strides = [1, 1]} : vector<8x64xf32> to vector<8x8xf32>
    %c1_14 = arith.constant 1 : index
    %c1_15 = arith.constant 1 : index
    %25 = arith.index_cast %3 : i32 to index
    %c0_16 = arith.constant 0 : index
    %26 = vector.load %arg10[%c1_14, %c1_15, %25, %c0_16] : memref<2x4x16x8xf32, #tpu.memory_space<vmem>>, vector<1x1x8x8xf32>
    %27 = vector.shape_cast %26 : vector<1x1x8x8xf32> to vector<8x8xf32>
    %28 = vector.shape_cast %24 : vector<8x8xf32> to vector<1x1x8x8xf32>
    tpu.vector_store %arg10[%c1_14, %c1_15, %25, %c0_16], %28 {strides = array<i32>} : memref<2x4x16x8xf32, #tpu.memory_space<vmem>>, vector<1x1x8x8xf32>,
    %29 = vector.extract_strided_slice %8 {offsets = [0, 16], sizes = [8, 8], strides = [1, 1]} : vector<8x64xf32> to vector<8x8xf32>
    %c0_17 = arith.constant 0 : index
    %c2 = arith.constant 2 : index
    %30 = arith.index_cast %3 : i32 to index
    %c0_18 = arith.constant 0 : index
    %31 = vector.load %arg10[%c0_17, %c2, %30, %c0_18] : memref<2x4x16x8xf32, #tpu.memory_space<vmem>>, vector<1x1x8x8xf32>
    %32 = vector.shape_cast %31 : vector<1x1x8x8xf32> to vector<8x8xf32>
    %33 = vector.shape_cast %29 : vector<8x8xf32> to vector<1x1x8x8xf32>
    tpu.vector_store %arg10[%c0_17, %c2, %30, %c0_18], %33 {strides = array<i32>} : memref<2x4x16x8xf32, #tpu.memory_space<vmem>>, vector<1x1x8x8xf32>,
    %34 = vector.extract_strided_slice %8 {offsets = [0, 48], sizes = [8, 8], strides = [1, 1]} : vector<8x64xf32> to vector<8x8xf32>
    %c1_19 = arith.constant 1 : index
    %c2_20 = arith.constant 2 : index
    %35 = arith.index_cast %3 : i32 to index
    %c0_21 = arith.constant 0 : index
    %36 = vector.load %arg10[%c1_19, %c2_20, %35, %c0_21] : memref<2x4x16x8xf32, #tpu.memory_space<vmem>>, vector<1x1x8x8xf32>
    %37 = vector.shape_cast %36 : vector<1x1x8x8xf32> to vector<8x8xf32>
    %38 = vector.shape_cast %34 : vector<8x8xf32> to vector<1x1x8x8xf32>
    tpu.vector_store %arg10[%c1_19, %c2_20, %35, %c0_21], %38 {strides = array<i32>} : memref<2x4x16x8xf32, #tpu.memory_space<vmem>>, vector<1x1x8x8xf32>,
    %39 = vector.extract_strided_slice %8 {offsets = [0, 24], sizes = [8, 8], strides = [1, 1]} : vector<8x64xf32> to vector<8x8xf32>
    %c0_22 = arith.constant 0 : index
    %c3 = arith.constant 3 : index
    %40 = arith.index_cast %3 : i32 to index
    %c0_23 = arith.constant 0 : index
    %41 = vector.load %arg10[%c0_22, %c3, %40, %c0_23] : memref<2x4x16x8xf32, #tpu.memory_space<vmem>>, vector<1x1x8x8xf32>
    %42 = vector.shape_cast %41 : vector<1x1x8x8xf32> to vector<8x8xf32>
    %43 = vector.shape_cast %39 : vector<8x8xf32> to vector<1x1x8x8xf32>
    tpu.vector_store %arg10[%c0_22, %c3, %40, %c0_23], %43 {strides = array<i32>} : memref<2x4x16x8xf32, #tpu.memory_space<vmem>>, vector<1x1x8x8xf32>,
    %44 = vector.extract_strided_slice %8 {offsets = [0, 56], sizes = [8, 8], strides = [1, 1]} : vector<8x64xf32> to vector<8x8xf32>
    %c1_24 = arith.constant 1 : index
    %c3_25 = arith.constant 3 : index
    %45 = arith.index_cast %3 : i32 to index
    %c0_26 = arith.constant 0 : index
    %46 = vector.load %arg10[%c1_24, %c3_25, %45, %c0_26] : memref<2x4x16x8xf32, #tpu.memory_space<vmem>>, vector<1x1x8x8xf32>
    %47 = vector.shape_cast %46 : vector<1x1x8x8xf32> to vector<8x8xf32>
    %48 = vector.shape_cast %44 : vector<8x8xf32> to vector<1x1x8x8xf32>
    tpu.vector_store %arg10[%c1_24, %c3_25, %45, %c0_26], %48 {strides = array<i32>} : memref<2x4x16x8xf32, #tpu.memory_space<vmem>>, vector<1x1x8x8xf32>,
    %c0_27 = arith.constant 0 : index
    %c0_28 = arith.constant 0 : index
    %49 = vector.load %arg3[%c0_27, %c0_28] : memref<32x32xf32, #tpu.memory_space<vmem>>, vector<32x32xf32>
    %cst_29 = arith.constant dense<0.000000e+00> : vector<8x32xf32>
    %50 = tpu.matmul %1, %49, %cst_29 {dimension_numbers = #tpu.dot_dimension_numbers<[1], [0], [0], [1], [0, 0, 1, 1], [], []>} : vector<8x32xf32>, vector<32x32xf32>, vector<8x32xf32> -> vector<8x32xf32>
    %c0_30 = arith.constant 0 : index
    %c0_31 = arith.constant 0 : index
    %51 = vector.load %arg4[%c0_30, %c0_31] : memref<1x32xf32, #tpu.memory_space<vmem>>, vector<1x32xf32>
    %52 = vector.broadcast %51 : vector<1x32xf32> to vector<8x32xf32>
    %53 = arith.addf %50, %52 : vector<8x32xf32>
    %cst_32 = arith.constant 0.353553385 : f32
    %54 = vector.broadcast %cst_32 : f32 to vector<8x32xf32>
    %55 = arith.mulf %53, %54 : vector<8x32xf32>
    %56 = tpu.iota {dimensions = array<i32: 0>} : vector<8x8xi32>
    %57 = tpu.iota {dimensions = array<i32: 1>} : vector<8x8xi32>
    %58 = arith.cmpi sle, %57, %56 : vector<8x8xi32>
    %cst_33 = arith.constant 0.000000e+00 : f32
    %59 = vector.broadcast %cst_33 : f32 to vector<8x32xf32>
    %60 = vector.extract_strided_slice %55 {offsets = [0, 0], sizes = [8, 8], strides = [1, 1]} : vector<8x32xf32> to vector<8x8xf32>
    %c0_34 = arith.constant 0 : index
    %c0_35 = arith.constant 0 : index
    %61 = arith.index_cast %3 : i32 to index
    %c0_36 = arith.constant 0 : index
    %62 = vector.load %arg10[%c0_34, %c0_35, %61, %c0_36] : memref<2x4x16x8xf32, #tpu.memory_space<vmem>>, vector<1x1x8x8xf32>
    %63 = vector.shape_cast %62 : vector<1x1x8x8xf32> to vector<8x8xf32>
    %c1_37 = arith.constant 1 : index
    %c0_38 = arith.constant 0 : index
    %64 = arith.index_cast %3 : i32 to index
    %c0_39 = arith.constant 0 : index
    %65 = vector.load %arg10[%c1_37, %c0_38, %64, %c0_39] : memref<2x4x16x8xf32, #tpu.memory_space<vmem>>, vector<1x1x8x8xf32>
    %66 = vector.shape_cast %65 : vector<1x1x8x8xf32> to vector<8x8xf32>
    %cst_40 = arith.constant dense<0.000000e+00> : vector<8x8xf32>
    %67 = tpu.matmul %60, %63, %cst_40 {dimension_numbers = #tpu.dot_dimension_numbers<[1], [1], [0], [0], [0, 0, 1, 0], [], []>} : vector<8x8xf32>, vector<8x8xf32>, vector<8x8xf32> -> vector<8x8xf32>
    %cst_41 = arith.constant -3.40282347E+38 : f32
    %68 = vector.broadcast %cst_41 : f32 to vector<8x8xf32>
    %69 = arith.select %58, %67, %68 : vector<8x8xi1>, vector<8x8xf32>
    %cst_42 = arith.constant dense<0xFF800000> : vector<8xf32>
    %70 = vector.multi_reduction <maximumf>, %69, %cst_42 [1] : vector<8x8xf32> to vector<8xf32>
    %71 = vector.shape_cast %70 : vector<8xf32> to vector<8x1xf32>
    %72 = vector.broadcast %71 : vector<8x1xf32> to vector<8x8xf32>
    %73 = arith.subf %69, %72 : vector<8x8xf32>
    %74 = math.exp %73 : vector<8x8xf32>
    %cst_43 = arith.constant dense<0.000000e+00> : vector<8xf32>
    %75 = vector.multi_reduction <add>, %74, %cst_43 [1] : vector<8x8xf32> to vector<8xf32>
    %76 = vector.shape_cast %75 : vector<8xf32> to vector<8x1xf32>
    %cst_44 = arith.constant dense<0.000000e+00> : vector<8x8xf32>
    %77 = tpu.matmul %74, %66, %cst_44 {dimension_numbers = #tpu.dot_dimension_numbers<[1], [0], [0], [1], [0, 0, 1, 1], [], []>} : vector<8x8xf32>, vector<8x8xf32>, vector<8x8xf32> -> vector<8x8xf32>
    %c0_i32 = arith.constant 0 : i32
    %78 = arith.subi %arg1, %c0_i32 : i32
    %79 = arith.addi %c0_i32, %78 : i32
    %c1_i32 = arith.constant 1 : i32
    %80:3 = scf.for %arg11 = %c0_i32 to %79 step %c1_i32 iter_args(%arg12 = %71, %arg13 = %76, %arg14 = %77) -> (vector<8x1xf32>, vector<8x1xf32>, vector<8x8xf32>)  : i32 {
      %c8_i32_98 = arith.constant 8 : i32
      %174 = arith.muli %arg11, %c8_i32_98 : i32
      %175 = tpu.assume_multiple %174, 8 : i32
      %c0_99 = arith.constant 0 : index
      %c0_100 = arith.constant 0 : index
      %176 = arith.index_cast %175 : i32 to index
      %c0_101 = arith.constant 0 : index
      %177 = vector.load %arg10[%c0_99, %c0_100, %176, %c0_101] : memref<2x4x16x8xf32, #tpu.memory_space<vmem>>, vector<1x1x8x8xf32>
      %178 = vector.shape_cast %177 : vector<1x1x8x8xf32> to vector<8x8xf32>
      %c1_102 = arith.constant 1 : index
      %c0_103 = arith.constant 0 : index
      %179 = arith.index_cast %175 : i32 to index
      %c0_104 = arith.constant 0 : index
      %180 = vector.load %arg10[%c1_102, %c0_103, %179, %c0_104] : memref<2x4x16x8xf32, #tpu.memory_space<vmem>>, vector<1x1x8x8xf32>
      %181 = vector.shape_cast %180 : vector<1x1x8x8xf32> to vector<8x8xf32>
      %cst_105 = arith.constant dense<0.000000e+00> : vector<8x8xf32>
      %182 = tpu.matmul %60, %178, %cst_105 {dimension_numbers = #tpu.dot_dimension_numbers<[1], [1], [0], [0], [0, 0, 1, 0], [], []>} : vector<8x8xf32>, vector<8x8xf32>, vector<8x8xf32> -> vector<8x8xf32>
      %cst_106 = arith.constant dense<0xFF800000> : vector<8xf32>
      %183 = vector.multi_reduction <maximumf>, %182, %cst_106 [1] : vector<8x8xf32> to vector<8xf32>
      %184 = vector.shape_cast %183 : vector<8xf32> to vector<8x1xf32>
      %185 = arith.maximumf %arg12, %184 : vector<8x1xf32>
      %186 = arith.subf %arg12, %185 : vector<8x1xf32>
      %187 = math.exp %186 : vector<8x1xf32>
      %188 = vector.broadcast %185 : vector<8x1xf32> to vector<8x8xf32>
      %189 = arith.subf %182, %188 : vector<8x8xf32>
      %190 = math.exp %189 : vector<8x8xf32>
      %191 = arith.mulf %187, %arg13 : vector<8x1xf32>
      %cst_107 = arith.constant dense<0.000000e+00> : vector<8xf32>
      %192 = vector.multi_reduction <add>, %190, %cst_107 [1] : vector<8x8xf32> to vector<8xf32>
      %193 = vector.shape_cast %192 : vector<8xf32> to vector<8x1xf32>
      %194 = arith.addf %191, %193 : vector<8x1xf32>
      %195 = vector.broadcast %187 : vector<8x1xf32> to vector<8x8xf32>
      %196 = arith.mulf %195, %arg14 : vector<8x8xf32>
      %cst_108 = arith.constant dense<0.000000e+00> : vector<8x8xf32>
      %197 = tpu.matmul %190, %181, %cst_108 {dimension_numbers = #tpu.dot_dimension_numbers<[1], [0], [0], [1], [0, 0, 1, 1], [], []>} : vector<8x8xf32>, vector<8x8xf32>, vector<8x8xf32> -> vector<8x8xf32>
      %198 = arith.addf %196, %197 : vector<8x8xf32>
      scf.yield %185, %194, %198 : vector<8x1xf32>, vector<8x1xf32>, vector<8x8xf32>
    }
    %81 = tpu.reciprocal %80#1 {approx = true} : vector<8x1xf32> -> vector<8x1xf32>
    %82 = vector.broadcast %81 : vector<8x1xf32> to vector<8x8xf32>
    %83 = arith.mulf %80#2, %82 : vector<8x8xf32>
    %c0_45 = arith.constant 0 : index
    %c0_46 = arith.constant 0 : index
    %84 = vector.load %arg7[%c0_45, %c0_46] : memref<32x32xf32, #tpu.memory_space<vmem>>, vector<8x32xf32>
    %cst_47 = arith.constant dense<0.000000e+00> : vector<8x32xf32>
    %85 = tpu.matmul %83, %84, %cst_47 {dimension_numbers = #tpu.dot_dimension_numbers<[1], [0], [0], [1], [0, 0, 1, 1], [], []>} : vector<8x8xf32>, vector<8x32xf32>, vector<8x32xf32> -> vector<8x32xf32>
    %86 = arith.addf %59, %85 : vector<8x32xf32>
    %87 = vector.extract_strided_slice %55 {offsets = [0, 8], sizes = [8, 8], strides = [1, 1]} : vector<8x32xf32> to vector<8x8xf32>
    %c0_48 = arith.constant 0 : index
    %c1_49 = arith.constant 1 : index
    %88 = arith.index_cast %3 : i32 to index
    %c0_50 = arith.constant 0 : index
    %89 = vector.load %arg10[%c0_48, %c1_49, %88, %c0_50] : memref<2x4x16x8xf32, #tpu.memory_space<vmem>>, vector<1x1x8x8xf32>
    %90 = vector.shape_cast %89 : vector<1x1x8x8xf32> to vector<8x8xf32>
    %c1_51 = arith.constant 1 : index
    %c1_52 = arith.constant 1 : index
    %91 = arith.index_cast %3 : i32 to index
    %c0_53 = arith.constant 0 : index
    %92 = vector.load %arg10[%c1_51, %c1_52, %91, %c0_53] : memref<2x4x16x8xf32, #tpu.memory_space<vmem>>, vector<1x1x8x8xf32>
    %93 = vector.shape_cast %92 : vector<1x1x8x8xf32> to vector<8x8xf32>
    %cst_54 = arith.constant dense<0.000000e+00> : vector<8x8xf32>
    %94 = tpu.matmul %87, %90, %cst_54 {dimension_numbers = #tpu.dot_dimension_numbers<[1], [1], [0], [0], [0, 0, 1, 0], [], []>} : vector<8x8xf32>, vector<8x8xf32>, vector<8x8xf32> -> vector<8x8xf32>
    %cst_55 = arith.constant -3.40282347E+38 : f32
    %95 = vector.broadcast %cst_55 : f32 to vector<8x8xf32>
    %96 = arith.select %58, %94, %95 : vector<8x8xi1>, vector<8x8xf32>
    %cst_56 = arith.constant dense<0xFF800000> : vector<8xf32>
    %97 = vector.multi_reduction <maximumf>, %96, %cst_56 [1] : vector<8x8xf32> to vector<8xf32>
    %98 = vector.shape_cast %97 : vector<8xf32> to vector<8x1xf32>
    %99 = vector.broadcast %98 : vector<8x1xf32> to vector<8x8xf32>
    %100 = arith.subf %96, %99 : vector<8x8xf32>
    %101 = math.exp %100 : vector<8x8xf32>
    %cst_57 = arith.constant dense<0.000000e+00> : vector<8xf32>
    %102 = vector.multi_reduction <add>, %101, %cst_57 [1] : vector<8x8xf32> to vector<8xf32>
    %103 = vector.shape_cast %102 : vector<8xf32> to vector<8x1xf32>
    %cst_58 = arith.constant dense<0.000000e+00> : vector<8x8xf32>
    %104 = tpu.matmul %101, %93, %cst_58 {dimension_numbers = #tpu.dot_dimension_numbers<[1], [0], [0], [1], [0, 0, 1, 1], [], []>} : vector<8x8xf32>, vector<8x8xf32>, vector<8x8xf32> -> vector<8x8xf32>
    %c0_i32_59 = arith.constant 0 : i32
    %105 = arith.subi %arg1, %c0_i32_59 : i32
    %106 = arith.addi %c0_i32_59, %105 : i32
    %c1_i32_60 = arith.constant 1 : i32
    %107:3 = scf.for %arg11 = %c0_i32_59 to %106 step %c1_i32_60 iter_args(%arg12 = %98, %arg13 = %103, %arg14 = %104) -> (vector<8x1xf32>, vector<8x1xf32>, vector<8x8xf32>)  : i32 {
      %c8_i32_98 = arith.constant 8 : i32
      %174 = arith.muli %arg11, %c8_i32_98 : i32
      %175 = tpu.assume_multiple %174, 8 : i32
      %c0_99 = arith.constant 0 : index
      %c1_100 = arith.constant 1 : index
      %176 = arith.index_cast %175 : i32 to index
      %c0_101 = arith.constant 0 : index
      %177 = vector.load %arg10[%c0_99, %c1_100, %176, %c0_101] : memref<2x4x16x8xf32, #tpu.memory_space<vmem>>, vector<1x1x8x8xf32>
      %178 = vector.shape_cast %177 : vector<1x1x8x8xf32> to vector<8x8xf32>
      %c1_102 = arith.constant 1 : index
      %c1_103 = arith.constant 1 : index
      %179 = arith.index_cast %175 : i32 to index
      %c0_104 = arith.constant 0 : index
      %180 = vector.load %arg10[%c1_102, %c1_103, %179, %c0_104] : memref<2x4x16x8xf32, #tpu.memory_space<vmem>>, vector<1x1x8x8xf32>
      %181 = vector.shape_cast %180 : vector<1x1x8x8xf32> to vector<8x8xf32>
      %cst_105 = arith.constant dense<0.000000e+00> : vector<8x8xf32>
      %182 = tpu.matmul %87, %178, %cst_105 {dimension_numbers = #tpu.dot_dimension_numbers<[1], [1], [0], [0], [0, 0, 1, 0], [], []>} : vector<8x8xf32>, vector<8x8xf32>, vector<8x8xf32> -> vector<8x8xf32>
      %cst_106 = arith.constant dense<0xFF800000> : vector<8xf32>
      %183 = vector.multi_reduction <maximumf>, %182, %cst_106 [1] : vector<8x8xf32> to vector<8xf32>
      %184 = vector.shape_cast %183 : vector<8xf32> to vector<8x1xf32>
      %185 = arith.maximumf %arg12, %184 : vector<8x1xf32>
      %186 = arith.subf %arg12, %185 : vector<8x1xf32>
      %187 = math.exp %186 : vector<8x1xf32>
      %188 = vector.broadcast %185 : vector<8x1xf32> to vector<8x8xf32>
      %189 = arith.subf %182, %188 : vector<8x8xf32>
      %190 = math.exp %189 : vector<8x8xf32>
      %191 = arith.mulf %187, %arg13 : vector<8x1xf32>
      %cst_107 = arith.constant dense<0.000000e+00> : vector<8xf32>
      %192 = vector.multi_reduction <add>, %190, %cst_107 [1] : vector<8x8xf32> to vector<8xf32>
      %193 = vector.shape_cast %192 : vector<8xf32> to vector<8x1xf32>
      %194 = arith.addf %191, %193 : vector<8x1xf32>
      %195 = vector.broadcast %187 : vector<8x1xf32> to vector<8x8xf32>
      %196 = arith.mulf %195, %arg14 : vector<8x8xf32>
      %cst_108 = arith.constant dense<0.000000e+00> : vector<8x8xf32>
      %197 = tpu.matmul %190, %181, %cst_108 {dimension_numbers = #tpu.dot_dimension_numbers<[1], [0], [0], [1], [0, 0, 1, 1], [], []>} : vector<8x8xf32>, vector<8x8xf32>, vector<8x8xf32> -> vector<8x8xf32>
      %198 = arith.addf %196, %197 : vector<8x8xf32>
      scf.yield %185, %194, %198 : vector<8x1xf32>, vector<8x1xf32>, vector<8x8xf32>
    }
    %108 = tpu.reciprocal %107#1 {approx = true} : vector<8x1xf32> -> vector<8x1xf32>
    %109 = vector.broadcast %108 : vector<8x1xf32> to vector<8x8xf32>
    %110 = arith.mulf %107#2, %109 : vector<8x8xf32>
    %c8 = arith.constant 8 : index
    %c0_61 = arith.constant 0 : index
    %111 = vector.load %arg7[%c8, %c0_61] : memref<32x32xf32, #tpu.memory_space<vmem>>, vector<8x32xf32>
    %cst_62 = arith.constant dense<0.000000e+00> : vector<8x32xf32>
    %112 = tpu.matmul %110, %111, %cst_62 {dimension_numbers = #tpu.dot_dimension_numbers<[1], [0], [0], [1], [0, 0, 1, 1], [], []>} : vector<8x8xf32>, vector<8x32xf32>, vector<8x32xf32> -> vector<8x32xf32>
    %113 = arith.addf %86, %112 : vector<8x32xf32>
    %114 = vector.extract_strided_slice %55 {offsets = [0, 16], sizes = [8, 8], strides = [1, 1]} : vector<8x32xf32> to vector<8x8xf32>
    %c0_63 = arith.constant 0 : index
    %c2_64 = arith.constant 2 : index
    %115 = arith.index_cast %3 : i32 to index
    %c0_65 = arith.constant 0 : index
    %116 = vector.load %arg10[%c0_63, %c2_64, %115, %c0_65] : memref<2x4x16x8xf32, #tpu.memory_space<vmem>>, vector<1x1x8x8xf32>
    %117 = vector.shape_cast %116 : vector<1x1x8x8xf32> to vector<8x8xf32>
    %c1_66 = arith.constant 1 : index
    %c2_67 = arith.constant 2 : index
    %118 = arith.index_cast %3 : i32 to index
    %c0_68 = arith.constant 0 : index
    %119 = vector.load %arg10[%c1_66, %c2_67, %118, %c0_68] : memref<2x4x16x8xf32, #tpu.memory_space<vmem>>, vector<1x1x8x8xf32>
    %120 = vector.shape_cast %119 : vector<1x1x8x8xf32> to vector<8x8xf32>
    %cst_69 = arith.constant dense<0.000000e+00> : vector<8x8xf32>
    %121 = tpu.matmul %114, %117, %cst_69 {dimension_numbers = #tpu.dot_dimension_numbers<[1], [1], [0], [0], [0, 0, 1, 0], [], []>} : vector<8x8xf32>, vector<8x8xf32>, vector<8x8xf32> -> vector<8x8xf32>
    %cst_70 = arith.constant -3.40282347E+38 : f32
    %122 = vector.broadcast %cst_70 : f32 to vector<8x8xf32>
    %123 = arith.select %58, %121, %122 : vector<8x8xi1>, vector<8x8xf32>
    %cst_71 = arith.constant dense<0xFF800000> : vector<8xf32>
    %124 = vector.multi_reduction <maximumf>, %123, %cst_71 [1] : vector<8x8xf32> to vector<8xf32>
    %125 = vector.shape_cast %124 : vector<8xf32> to vector<8x1xf32>
    %126 = vector.broadcast %125 : vector<8x1xf32> to vector<8x8xf32>
    %127 = arith.subf %123, %126 : vector<8x8xf32>
    %128 = math.exp %127 : vector<8x8xf32>
    %cst_72 = arith.constant dense<0.000000e+00> : vector<8xf32>
    %129 = vector.multi_reduction <add>, %128, %cst_72 [1] : vector<8x8xf32> to vector<8xf32>
    %130 = vector.shape_cast %129 : vector<8xf32> to vector<8x1xf32>
    %cst_73 = arith.constant dense<0.000000e+00> : vector<8x8xf32>
    %131 = tpu.matmul %128, %120, %cst_73 {dimension_numbers = #tpu.dot_dimension_numbers<[1], [0], [0], [1], [0, 0, 1, 1], [], []>} : vector<8x8xf32>, vector<8x8xf32>, vector<8x8xf32> -> vector<8x8xf32>
    %c0_i32_74 = arith.constant 0 : i32
    %132 = arith.subi %arg1, %c0_i32_74 : i32
    %133 = arith.addi %c0_i32_74, %132 : i32
    %c1_i32_75 = arith.constant 1 : i32
    %134:3 = scf.for %arg11 = %c0_i32_74 to %133 step %c1_i32_75 iter_args(%arg12 = %125, %arg13 = %130, %arg14 = %131) -> (vector<8x1xf32>, vector<8x1xf32>, vector<8x8xf32>)  : i32 {
      %c8_i32_98 = arith.constant 8 : i32
      %174 = arith.muli %arg11, %c8_i32_98 : i32
      %175 = tpu.assume_multiple %174, 8 : i32
      %c0_99 = arith.constant 0 : index
      %c2_100 = arith.constant 2 : index
      %176 = arith.index_cast %175 : i32 to index
      %c0_101 = arith.constant 0 : index
      %177 = vector.load %arg10[%c0_99, %c2_100, %176, %c0_101] : memref<2x4x16x8xf32, #tpu.memory_space<vmem>>, vector<1x1x8x8xf32>
      %178 = vector.shape_cast %177 : vector<1x1x8x8xf32> to vector<8x8xf32>
      %c1_102 = arith.constant 1 : index
      %c2_103 = arith.constant 2 : index
      %179 = arith.index_cast %175 : i32 to index
      %c0_104 = arith.constant 0 : index
      %180 = vector.load %arg10[%c1_102, %c2_103, %179, %c0_104] : memref<2x4x16x8xf32, #tpu.memory_space<vmem>>, vector<1x1x8x8xf32>
      %181 = vector.shape_cast %180 : vector<1x1x8x8xf32> to vector<8x8xf32>
      %cst_105 = arith.constant dense<0.000000e+00> : vector<8x8xf32>
      %182 = tpu.matmul %114, %178, %cst_105 {dimension_numbers = #tpu.dot_dimension_numbers<[1], [1], [0], [0], [0, 0, 1, 0], [], []>} : vector<8x8xf32>, vector<8x8xf32>, vector<8x8xf32> -> vector<8x8xf32>
      %cst_106 = arith.constant dense<0xFF800000> : vector<8xf32>
      %183 = vector.multi_reduction <maximumf>, %182, %cst_106 [1] : vector<8x8xf32> to vector<8xf32>
      %184 = vector.shape_cast %183 : vector<8xf32> to vector<8x1xf32>
      %185 = arith.maximumf %arg12, %184 : vector<8x1xf32>
      %186 = arith.subf %arg12, %185 : vector<8x1xf32>
      %187 = math.exp %186 : vector<8x1xf32>
      %188 = vector.broadcast %185 : vector<8x1xf32> to vector<8x8xf32>
      %189 = arith.subf %182, %188 : vector<8x8xf32>
      %190 = math.exp %189 : vector<8x8xf32>
      %191 = arith.mulf %187, %arg13 : vector<8x1xf32>
      %cst_107 = arith.constant dense<0.000000e+00> : vector<8xf32>
      %192 = vector.multi_reduction <add>, %190, %cst_107 [1] : vector<8x8xf32> to vector<8xf32>
      %193 = vector.shape_cast %192 : vector<8xf32> to vector<8x1xf32>
      %194 = arith.addf %191, %193 : vector<8x1xf32>
      %195 = vector.broadcast %187 : vector<8x1xf32> to vector<8x8xf32>
      %196 = arith.mulf %195, %arg14 : vector<8x8xf32>
      %cst_108 = arith.constant dense<0.000000e+00> : vector<8x8xf32>
      %197 = tpu.matmul %190, %181, %cst_108 {dimension_numbers = #tpu.dot_dimension_numbers<[1], [0], [0], [1], [0, 0, 1, 1], [], []>} : vector<8x8xf32>, vector<8x8xf32>, vector<8x8xf32> -> vector<8x8xf32>
      %198 = arith.addf %196, %197 : vector<8x8xf32>
      scf.yield %185, %194, %198 : vector<8x1xf32>, vector<8x1xf32>, vector<8x8xf32>
    }
    %135 = tpu.reciprocal %134#1 {approx = true} : vector<8x1xf32> -> vector<8x1xf32>
    %136 = vector.broadcast %135 : vector<8x1xf32> to vector<8x8xf32>
    %137 = arith.mulf %134#2, %136 : vector<8x8xf32>
    %c16 = arith.constant 16 : index
    %c0_76 = arith.constant 0 : index
    %138 = vector.load %arg7[%c16, %c0_76] : memref<32x32xf32, #tpu.memory_space<vmem>>, vector<8x32xf32>
    %cst_77 = arith.constant dense<0.000000e+00> : vector<8x32xf32>
    %139 = tpu.matmul %137, %138, %cst_77 {dimension_numbers = #tpu.dot_dimension_numbers<[1], [0], [0], [1], [0, 0, 1, 1], [], []>} : vector<8x8xf32>, vector<8x32xf32>, vector<8x32xf32> -> vector<8x32xf32>
    %140 = arith.addf %113, %139 : vector<8x32xf32>
    %141 = vector.extract_strided_slice %55 {offsets = [0, 24], sizes = [8, 8], strides = [1, 1]} : vector<8x32xf32> to vector<8x8xf32>
    %c0_78 = arith.constant 0 : index
    %c3_79 = arith.constant 3 : index
    %142 = arith.index_cast %3 : i32 to index
    %c0_80 = arith.constant 0 : index
    %143 = vector.load %arg10[%c0_78, %c3_79, %142, %c0_80] : memref<2x4x16x8xf32, #tpu.memory_space<vmem>>, vector<1x1x8x8xf32>
    %144 = vector.shape_cast %143 : vector<1x1x8x8xf32> to vector<8x8xf32>
    %c1_81 = arith.constant 1 : index
    %c3_82 = arith.constant 3 : index
    %145 = arith.index_cast %3 : i32 to index
    %c0_83 = arith.constant 0 : index
    %146 = vector.load %arg10[%c1_81, %c3_82, %145, %c0_83] : memref<2x4x16x8xf32, #tpu.memory_space<vmem>>, vector<1x1x8x8xf32>
    %147 = vector.shape_cast %146 : vector<1x1x8x8xf32> to vector<8x8xf32>
    %cst_84 = arith.constant dense<0.000000e+00> : vector<8x8xf32>
    %148 = tpu.matmul %141, %144, %cst_84 {dimension_numbers = #tpu.dot_dimension_numbers<[1], [1], [0], [0], [0, 0, 1, 0], [], []>} : vector<8x8xf32>, vector<8x8xf32>, vector<8x8xf32> -> vector<8x8xf32>
    %cst_85 = arith.constant -3.40282347E+38 : f32
    %149 = vector.broadcast %cst_85 : f32 to vector<8x8xf32>
    %150 = arith.select %58, %148, %149 : vector<8x8xi1>, vector<8x8xf32>
    %cst_86 = arith.constant dense<0xFF800000> : vector<8xf32>
    %151 = vector.multi_reduction <maximumf>, %150, %cst_86 [1] : vector<8x8xf32> to vector<8xf32>
    %152 = vector.shape_cast %151 : vector<8xf32> to vector<8x1xf32>
    %153 = vector.broadcast %152 : vector<8x1xf32> to vector<8x8xf32>
    %154 = arith.subf %150, %153 : vector<8x8xf32>
    %155 = math.exp %154 : vector<8x8xf32>
    %cst_87 = arith.constant dense<0.000000e+00> : vector<8xf32>
    %156 = vector.multi_reduction <add>, %155, %cst_87 [1] : vector<8x8xf32> to vector<8xf32>
    %157 = vector.shape_cast %156 : vector<8xf32> to vector<8x1xf32>
    %cst_88 = arith.constant dense<0.000000e+00> : vector<8x8xf32>
    %158 = tpu.matmul %155, %147, %cst_88 {dimension_numbers = #tpu.dot_dimension_numbers<[1], [0], [0], [1], [0, 0, 1, 1], [], []>} : vector<8x8xf32>, vector<8x8xf32>, vector<8x8xf32> -> vector<8x8xf32>
    %c0_i32_89 = arith.constant 0 : i32
    %159 = arith.subi %arg1, %c0_i32_89 : i32
    %160 = arith.addi %c0_i32_89, %159 : i32
    %c1_i32_90 = arith.constant 1 : i32
    %161:3 = scf.for %arg11 = %c0_i32_89 to %160 step %c1_i32_90 iter_args(%arg12 = %152, %arg13 = %157, %arg14 = %158) -> (vector<8x1xf32>, vector<8x1xf32>, vector<8x8xf32>)  : i32 {
      %c8_i32_98 = arith.constant 8 : i32
      %174 = arith.muli %arg11, %c8_i32_98 : i32
      %175 = tpu.assume_multiple %174, 8 : i32
      %c0_99 = arith.constant 0 : index
      %c3_100 = arith.constant 3 : index
      %176 = arith.index_cast %175 : i32 to index
      %c0_101 = arith.constant 0 : index
      %177 = vector.load %arg10[%c0_99, %c3_100, %176, %c0_101] : memref<2x4x16x8xf32, #tpu.memory_space<vmem>>, vector<1x1x8x8xf32>
      %178 = vector.shape_cast %177 : vector<1x1x8x8xf32> to vector<8x8xf32>
      %c1_102 = arith.constant 1 : index
      %c3_103 = arith.constant 3 : index
      %179 = arith.index_cast %175 : i32 to index
      %c0_104 = arith.constant 0 : index
      %180 = vector.load %arg10[%c1_102, %c3_103, %179, %c0_104] : memref<2x4x16x8xf32, #tpu.memory_space<vmem>>, vector<1x1x8x8xf32>
      %181 = vector.shape_cast %180 : vector<1x1x8x8xf32> to vector<8x8xf32>
      %cst_105 = arith.constant dense<0.000000e+00> : vector<8x8xf32>
      %182 = tpu.matmul %141, %178, %cst_105 {dimension_numbers = #tpu.dot_dimension_numbers<[1], [1], [0], [0], [0, 0, 1, 0], [], []>} : vector<8x8xf32>, vector<8x8xf32>, vector<8x8xf32> -> vector<8x8xf32>
      %cst_106 = arith.constant dense<0xFF800000> : vector<8xf32>
      %183 = vector.multi_reduction <maximumf>, %182, %cst_106 [1] : vector<8x8xf32> to vector<8xf32>
      %184 = vector.shape_cast %183 : vector<8xf32> to vector<8x1xf32>
      %185 = arith.maximumf %arg12, %184 : vector<8x1xf32>
      %186 = arith.subf %arg12, %185 : vector<8x1xf32>
      %187 = math.exp %186 : vector<8x1xf32>
      %188 = vector.broadcast %185 : vector<8x1xf32> to vector<8x8xf32>
      %189 = arith.subf %182, %188 : vector<8x8xf32>
      %190 = math.exp %189 : vector<8x8xf32>
      %191 = arith.mulf %187, %arg13 : vector<8x1xf32>
      %cst_107 = arith.constant dense<0.000000e+00> : vector<8xf32>
      %192 = vector.multi_reduction <add>, %190, %cst_107 [1] : vector<8x8xf32> to vector<8xf32>
      %193 = vector.shape_cast %192 : vector<8xf32> to vector<8x1xf32>
      %194 = arith.addf %191, %193 : vector<8x1xf32>
      %195 = vector.broadcast %187 : vector<8x1xf32> to vector<8x8xf32>
      %196 = arith.mulf %195, %arg14 : vector<8x8xf32>
      %cst_108 = arith.constant dense<0.000000e+00> : vector<8x8xf32>
      %197 = tpu.matmul %190, %181, %cst_108 {dimension_numbers = #tpu.dot_dimension_numbers<[1], [0], [0], [1], [0, 0, 1, 1], [], []>} : vector<8x8xf32>, vector<8x8xf32>, vector<8x8xf32> -> vector<8x8xf32>
      %198 = arith.addf %196, %197 : vector<8x8xf32>
      scf.yield %185, %194, %198 : vector<8x1xf32>, vector<8x1xf32>, vector<8x8xf32>
    }
    %162 = tpu.reciprocal %161#1 {approx = true} : vector<8x1xf32> -> vector<8x1xf32>
    %163 = vector.broadcast %162 : vector<8x1xf32> to vector<8x8xf32>
    %164 = arith.mulf %161#2, %163 : vector<8x8xf32>
    %c24 = arith.constant 24 : index
    %c0_91 = arith.constant 0 : index
    %165 = vector.load %arg7[%c24, %c0_91] : memref<32x32xf32, #tpu.memory_space<vmem>>, vector<8x32xf32>
    %cst_92 = arith.constant dense<0.000000e+00> : vector<8x32xf32>
    %166 = tpu.matmul %164, %165, %cst_92 {dimension_numbers = #tpu.dot_dimension_numbers<[1], [0], [0], [1], [0, 0, 1, 1], [], []>} : vector<8x8xf32>, vector<8x32xf32>, vector<8x32xf32> -> vector<8x32xf32>
    %167 = arith.addf %140, %166 : vector<8x32xf32>
    %c0_93 = arith.constant 0 : index
    %c0_94 = arith.constant 0 : index
    %168 = vector.load %arg8[%c0_93, %c0_94] : memref<1x32xf32, #tpu.memory_space<vmem>>, vector<1x32xf32>
    %169 = vector.broadcast %168 : vector<1x32xf32> to vector<8x32xf32>
    %170 = arith.addf %167, %169 : vector<8x32xf32>
    %c0_95 = arith.constant 0 : index
    %c0_96 = arith.constant 0 : index
    %c0_97 = arith.constant 0 : index
    %171 = vector.load %arg9[%c0_95, %c0_96, %c0_97] : memref<1x8x32xf32, #tpu.memory_space<vmem>>, vector<1x8x32xf32>
    %172 = vector.shape_cast %171 : vector<1x8x32xf32> to vector<8x32xf32>
    %173 = vector.shape_cast %170 : vector<8x32xf32> to vector<1x8x32xf32>
    tpu.vector_store %arg9[%c0_95, %c0_96, %c0_97], %173 {strides = array<i32>} : memref<1x8x32xf32, #tpu.memory_space<vmem>>, vector<1x8x32xf32>,
    return
  }
  func.func @transform_0(%arg0: i32, %arg1: i32) -> (i32, i32, i32) {
    %c0_i32 = arith.constant 0 : i32
    %c0_i32_0 = arith.constant 0 : i32
    return %arg0, %arg1, %c0_i32 : i32, i32, i32
  }
  func.func @transform_1(%arg0: i32, %arg1: i32) -> (i32, i32) {
    %c0_i32 = arith.constant 0 : i32
    %c0_i32_0 = arith.constant 0 : i32
    %c0_i32_1 = arith.constant 0 : i32
    return %c0_i32, %c0_i32_0 : i32, i32
  }
  func.func @transform_2(%arg0: i32, %arg1: i32) -> (i32, i32) {
    %c0_i32 = arith.constant 0 : i32
    %c0_i32_0 = arith.constant 0 : i32
    %c0_i32_1 = arith.constant 0 : i32
    return %c0_i32, %c0_i32_0 : i32, i32
  }
  func.func @transform_3(%arg0: i32, %arg1: i32) -> (i32, i32) {
    %c0_i32 = arith.constant 0 : i32
    %c0_i32_0 = arith.constant 0 : i32
    %c0_i32_1 = arith.constant 0 : i32
    return %c0_i32, %c0_i32_0 : i32, i32
  }
  func.func @transform_4(%arg0: i32, %arg1: i32) -> (i32, i32) {
    %c0_i32 = arith.constant 0 : i32
    %c0_i32_0 = arith.constant 0 : i32
    %c0_i32_1 = arith.constant 0 : i32
    return %c0_i32, %c0_i32_0 : i32, i32
  }
  func.func @transform_5(%arg0: i32, %arg1: i32) -> (i32, i32) {
    %c0_i32 = arith.constant 0 : i32
    %c0_i32_0 = arith.constant 0 : i32
    %c0_i32_1 = arith.constant 0 : i32
    return %c0_i32, %c0_i32_0 : i32, i32
  }
  func.func @transform_6(%arg0: i32, %arg1: i32) -> (i32, i32) {
    %c0_i32 = arith.constant 0 : i32
    %c0_i32_0 = arith.constant 0 : i32
    %c0_i32_1 = arith.constant 0 : i32
    return %c0_i32, %c0_i32_0 : i32, i32
  }
  func.func @transform_7(%arg0: i32, %arg1: i32) -> (i32, i32, i32) {
    %c0_i32 = arith.constant 0 : i32
    %c0_i32_0 = arith.constant 0 : i32
    return %arg0, %arg1, %c0_i32 : i32, i32, i32
  }
}

module attributes {stable_mosaic.version = 11 : i64} {
  func.func @_attn_kernel(%arg0: i32, %arg1: i32, %arg2: memref<1x8x32xf32, #tpu.memory_space<vmem>>, %arg3: memref<32x32xf32, #tpu.memory_space<vmem>>, %arg4: memref<1x32xf32, #tpu.memory_space<vmem>>, %arg5: memref<32x64xf32, #tpu.memory_space<vmem>>, %arg6: memref<1x64xf32, #tpu.memory_space<vmem>>, %arg7: memref<32x32xf32, #tpu.memory_space<vmem>>, %arg8: memref<1x32xf32, #tpu.memory_space<vmem>>, %arg9: memref<1x8x32xf32, #tpu.memory_space<vmem>>, %arg10: memref<2x4x16x8xf32, #tpu.memory_space<vmem>>) attributes {dimension_semantics = [#tpu.dimension_semantics<parallel>, #tpu.dimension_semantics<arbitrary>], iteration_bounds = array<i64: 2, 2>, scalar_prefetch = 0 : i64, scratch_operands = 1 : i64, tpu.core_type = #tpu.core_type<tc>, window_params = [{transform_indices = @transform_0, window_bounds = array<i64: 1, 8, 32>}, {pipeline_mode = #tpu.pipeline_mode<synchronous>, transform_indices = @transform_1, window_bounds = array<i64: 32, 32>}, {pipeline_mode = #tpu.pipeline_mode<synchronous>, transform_indices = @transform_2, window_bounds = array<i64: 1, 32>}, {pipeline_mode = #tpu.pipeline_mode<synchronous>, transform_indices = @transform_3, window_bounds = array<i64: 32, 64>}, {pipeline_mode = #tpu.pipeline_mode<synchronous>, transform_indices = @transform_4, window_bounds = array<i64: 1, 64>}, {pipeline_mode = #tpu.pipeline_mode<synchronous>, transform_indices = @transform_5, window_bounds = array<i64: 32, 32>}, {pipeline_mode = #tpu.pipeline_mode<synchronous>, transform_indices = @transform_6, window_bounds = array<i64: 1, 32>}, {transform_indices = @transform_7, window_bounds = array<i64: 1, 8, 32>}]} {
    %c0 = arith.constant 0 : index
    %c0_0 = arith.constant 0 : index
    %c0_1 = arith.constant 0 : index
    %0 = vector.load %arg2[%c0, %c0_0, %c0_1] : memref<1x8x32xf32, #tpu.memory_space<vmem>>, vector<1x8x32xf32>
    %1 = vector.shape_cast %0 : vector<1x8x32xf32> to vector<8x32xf32>
    %c8_i32 = arith.constant 8 : i32
    %2 = arith.muli %arg1, %c8_i32 : i32
    %3 = tpu.assume_multiple %2, 8 : i32
    %c0_2 = arith.constant 0 : index
    %c0_3 = arith.constant 0 : index
    %4 = vector.load %arg5[%c0_2, %c0_3] : memref<32x64xf32, #tpu.memory_space<vmem>>, vector<32x64xf32>
    %cst = arith.constant dense<0.000000e+00> : vector<8x64xf32>
    %5 = tpu.matmul %1, %4, %cst {dimension_numbers = #tpu.dot_dimension_numbers<[1], [0], [0], [1], [0, 0, 1, 1], [], []>} : vector<8x32xf32>, vector<32x64xf32>, vector<8x64xf32> -> vector<8x64xf32>
    %c0_4 = arith.constant 0 : index
    %c0_5 = arith.constant 0 : index
    %6 = vector.load %arg6[%c0_4, %c0_5] : memref<1x64xf32, #tpu.memory_space<vmem>>, vector<1x64xf32>
    %7 = vector.broadcast %6 : vector<1x64xf32> to vector<8x64xf32>
    %8 = arith.addf %5, %7 : vector<8x64xf32>
    %9 = vector.extract_strided_slice %8 {offsets = [0, 0], sizes = [8, 8], strides = [1, 1]} : vector<8x64xf32> to vector<8x8xf32>
    %c0_6 = arith.constant 0 : index
    %c0_7 = arith.constant 0 : index
    %10 = arith.index_cast %3 : i32 to index
    %c0_8 = arith.constant 0 : index
    %11 = vector.load %arg10[%c0_6, %c0_7, %10, %c0_8] : memref<2x4x16x8xf32, #tpu.memory_space<vmem>>, vector<1x1x8x8xf32>
    %12 = vector.shape_cast %11 : vector<1x1x8x8xf32> to vector<8x8xf32>
    %13 = vector.shape_cast %9 : vector<8x8xf32> to vector<1x1x8x8xf32>
    tpu.vector_store %arg10[%c0_6, %c0_7, %10, %c0_8], %13 {strides = array<i32>} : memref<2x4x16x8xf32, #tpu.memory_space<vmem>>, vector<1x1x8x8xf32>,
    %14 = vector.extract_strided_slice %8 {offsets = [0, 32], sizes = [8, 8], strides = [1, 1]} : vector<8x64xf32> to vector<8x8xf32>
    %c1 = arith.constant 1 : index
    %c0_9 = arith.constant 0 : index
    %15 = arith.index_cast %3 : i32 to index
    %c0_10 = arith.constant 0 : index
    %16 = vector.load %arg10[%c1, %c0_9, %15, %c0_10] : memref<2x4x16x8xf32, #tpu.memory_space<vmem>>, vector<1x1x8x8xf32>
    %17 = vector.shape_cast %16 : vector<1x1x8x8xf32> to vector<8x8xf32>
    %18 = vector.shape_cast %14 : vector<8x8xf32> to vector<1x1x8x8xf32>
    tpu.vector_store %arg10[%c1, %c0_9, %15, %c0_10], %18 {strides = array<i32>} : memref<2x4x16x8xf32, #tpu.memory_space<vmem>>, vector<1x1x8x8xf32>,
    %19 = vector.extract_strided_slice %8 {offsets = [0, 8], sizes = [8, 8], strides = [1, 1]} : vector<8x64xf32> to vector<8x8xf32>
    %c0_11 = arith.constant 0 : index
    %c1_12 = arith.constant 1 : index
    %20 = arith.index_cast %3 : i32 to index
    %c0_13 = arith.constant 0 : index
    %21 = vector.load %arg10[%c0_11, %c1_12, %20, %c0_13] : memref<2x4x16x8xf32, #tpu.memory_space<vmem>>, vector<1x1x8x8xf32>
    %22 = vector.shape_cast %21 : vector<1x1x8x8xf32> to vector<8x8xf32>
    %23 = vector.shape_cast %19 : vector<8x8xf32> to vector<1x1x8x8xf32>
    tpu.vector_store %arg10[%c0_11, %c1_12, %20, %c0_13], %23 {strides = array<i32>} : memref<2x4x16x8xf32, #tpu.memory_space<vmem>>, vector<1x1x8x8xf32>,
    %24 = vector.extract_strided_slice %8 {offsets = [0, 40], sizes = [8, 8], strides = [1, 1]} : vector<8x64xf32> to vector<8x8xf32>
    %c1_14 = arith.constant 1 : index
    %c1_15 = arith.constant 1 : index
    %25 = arith.index_cast %3 : i32 to index
    %c0_16 = arith.constant 0 : index
    %26 = vector.load %arg10[%c1_14, %c1_15, %25, %c0_16] : memref<2x4x16x8xf32, #tpu.memory_space<vmem>>, vector<1x1x8x8xf32>
    %27 = vector.shape_cast %26 : vector<1x1x8x8xf32> to vector<8x8xf32>
    %28 = vector.shape_cast %24 : vector<8x8xf32> to vector<1x1x8x8xf32>
    tpu.vector_store %arg10[%c1_14, %c1_15, %25, %c0_16], %28 {strides = array<i32>} : memref<2x4x16x8xf32, #tpu.memory_space<vmem>>, vector<1x1x8x8xf32>,
    %29 = vector.extract_strided_slice %8 {offsets = [0, 16], sizes = [8, 8], strides = [1, 1]} : vector<8x64xf32> to vector<8x8xf32>
    %c0_17 = arith.constant 0 : index
    %c2 = arith.constant 2 : index
    %30 = arith.index_cast %3 : i32 to index
    %c0_18 = arith.constant 0 : index
    %31 = vector.load %arg10[%c0_17, %c2, %30, %c0_18] : memref<2x4x16x8xf32, #tpu.memory_space<vmem>>, vector<1x1x8x8xf32>
    %32 = vector.shape_cast %31 : vector<1x1x8x8xf32> to vector<8x8xf32>
    %33 = vector.shape_cast %29 : vector<8x8xf32> to vector<1x1x8x8xf32>
    tpu.vector_store %arg10[%c0_17, %c2, %30, %c0_18], %33 {strides = array<i32>} : memref<2x4x16x8xf32, #tpu.memory_space<vmem>>, vector<1x1x8x8xf32>,
    %34 = vector.extract_strided_slice %8 {offsets = [0, 48], sizes = [8, 8], strides = [1, 1]} : vector<8x64xf32> to vector<8x8xf32>
    %c1_19 = arith.constant 1 : index
    %c2_20 = arith.constant 2 : index
    %35 = arith.index_cast %3 : i32 to index
    %c0_21 = arith.constant 0 : index
    %36 = vector.load %arg10[%c1_19, %c2_20, %35, %c0_21] : memref<2x4x16x8xf32, #tpu.memory_space<vmem>>, vector<1x1x8x8xf32>
    %37 = vector.shape_cast %36 : vector<1x1x8x8xf32> to vector<8x8xf32>
    %38 = vector.shape_cast %34 : vector<8x8xf32> to vector<1x1x8x8xf32>
    tpu.vector_store %arg10[%c1_19, %c2_20, %35, %c0_21], %38 {strides = array<i32>} : memref<2x4x16x8xf32, #tpu.memory_space<vmem>>, vector<1x1x8x8xf32>,
    %39 = vector.extract_strided_slice %8 {offsets = [0, 24], sizes = [8, 8], strides = [1, 1]} : vector<8x64xf32> to vector<8x8xf32>
    %c0_22 = arith.constant 0 : index
    %c3 = arith.constant 3 : index
    %40 = arith.index_cast %3 : i32 to index
    %c0_23 = arith.constant 0 : index
    %41 = vector.load %arg10[%c0_22, %c3, %40, %c0_23] : memref<2x4x16x8xf32, #tpu.memory_space<vmem>>, vector<1x1x8x8xf32>
    %42 = vector.shape_cast %41 : vector<1x1x8x8xf32> to vector<8x8xf32>
    %43 = vector.shape_cast %39 : vector<8x8xf32> to vector<1x1x8x8xf32>
    tpu.vector_store %arg10[%c0_22, %c3, %40, %c0_23], %43 {strides = array<i32>} : memref<2x4x16x8xf32, #tpu.memory_space<vmem>>, vector<1x1x8x8xf32>,
    %44 = vector.extract_strided_slice %8 {offsets = [0, 56], sizes = [8, 8], strides = [1, 1]} : vector<8x64xf32> to vector<8x8xf32>
    %c1_24 = arith.constant 1 : index
    %c3_25 = arith.constant 3 : index
    %45 = arith.index_cast %3 : i32 to index
    %c0_26 = arith.constant 0 : index
    %46 = vector.load %arg10[%c1_24, %c3_25, %45, %c0_26] : memref<2x4x16x8xf32, #tpu.memory_space<vmem>>, vector<1x1x8x8xf32>
    %47 = vector.shape_cast %46 : vector<1x1x8x8xf32> to vector<8x8xf32>
    %48 = vector.shape_cast %44 : vector<8x8xf32> to vector<1x1x8x8xf32>
    tpu.vector_store %arg10[%c1_24, %c3_25, %45, %c0_26], %48 {strides = array<i32>} : memref<2x4x16x8xf32, #tpu.memory_space<vmem>>, vector<1x1x8x8xf32>,
    %c0_27 = arith.constant 0 : index
    %c0_28 = arith.constant 0 : index
    %49 = vector.load %arg3[%c0_27, %c0_28] : memref<32x32xf32, #tpu.memory_space<vmem>>, vector<32x32xf32>
    %cst_29 = arith.constant dense<0.000000e+00> : vector<8x32xf32>
    %50 = tpu.matmul %1, %49, %cst_29 {dimension_numbers = #tpu.dot_dimension_numbers<[1], [0], [0], [1], [0, 0, 1, 1], [], []>} : vector<8x32xf32>, vector<32x32xf32>, vector<8x32xf32> -> vector<8x32xf32>
    %c0_30 = arith.constant 0 : index
    %c0_31 = arith.constant 0 : index
    %51 = vector.load %arg4[%c0_30, %c0_31] : memref<1x32xf32, #tpu.memory_space<vmem>>, vector<1x32xf32>
    %52 = vector.broadcast %51 : vector<1x32xf32> to vector<8x32xf32>
    %53 = arith.addf %50, %52 : vector<8x32xf32>
    %cst_32 = arith.constant 0.353553385 : f32
    %54 = vector.broadcast %cst_32 : f32 to vector<8x32xf32>
    %55 = arith.mulf %53, %54 : vector<8x32xf32>
    %56 = tpu.iota {dimensions = array<i32: 0>} : vector<8x8xi32>
    %57 = tpu.iota {dimensions = array<i32: 1>} : vector<8x8xi32>
    %58 = arith.cmpi sle, %57, %56 : vector<8x8xi32>
    %cst_33 = arith.constant 0.000000e+00 : f32
    %59 = vector.broadcast %cst_33 : f32 to vector<8x32xf32>
    %60 = vector.extract_strided_slice %55 {offsets = [0, 0], sizes = [8, 8], strides = [1, 1]} : vector<8x32xf32> to vector<8x8xf32>
    %c0_34 = arith.constant 0 : index
    %c0_35 = arith.constant 0 : index
    %61 = arith.index_cast %3 : i32 to index
    %c0_36 = arith.constant 0 : index
    %62 = vector.load %arg10[%c0_34, %c0_35, %61, %c0_36] : memref<2x4x16x8xf32, #tpu.memory_space<vmem>>, vector<1x1x8x8xf32>
    %63 = vector.shape_cast %62 : vector<1x1x8x8xf32> to vector<8x8xf32>
    %c1_37 = arith.constant 1 : index
    %c0_38 = arith.constant 0 : index
    %64 = arith.index_cast %3 : i32 to index
    %c0_39 = arith.constant 0 : index
    %65 = vector.load %arg10[%c1_37, %c0_38, %64, %c0_39] : memref<2x4x16x8xf32, #tpu.memory_space<vmem>>, vector<1x1x8x8xf32>
    %66 = vector.shape_cast %65 : vector<1x1x8x8xf32> to vector<8x8xf32>
    %cst_40 = arith.constant dense<0.000000e+00> : vector<8x8xf32>
    %67 = tpu.matmul %60, %63, %cst_40 {dimension_numbers = #tpu.dot_dimension_numbers<[1], [1], [0], [0], [0, 0, 1, 0], [], []>} : vector<8x8xf32>, vector<8x8xf32>, vector<8x8xf32> -> vector<8x8xf32>
    %cst_41 = arith.constant -3.40282347E+38 : f32
    %68 = vector.broadcast %cst_41 : f32 to vector<8x8xf32>
    %69 = arith.select %58, %67, %68 : vector<8x8xi1>, vector<8x8xf32>
    %cst_42 = arith.constant dense<0xFF800000> : vector<8xf32>
    %70 = vector.multi_reduction <maximumf>, %69, %cst_42 [1] : vector<8x8xf32> to vector<8xf32>
    %71 = vector.shape_cast %70 : vector<8xf32> to vector<8x1xf32>
    %72 = vector.broadcast %71 : vector<8x1xf32> to vector<8x8xf32>
    %73 = arith.subf %69, %72 : vector<8x8xf32>
    %74 = math.exp %73 : vector<8x8xf32>
    %cst_43 = arith.constant dense<0.000000e+00> : vector<8xf32>
    %75 = vector.multi_reduction <add>, %74, %cst_43 [1] : vector<8x8xf32> to vector<8xf32>
    %76 = vector.shape_cast %75 : vector<8xf32> to vector<8x1xf32>
    %cst_44 = arith.constant dense<0.000000e+00> : vector<8x8xf32>
    %77 = tpu.matmul %74, %66, %cst_44 {dimension_numbers = #tpu.dot_dimension_numbers<[1], [0], [0], [1], [0, 0, 1, 1], [], []>} : vector<8x8xf32>, vector<8x8xf32>, vector<8x8xf32> -> vector<8x8xf32>
    %c0_i32 = arith.constant 0 : i32
    %78 = arith.subi %arg1, %c0_i32 : i32
    %79 = arith.addi %c0_i32, %78 : i32
    %c1_i32 = arith.constant 1 : i32
    %80:3 = scf.for %arg11 = %c0_i32 to %79 step %c1_i32 iter_args(%arg12 = %71, %arg13 = %76, %arg14 = %77) -> (vector<8x1xf32>, vector<8x1xf32>, vector<8x8xf32>)  : i32 {
      %c8_i32_98 = arith.constant 8 : i32
      %174 = arith.muli %arg11, %c8_i32_98 : i32
      %175 = tpu.assume_multiple %174, 8 : i32
      %c0_99 = arith.constant 0 : index
      %c0_100 = arith.constant 0 : index
      %176 = arith.index_cast %175 : i32 to index
      %c0_101 = arith.constant 0 : index
      %177 = vector.load %arg10[%c0_99, %c0_100, %176, %c0_101] : memref<2x4x16x8xf32, #tpu.memory_space<vmem>>, vector<1x1x8x8xf32>
      %178 = vector.shape_cast %177 : vector<1x1x8x8xf32> to vector<8x8xf32>
      %c1_102 = arith.constant 1 : index
      %c0_103 = arith.constant 0 : index
      %179 = arith.index_cast %175 : i32 to index
      %c0_104 = arith.constant 0 : index
      %180 = vector.load %arg10[%c1_102, %c0_103, %179, %c0_104] : memref<2x4x16x8xf32, #tpu.memory_space<vmem>>, vector<1x1x8x8xf32>
      %181 = vector.shape_cast %180 : vector<1x1x8x8xf32> to vector<8x8xf32>
      %cst_105 = arith.constant dense<0.000000e+00> : vector<8x8xf32>
      %182 = tpu.matmul %60, %178, %cst_105 {dimension_numbers = #tpu.dot_dimension_numbers<[1], [1], [0], [0], [0, 0, 1, 0], [], []>} : vector<8x8xf32>, vector<8x8xf32>, vector<8x8xf32> -> vector<8x8xf32>
      %cst_106 = arith.constant dense<0xFF800000> : vector<8xf32>
      %183 = vector.multi_reduction <maximumf>, %182, %cst_106 [1] : vector<8x8xf32> to vector<8xf32>
      %184 = vector.shape_cast %183 : vector<8xf32> to vector<8x1xf32>
      %185 = arith.maximumf %arg12, %184 : vector<8x1xf32>
      %186 = arith.subf %arg12, %185 : vector<8x1xf32>
      %187 = math.exp %186 : vector<8x1xf32>
      %188 = vector.broadcast %185 : vector<8x1xf32> to vector<8x8xf32>
      %189 = arith.subf %182, %188 : vector<8x8xf32>
      %190 = math.exp %189 : vector<8x8xf32>
      %191 = arith.mulf %187, %arg13 : vector<8x1xf32>
      %cst_107 = arith.constant dense<0.000000e+00> : vector<8xf32>
      %192 = vector.multi_reduction <add>, %190, %cst_107 [1] : vector<8x8xf32> to vector<8xf32>
      %193 = vector.shape_cast %192 : vector<8xf32> to vector<8x1xf32>
      %194 = arith.addf %191, %193 : vector<8x1xf32>
      %195 = vector.broadcast %187 : vector<8x1xf32> to vector<8x8xf32>
      %196 = arith.mulf %195, %arg14 : vector<8x8xf32>
      %cst_108 = arith.constant dense<0.000000e+00> : vector<8x8xf32>
      %197 = tpu.matmul %190, %181, %cst_108 {dimension_numbers = #tpu.dot_dimension_numbers<[1], [0], [0], [1], [0, 0, 1, 1], [], []>} : vector<8x8xf32>, vector<8x8xf32>, vector<8x8xf32> -> vector<8x8xf32>
      %198 = arith.addf %196, %197 : vector<8x8xf32>
      scf.yield %185, %194, %198 : vector<8x1xf32>, vector<8x1xf32>, vector<8x8xf32>
    }
    %81 = tpu.reciprocal %80#1 {approx = true} : vector<8x1xf32> -> vector<8x1xf32>
    %82 = vector.broadcast %81 : vector<8x1xf32> to vector<8x8xf32>
    %83 = arith.mulf %80#2, %82 : vector<8x8xf32>
    %c0_45 = arith.constant 0 : index
    %c0_46 = arith.constant 0 : index
    %84 = vector.load %arg7[%c0_45, %c0_46] : memref<32x32xf32, #tpu.memory_space<vmem>>, vector<8x32xf32>
    %cst_47 = arith.constant dense<0.000000e+00> : vector<8x32xf32>
    %85 = tpu.matmul %83, %84, %cst_47 {dimension_numbers = #tpu.dot_dimension_numbers<[1], [0], [0], [1], [0, 0, 1, 1], [], []>} : vector<8x8xf32>, vector<8x32xf32>, vector<8x32xf32> -> vector<8x32xf32>
    %86 = arith.addf %59, %85 : vector<8x32xf32>
    %87 = vector.extract_strided_slice %55 {offsets = [0, 8], sizes = [8, 8], strides = [1, 1]} : vector<8x32xf32> to vector<8x8xf32>
    %c0_48 = arith.constant 0 : index
    %c1_49 = arith.constant 1 : index
    %88 = arith.index_cast %3 : i32 to index
    %c0_50 = arith.constant 0 : index
    %89 = vector.load %arg10[%c0_48, %c1_49, %88, %c0_50] : memref<2x4x16x8xf32, #tpu.memory_space<vmem>>, vector<1x1x8x8xf32>
    %90 = vector.shape_cast %89 : vector<1x1x8x8xf32> to vector<8x8xf32>
    %c1_51 = arith.constant 1 : index
    %c1_52 = arith.constant 1 : index
    %91 = arith.index_cast %3 : i32 to index
    %c0_53 = arith.constant 0 : index
    %92 = vector.load %arg10[%c1_51, %c1_52, %91, %c0_53] : memref<2x4x16x8xf32, #tpu.memory_space<vmem>>, vector<1x1x8x8xf32>
    %93 = vector.shape_cast %92 : vector<1x1x8x8xf32> to vector<8x8xf32>
    %cst_54 = arith.constant dense<0.000000e+00> : vector<8x8xf32>
    %94 = tpu.matmul %87, %90, %cst_54 {dimension_numbers = #tpu.dot_dimension_numbers<[1], [1], [0], [0], [0, 0, 1, 0], [], []>} : vector<8x8xf32>, vector<8x8xf32>, vector<8x8xf32> -> vector<8x8xf32>
    %cst_55 = arith.constant -3.40282347E+38 : f32
    %95 = vector.broadcast %cst_55 : f32 to vector<8x8xf32>
    %96 = arith.select %58, %94, %95 : vector<8x8xi1>, vector<8x8xf32>
    %cst_56 = arith.constant dense<0xFF800000> : vector<8xf32>
    %97 = vector.multi_reduction <maximumf>, %96, %cst_56 [1] : vector<8x8xf32> to vector<8xf32>
    %98 = vector.shape_cast %97 : vector<8xf32> to vector<8x1xf32>
    %99 = vector.broadcast %98 : vector<8x1xf32> to vector<8x8xf32>
    %100 = arith.subf %96, %99 : vector<8x8xf32>
    %101 = math.exp %100 : vector<8x8xf32>
    %cst_57 = arith.constant dense<0.000000e+00> : vector<8xf32>
    %102 = vector.multi_reduction <add>, %101, %cst_57 [1] : vector<8x8xf32> to vector<8xf32>
    %103 = vector.shape_cast %102 : vector<8xf32> to vector<8x1xf32>
    %cst_58 = arith.constant dense<0.000000e+00> : vector<8x8xf32>
    %104 = tpu.matmul %101, %93, %cst_58 {dimension_numbers = #tpu.dot_dimension_numbers<[1], [0], [0], [1], [0, 0, 1, 1], [], []>} : vector<8x8xf32>, vector<8x8xf32>, vector<8x8xf32> -> vector<8x8xf32>
    %c0_i32_59 = arith.constant 0 : i32
    %105 = arith.subi %arg1, %c0_i32_59 : i32
    %106 = arith.addi %c0_i32_59, %105 : i32
    %c1_i32_60 = arith.constant 1 : i32
    %107:3 = scf.for %arg11 = %c0_i32_59 to %106 step %c1_i32_60 iter_args(%arg12 = %98, %arg13 = %103, %arg14 = %104) -> (vector<8x1xf32>, vector<8x1xf32>, vector<8x8xf32>)  : i32 {
      %c8_i32_98 = arith.constant 8 : i32
      %174 = arith.muli %arg11, %c8_i32_98 : i32
      %175 = tpu.assume_multiple %174, 8 : i32
      %c0_99 = arith.constant 0 : index
      %c1_100 = arith.constant 1 : index
      %176 = arith.index_cast %175 : i32 to index
      %c0_101 = arith.constant 0 : index
      %177 = vector.load %arg10[%c0_99, %c1_100, %176, %c0_101] : memref<2x4x16x8xf32, #tpu.memory_space<vmem>>, vector<1x1x8x8xf32>
      %178 = vector.shape_cast %177 : vector<1x1x8x8xf32> to vector<8x8xf32>
      %c1_102 = arith.constant 1 : index
      %c1_103 = arith.constant 1 : index
      %179 = arith.index_cast %175 : i32 to index
      %c0_104 = arith.constant 0 : index
      %180 = vector.load %arg10[%c1_102, %c1_103, %179, %c0_104] : memref<2x4x16x8xf32, #tpu.memory_space<vmem>>, vector<1x1x8x8xf32>
      %181 = vector.shape_cast %180 : vector<1x1x8x8xf32> to vector<8x8xf32>
      %cst_105 = arith.constant dense<0.000000e+00> : vector<8x8xf32>
      %182 = tpu.matmul %87, %178, %cst_105 {dimension_numbers = #tpu.dot_dimension_numbers<[1], [1], [0], [0], [0, 0, 1, 0], [], []>} : vector<8x8xf32>, vector<8x8xf32>, vector<8x8xf32> -> vector<8x8xf32>
      %cst_106 = arith.constant dense<0xFF800000> : vector<8xf32>
      %183 = vector.multi_reduction <maximumf>, %182, %cst_106 [1] : vector<8x8xf32> to vector<8xf32>
      %184 = vector.shape_cast %183 : vector<8xf32> to vector<8x1xf32>
      %185 = arith.maximumf %arg12, %184 : vector<8x1xf32>
      %186 = arith.subf %arg12, %185 : vector<8x1xf32>
      %187 = math.exp %186 : vector<8x1xf32>
      %188 = vector.broadcast %185 : vector<8x1xf32> to vector<8x8xf32>
      %189 = arith.subf %182, %188 : vector<8x8xf32>
      %190 = math.exp %189 : vector<8x8xf32>
      %191 = arith.mulf %187, %arg13 : vector<8x1xf32>
      %cst_107 = arith.constant dense<0.000000e+00> : vector<8xf32>
      %192 = vector.multi_reduction <add>, %190, %cst_107 [1] : vector<8x8xf32> to vector<8xf32>
      %193 = vector.shape_cast %192 : vector<8xf32> to vector<8x1xf32>
      %194 = arith.addf %191, %193 : vector<8x1xf32>
      %195 = vector.broadcast %187 : vector<8x1xf32> to vector<8x8xf32>
      %196 = arith.mulf %195, %arg14 : vector<8x8xf32>
      %cst_108 = arith.constant dense<0.000000e+00> : vector<8x8xf32>
      %197 = tpu.matmul %190, %181, %cst_108 {dimension_numbers = #tpu.dot_dimension_numbers<[1], [0], [0], [1], [0, 0, 1, 1], [], []>} : vector<8x8xf32>, vector<8x8xf32>, vector<8x8xf32> -> vector<8x8xf32>
      %198 = arith.addf %196, %197 : vector<8x8xf32>
      scf.yield %185, %194, %198 : vector<8x1xf32>, vector<8x1xf32>, vector<8x8xf32>
    }
    %108 = tpu.reciprocal %107#1 {approx = true} : vector<8x1xf32> -> vector<8x1xf32>
    %109 = vector.broadcast %108 : vector<8x1xf32> to vector<8x8xf32>
    %110 = arith.mulf %107#2, %109 : vector<8x8xf32>
    %c8 = arith.constant 8 : index
    %c0_61 = arith.constant 0 : index
    %111 = vector.load %arg7[%c8, %c0_61] : memref<32x32xf32, #tpu.memory_space<vmem>>, vector<8x32xf32>
    %cst_62 = arith.constant dense<0.000000e+00> : vector<8x32xf32>
    %112 = tpu.matmul %110, %111, %cst_62 {dimension_numbers = #tpu.dot_dimension_numbers<[1], [0], [0], [1], [0, 0, 1, 1], [], []>} : vector<8x8xf32>, vector<8x32xf32>, vector<8x32xf32> -> vector<8x32xf32>
    %113 = arith.addf %86, %112 : vector<8x32xf32>
    %114 = vector.extract_strided_slice %55 {offsets = [0, 16], sizes = [8, 8], strides = [1, 1]} : vector<8x32xf32> to vector<8x8xf32>
    %c0_63 = arith.constant 0 : index
    %c2_64 = arith.constant 2 : index
    %115 = arith.index_cast %3 : i32 to index
    %c0_65 = arith.constant 0 : index
    %116 = vector.load %arg10[%c0_63, %c2_64, %115, %c0_65] : memref<2x4x16x8xf32, #tpu.memory_space<vmem>>, vector<1x1x8x8xf32>
    %117 = vector.shape_cast %116 : vector<1x1x8x8xf32> to vector<8x8xf32>
    %c1_66 = arith.constant 1 : index
    %c2_67 = arith.constant 2 : index
    %118 = arith.index_cast %3 : i32 to index
    %c0_68 = arith.constant 0 : index
    %119 = vector.load %arg10[%c1_66, %c2_67, %118, %c0_68] : memref<2x4x16x8xf32, #tpu.memory_space<vmem>>, vector<1x1x8x8xf32>
    %120 = vector.shape_cast %119 : vector<1x1x8x8xf32> to vector<8x8xf32>
    %cst_69 = arith.constant dense<0.000000e+00> : vector<8x8xf32>
    %121 = tpu.matmul %114, %117, %cst_69 {dimension_numbers = #tpu.dot_dimension_numbers<[1], [1], [0], [0], [0, 0, 1, 0], [], []>} : vector<8x8xf32>, vector<8x8xf32>, vector<8x8xf32> -> vector<8x8xf32>
    %cst_70 = arith.constant -3.40282347E+38 : f32
    %122 = vector.broadcast %cst_70 : f32 to vector<8x8xf32>
    %123 = arith.select %58, %121, %122 : vector<8x8xi1>, vector<8x8xf32>
    %cst_71 = arith.constant dense<0xFF800000> : vector<8xf32>
    %124 = vector.multi_reduction <maximumf>, %123, %cst_71 [1] : vector<8x8xf32> to vector<8xf32>
    %125 = vector.shape_cast %124 : vector<8xf32> to vector<8x1xf32>
    %126 = vector.broadcast %125 : vector<8x1xf32> to vector<8x8xf32>
    %127 = arith.subf %123, %126 : vector<8x8xf32>
    %128 = math.exp %127 : vector<8x8xf32>
    %cst_72 = arith.constant dense<0.000000e+00> : vector<8xf32>
    %129 = vector.multi_reduction <add>, %128, %cst_72 [1] : vector<8x8xf32> to vector<8xf32>
    %130 = vector.shape_cast %129 : vector<8xf32> to vector<8x1xf32>
    %cst_73 = arith.constant dense<0.000000e+00> : vector<8x8xf32>
    %131 = tpu.matmul %128, %120, %cst_73 {dimension_numbers = #tpu.dot_dimension_numbers<[1], [0], [0], [1], [0, 0, 1, 1], [], []>} : vector<8x8xf32>, vector<8x8xf32>, vector<8x8xf32> -> vector<8x8xf32>
    %c0_i32_74 = arith.constant 0 : i32
    %132 = arith.subi %arg1, %c0_i32_74 : i32
    %133 = arith.addi %c0_i32_74, %132 : i32
    %c1_i32_75 = arith.constant 1 : i32
    %134:3 = scf.for %arg11 = %c0_i32_74 to %133 step %c1_i32_75 iter_args(%arg12 = %125, %arg13 = %130, %arg14 = %131) -> (vector<8x1xf32>, vector<8x1xf32>, vector<8x8xf32>)  : i32 {
      %c8_i32_98 = arith.constant 8 : i32
      %174 = arith.muli %arg11, %c8_i32_98 : i32
      %175 = tpu.assume_multiple %174, 8 : i32
      %c0_99 = arith.constant 0 : index
      %c2_100 = arith.constant 2 : index
      %176 = arith.index_cast %175 : i32 to index
      %c0_101 = arith.constant 0 : index
      %177 = vector.load %arg10[%c0_99, %c2_100, %176, %c0_101] : memref<2x4x16x8xf32, #tpu.memory_space<vmem>>, vector<1x1x8x8xf32>
      %178 = vector.shape_cast %177 : vector<1x1x8x8xf32> to vector<8x8xf32>
      %c1_102 = arith.constant 1 : index
      %c2_103 = arith.constant 2 : index
      %179 = arith.index_cast %175 : i32 to index
      %c0_104 = arith.constant 0 : index
      %180 = vector.load %arg10[%c1_102, %c2_103, %179, %c0_104] : memref<2x4x16x8xf32, #tpu.memory_space<vmem>>, vector<1x1x8x8xf32>
      %181 = vector.shape_cast %180 : vector<1x1x8x8xf32> to vector<8x8xf32>
      %cst_105 = arith.constant dense<0.000000e+00> : vector<8x8xf32>
      %182 = tpu.matmul %114, %178, %cst_105 {dimension_numbers = #tpu.dot_dimension_numbers<[1], [1], [0], [0], [0, 0, 1, 0], [], []>} : vector<8x8xf32>, vector<8x8xf32>, vector<8x8xf32> -> vector<8x8xf32>
      %cst_106 = arith.constant dense<0xFF800000> : vector<8xf32>
      %183 = vector.multi_reduction <maximumf>, %182, %cst_106 [1] : vector<8x8xf32> to vector<8xf32>
      %184 = vector.shape_cast %183 : vector<8xf32> to vector<8x1xf32>
      %185 = arith.maximumf %arg12, %184 : vector<8x1xf32>
      %186 = arith.subf %arg12, %185 : vector<8x1xf32>
      %187 = math.exp %186 : vector<8x1xf32>
      %188 = vector.broadcast %185 : vector<8x1xf32> to vector<8x8xf32>
      %189 = arith.subf %182, %188 : vector<8x8xf32>
      %190 = math.exp %189 : vector<8x8xf32>
      %191 = arith.mulf %187, %arg13 : vector<8x1xf32>
      %cst_107 = arith.constant dense<0.000000e+00> : vector<8xf32>
      %192 = vector.multi_reduction <add>, %190, %cst_107 [1] : vector<8x8xf32> to vector<8xf32>
      %193 = vector.shape_cast %192 : vector<8xf32> to vector<8x1xf32>
      %194 = arith.addf %191, %193 : vector<8x1xf32>
      %195 = vector.broadcast %187 : vector<8x1xf32> to vector<8x8xf32>
      %196 = arith.mulf %195, %arg14 : vector<8x8xf32>
      %cst_108 = arith.constant dense<0.000000e+00> : vector<8x8xf32>
      %197 = tpu.matmul %190, %181, %cst_108 {dimension_numbers = #tpu.dot_dimension_numbers<[1], [0], [0], [1], [0, 0, 1, 1], [], []>} : vector<8x8xf32>, vector<8x8xf32>, vector<8x8xf32> -> vector<8x8xf32>
      %198 = arith.addf %196, %197 : vector<8x8xf32>
      scf.yield %185, %194, %198 : vector<8x1xf32>, vector<8x1xf32>, vector<8x8xf32>
    }
    %135 = tpu.reciprocal %134#1 {approx = true} : vector<8x1xf32> -> vector<8x1xf32>
    %136 = vector.broadcast %135 : vector<8x1xf32> to vector<8x8xf32>
    %137 = arith.mulf %134#2, %136 : vector<8x8xf32>
    %c16 = arith.constant 16 : index
    %c0_76 = arith.constant 0 : index
    %138 = vector.load %arg7[%c16, %c0_76] : memref<32x32xf32, #tpu.memory_space<vmem>>, vector<8x32xf32>
    %cst_77 = arith.constant dense<0.000000e+00> : vector<8x32xf32>
    %139 = tpu.matmul %137, %138, %cst_77 {dimension_numbers = #tpu.dot_dimension_numbers<[1], [0], [0], [1], [0, 0, 1, 1], [], []>} : vector<8x8xf32>, vector<8x32xf32>, vector<8x32xf32> -> vector<8x32xf32>
    %140 = arith.addf %113, %139 : vector<8x32xf32>
    %141 = vector.extract_strided_slice %55 {offsets = [0, 24], sizes = [8, 8], strides = [1, 1]} : vector<8x32xf32> to vector<8x8xf32>
    %c0_78 = arith.constant 0 : index
    %c3_79 = arith.constant 3 : index
    %142 = arith.index_cast %3 : i32 to index
    %c0_80 = arith.constant 0 : index
    %143 = vector.load %arg10[%c0_78, %c3_79, %142, %c0_80] : memref<2x4x16x8xf32, #tpu.memory_space<vmem>>, vector<1x1x8x8xf32>
    %144 = vector.shape_cast %143 : vector<1x1x8x8xf32> to vector<8x8xf32>
    %c1_81 = arith.constant 1 : index
    %c3_82 = arith.constant 3 : index
    %145 = arith.index_cast %3 : i32 to index
    %c0_83 = arith.constant 0 : index
    %146 = vector.load %arg10[%c1_81, %c3_82, %145, %c0_83] : memref<2x4x16x8xf32, #tpu.memory_space<vmem>>, vector<1x1x8x8xf32>
    %147 = vector.shape_cast %146 : vector<1x1x8x8xf32> to vector<8x8xf32>
    %cst_84 = arith.constant dense<0.000000e+00> : vector<8x8xf32>
    %148 = tpu.matmul %141, %144, %cst_84 {dimension_numbers = #tpu.dot_dimension_numbers<[1], [1], [0], [0], [0, 0, 1, 0], [], []>} : vector<8x8xf32>, vector<8x8xf32>, vector<8x8xf32> -> vector<8x8xf32>
    %cst_85 = arith.constant -3.40282347E+38 : f32
    %149 = vector.broadcast %cst_85 : f32 to vector<8x8xf32>
    %150 = arith.select %58, %148, %149 : vector<8x8xi1>, vector<8x8xf32>
    %cst_86 = arith.constant dense<0xFF800000> : vector<8xf32>
    %151 = vector.multi_reduction <maximumf>, %150, %cst_86 [1] : vector<8x8xf32> to vector<8xf32>
    %152 = vector.shape_cast %151 : vector<8xf32> to vector<8x1xf32>
    %153 = vector.broadcast %152 : vector<8x1xf32> to vector<8x8xf32>
    %154 = arith.subf %150, %153 : vector<8x8xf32>
    %155 = math.exp %154 : vector<8x8xf32>
    %cst_87 = arith.constant dense<0.000000e+00> : vector<8xf32>
    %156 = vector.multi_reduction <add>, %155, %cst_87 [1] : vector<8x8xf32> to vector<8xf32>
    %157 = vector.shape_cast %156 : vector<8xf32> to vector<8x1xf32>
    %cst_88 = arith.constant dense<0.000000e+00> : vector<8x8xf32>
    %158 = tpu.matmul %155, %147, %cst_88 {dimension_numbers = #tpu.dot_dimension_numbers<[1], [0], [0], [1], [0, 0, 1, 1], [], []>} : vector<8x8xf32>, vector<8x8xf32>, vector<8x8xf32> -> vector<8x8xf32>
    %c0_i32_89 = arith.constant 0 : i32
    %159 = arith.subi %arg1, %c0_i32_89 : i32
    %160 = arith.addi %c0_i32_89, %159 : i32
    %c1_i32_90 = arith.constant 1 : i32
    %161:3 = scf.for %arg11 = %c0_i32_89 to %160 step %c1_i32_90 iter_args(%arg12 = %152, %arg13 = %157, %arg14 = %158) -> (vector<8x1xf32>, vector<8x1xf32>, vector<8x8xf32>)  : i32 {
      %c8_i32_98 = arith.constant 8 : i32
      %174 = arith.muli %arg11, %c8_i32_98 : i32
      %175 = tpu.assume_multiple %174, 8 : i32
      %c0_99 = arith.constant 0 : index
      %c3_100 = arith.constant 3 : index
      %176 = arith.index_cast %175 : i32 to index
      %c0_101 = arith.constant 0 : index
      %177 = vector.load %arg10[%c0_99, %c3_100, %176, %c0_101] : memref<2x4x16x8xf32, #tpu.memory_space<vmem>>, vector<1x1x8x8xf32>
      %178 = vector.shape_cast %177 : vector<1x1x8x8xf32> to vector<8x8xf32>
      %c1_102 = arith.constant 1 : index
      %c3_103 = arith.constant 3 : index
      %179 = arith.index_cast %175 : i32 to index
      %c0_104 = arith.constant 0 : index
      %180 = vector.load %arg10[%c1_102, %c3_103, %179, %c0_104] : memref<2x4x16x8xf32, #tpu.memory_space<vmem>>, vector<1x1x8x8xf32>
      %181 = vector.shape_cast %180 : vector<1x1x8x8xf32> to vector<8x8xf32>
      %cst_105 = arith.constant dense<0.000000e+00> : vector<8x8xf32>
      %182 = tpu.matmul %141, %178, %cst_105 {dimension_numbers = #tpu.dot_dimension_numbers<[1], [1], [0], [0], [0, 0, 1, 0], [], []>} : vector<8x8xf32>, vector<8x8xf32>, vector<8x8xf32> -> vector<8x8xf32>
      %cst_106 = arith.constant dense<0xFF800000> : vector<8xf32>
      %183 = vector.multi_reduction <maximumf>, %182, %cst_106 [1] : vector<8x8xf32> to vector<8xf32>
      %184 = vector.shape_cast %183 : vector<8xf32> to vector<8x1xf32>
      %185 = arith.maximumf %arg12, %184 : vector<8x1xf32>
      %186 = arith.subf %arg12, %185 : vector<8x1xf32>
      %187 = math.exp %186 : vector<8x1xf32>
      %188 = vector.broadcast %185 : vector<8x1xf32> to vector<8x8xf32>
      %189 = arith.subf %182, %188 : vector<8x8xf32>
      %190 = math.exp %189 : vector<8x8xf32>
      %191 = arith.mulf %187, %arg13 : vector<8x1xf32>
      %cst_107 = arith.constant dense<0.000000e+00> : vector<8xf32>
      %192 = vector.multi_reduction <add>, %190, %cst_107 [1] : vector<8x8xf32> to vector<8xf32>
      %193 = vector.shape_cast %192 : vector<8xf32> to vector<8x1xf32>
      %194 = arith.addf %191, %193 : vector<8x1xf32>
      %195 = vector.broadcast %187 : vector<8x1xf32> to vector<8x8xf32>
      %196 = arith.mulf %195, %arg14 : vector<8x8xf32>
      %cst_108 = arith.constant dense<0.000000e+00> : vector<8x8xf32>
      %197 = tpu.matmul %190, %181, %cst_108 {dimension_numbers = #tpu.dot_dimension_numbers<[1], [0], [0], [1], [0, 0, 1, 1], [], []>} : vector<8x8xf32>, vector<8x8xf32>, vector<8x8xf32> -> vector<8x8xf32>
      %198 = arith.addf %196, %197 : vector<8x8xf32>
      scf.yield %185, %194, %198 : vector<8x1xf32>, vector<8x1xf32>, vector<8x8xf32>
    }
    %162 = tpu.reciprocal %161#1 {approx = true} : vector<8x1xf32> -> vector<8x1xf32>
    %163 = vector.broadcast %162 : vector<8x1xf32> to vector<8x8xf32>
    %164 = arith.mulf %161#2, %163 : vector<8x8xf32>
    %c24 = arith.constant 24 : index
    %c0_91 = arith.constant 0 : index
    %165 = vector.load %arg7[%c24, %c0_91] : memref<32x32xf32, #tpu.memory_space<vmem>>, vector<8x32xf32>
    %cst_92 = arith.constant dense<0.000000e+00> : vector<8x32xf32>
    %166 = tpu.matmul %164, %165, %cst_92 {dimension_numbers = #tpu.dot_dimension_numbers<[1], [0], [0], [1], [0, 0, 1, 1], [], []>} : vector<8x8xf32>, vector<8x32xf32>, vector<8x32xf32> -> vector<8x32xf32>
    %167 = arith.addf %140, %166 : vector<8x32xf32>
    %c0_93 = arith.constant 0 : index
    %c0_94 = arith.constant 0 : index
    %168 = vector.load %arg8[%c0_93, %c0_94] : memref<1x32xf32, #tpu.memory_space<vmem>>, vector<1x32xf32>
    %169 = vector.broadcast %168 : vector<1x32xf32> to vector<8x32xf32>
    %170 = arith.addf %167, %169 : vector<8x32xf32>
    %c0_95 = arith.constant 0 : index
    %c0_96 = arith.constant 0 : index
    %c0_97 = arith.constant 0 : index
    %171 = vector.load %arg9[%c0_95, %c0_96, %c0_97] : memref<1x8x32xf32, #tpu.memory_space<vmem>>, vector<1x8x32xf32>
    %172 = vector.shape_cast %171 : vector<1x8x32xf32> to vector<8x32xf32>
    %173 = vector.shape_cast %170 : vector<8x32xf32> to vector<1x8x32xf32>
    tpu.vector_store %arg9[%c0_95, %c0_96, %c0_97], %173 {strides = array<i32>} : memref<1x8x32xf32, #tpu.memory_space<vmem>>, vector<1x8x32xf32>,
    return
  }
  func.func @transform_0(%arg0: i32, %arg1: i32) -> (i32, i32, i32) {
    %c0_i32 = arith.constant 0 : i32
    %c0_i32_0 = arith.constant 0 : i32
    return %arg0, %arg1, %c0_i32 : i32, i32, i32
  }
  func.func @transform_1(%arg0: i32, %arg1: i32) -> (i32, i32) {
    %c0_i32 = arith.constant 0 : i32
    %c0_i32_0 = arith.constant 0 : i32
    %c0_i32_1 = arith.constant 0 : i32
    return %c0_i32, %c0_i32_0 : i32, i32
  }
  func.func @transform_2(%arg0: i32, %arg1: i32) -> (i32, i32) {
    %c0_i32 = arith.constant 0 : i32
    %c0_i32_0 = arith.constant 0 : i32
    %c0_i32_1 = arith.constant 0 : i32
    return %c0_i32, %c0_i32_0 : i32, i32
  }
  func.func @transform_3(%arg0: i32, %arg1: i32) -> (i32, i32) {
    %c0_i32 = arith.constant 0 : i32
    %c0_i32_0 = arith.constant 0 : i32
    %c0_i32_1 = arith.constant 0 : i32
    return %c0_i32, %c0_i32_0 : i32, i32
  }
  func.func @transform_4(%arg0: i32, %arg1: i32) -> (i32, i32) {
    %c0_i32 = arith.constant 0 : i32
    %c0_i32_0 = arith.constant 0 : i32
    %c0_i32_1 = arith.constant 0 : i32
    return %c0_i32, %c0_i32_0 : i32, i32
  }
  func.func @transform_5(%arg0: i32, %arg1: i32) -> (i32, i32) {
    %c0_i32 = arith.constant 0 : i32
    %c0_i32_0 = arith.constant 0 : i32
    %c0_i32_1 = arith.constant 0 : i32
    return %c0_i32, %c0_i32_0 : i32, i32
  }
  func.func @transform_6(%arg0: i32, %arg1: i32) -> (i32, i32) {
    %c0_i32 = arith.constant 0 : i32
    %c0_i32_0 = arith.constant 0 : i32
    %c0_i32_1 = arith.constant 0 : i32
    return %c0_i32, %c0_i32_0 : i32, i32
  }
  func.func @transform_7(%arg0: i32, %arg1: i32) -> (i32, i32, i32) {
    %c0_i32 = arith.constant 0 : i32
    %c0_i32_0 = arith.constant 0 : i32
    return %arg0, %arg1, %c0_i32 : i32, i32, i32
  }
}

</mosaic_0001>

<bundles_post_ra>
// kernel: tpu_custom_call.1
= control target key start
LH: loop header
LB: loop body
LE: loop exit
PB: predicated region body
PF: predicated region fallthrough
CT: control target
= control target key end

     0   :  { %s2679_s0 = inlined_call_operand.hbm [shape: f32[2,16,32], index: 0, kind: input, shape index: {}]   ;;  %s2680_s1 = inlined_call_operand.hbm [shape: f32[32,32], index: 1, kind: input, shape index: {}]   ;;  %s2681_s2 = inlined_call_operand.vmem [shape: f32[1,32], index: 2, kind: input, shape index: {}]   ;;  %s2682_s3 = inlined_call_operand.hbm [shape: f32[32,64], index: 3, kind: input, shape index: {}]   ;;  %s2683_s4 = inlined_call_operand.vmem [shape: f32[1,64], index: 4, kind: input, shape index: {}]   ;;  %s2684_s5 = inlined_call_operand.hbm [shape: f32[32,32], index: 5, kind: input, shape index: {}]   ;;  %s2685_s6 = inlined_call_operand.vmem [shape: f32[1,32], index: 6, kind: input, shape index: {}]   ;;  %s2686_s7 = inlined_call_operand.hbm [shape: f32[2,16,32], index: 7, kind: output, shape index: {}]  }
   0x1   :  { %2694 = sst [smem:[#allocation21_spill]] %s2680_s1 }
   0x2   :  { %2695 = sst [smem:[#allocation22_spill]] %s2682_s3 }
   0x3   :  { %2696 = sst [smem:[#allocation23_spill]] %s2684_s5 }
   0x4   :  { %2697 = sst [smem:[#allocation24_spill]] %s2685_s6 }
   0x5   :  { %12 = vsyncpa [#allocation4], 0 }
   0x6   :  { %14 = vsyncpa [#allocation4 + $0x1], 0 }
   0x7   :  { %15 = vsyncpa [#allocation7], 0 }
   0x8   :  { %16 = vsyncpa [#allocation10], 0 }
   0x9   :  { %17 = vsyncpa [#allocation5], 0 }
   0xa   :  { %19 = vsyncpa [#allocation5 + $0x1], 0  ;;  %s2295_s24 = smov 0   ;;  %s2297_s25 = smov 0  }
   0xb   :  { %s2299_s26 = smov 0   ;;  %s2301_s27 = smov 0  }
   0xc   :  { %s2303_s28 = smov 0   ;;  %s2305_s29 = smov 0  }
   0xd   :  { %s2307_s30 = smov 0   ;;  %s2309_s8 = smov 0  }
   0xe LB: > { %2698 = sst [smem:[#allocation16_spill]] %s2117_s24  ;;  %s2687_s9 = sadd.s32 4294967295, %s2145_s8   ;;  %s2145_s8 = sphi %s2309_s8, %s25_s8   ;;  %s2141_s30 = sphi %s2307_s30, %s2726_s30   ;;  %s2137_s29 = sphi %s2305_s29, %s2725_s29   ;;  %s2133_s28 = sphi %s2303_s28, %s2724_s28   ;;  %s2129_s27 = sphi %s2301_s27, %s2723_s27   ;;  %s2125_s26 = sphi %s2299_s26, %s2722_s26   ;;  %s2121_s25 = sphi %s2297_s25, %s2721_s25   ;;  %s2117_s24 = sphi %s2295_s24, %s2720_s24  }
   0xf   : > { %p1388_p0 = scmp.ge.s32.totalorder %s2145_s8, 1  ;;  %p2339_p1 = scmp.eq.s32.totalorder %s2687_s9, 0 }
  0x10   : > { %p224_p2 = scmp.lt.s32.totalorder %s2145_s8, 5  ;;  %s2700_s1 = sld [smem:[#allocation21_spill]] }
  0x11   : > { %s2243_s15 = smov [#allocation6]   ;;  %s2703_s3 = sld [smem:[#allocation22_spill]] }
  0x12   : > { %p2347_p3 = pnand %p1388_p0, %p224_p2  ;;  %s237_s16 = sshll.u32 %s2243_s15, 4  ;;  %s238_s16 = int_to_ptr.vmem [resolvable:$true] %s237_s16 }
  0x13   : > { %s2244_s21 = smov 128   ;;  %s2245_s22 = smov 8  }
  0x14   : > { %p1494_p4 = pneg %p2347_p3  ;;  %s2246_s23 = smov [#allocation8]  }
  0x15   : > { %s254_s11 = sshll.u32 %s2246_s23, 4  ;;  %s2704_s5 = sld [smem:[#allocation23_spill]]  ;;  %s255_s11 = int_to_ptr.vmem [resolvable:$true] %s254_s11 }
  0x16   : > { %s235_s13 = sshll.u32 %s2700_s1, 4  ;;  %p2355_p5 = pnand %p1494_p4, %p2339_p1  ;;  %s236_s13 = int_to_ptr.hbm [resolvable:$true] %s235_s13 }
  0x17   : > { %s252_s20 = sshll.u32 %s2703_s3, 4  ;;  %s2247_s19 = smov [#allocation9]   ;;  %s253_s20 = int_to_ptr.hbm [resolvable:$true] %s252_s20 }
  0x18   : > { %1497 = dma.hbm_to_vmem [thread:$0]  (!%p2355_p5), %s236_s13, 512, %s238_s16, [#allocation7], %s2244_s21, %s2244_s21, %s2245_s22  }
  0x19   : > { %1500 = dma.hbm_to_vmem [thread:$0]  (!%p2355_p5), %s253_s20, 512, %s255_s11, [#allocation7], %s2244_s21, %s2244_s21, %s2245_s22  }
  0x1a   : > { %s271_s9 = sshll.u32 %s2247_s19, 4  ;;  %s1387_s13 = sadd.s32 4294967294, %s2145_s8   ;;  %s272_s9 = int_to_ptr.vmem [resolvable:$true] %s271_s9 }
  0x1b   : > { %s269_s18 = sshll.u32 %s2704_s5, 4  ;;  %s34_s16 = sadd.s32 1, %s2137_s29  ;;  %s270_s18 = int_to_ptr.hbm [resolvable:$true] %s269_s18 }
  0x1c   : > { %1503 = dma.hbm_to_vmem [thread:$0]  (!%p2355_p5), %s270_s18, 512, %s272_s9, [#allocation10], %s2244_s21, %s2244_s21, %s2245_s22  }
  0x1d   : > { %s37_s23 = sadd.s32 1, %s2141_s30  ;;  %p35_p6 = scmp.ge.s32.totalorder %s34_s16, 2 }
  0x1e   : > { %s46_s12 = sadd.s32 1, %s2125_s26  ;;  %p53_p7 = scmp.ne.s32.totalorder %s2125_s26, %s2121_s25 }
  0x1f   : > { %p54_p8 = scmp.eq.s32.totalorder %s2145_s8, 0  ;;  %s2728_s16 = smov (%p35_p6, %s34_s16), 0 }
  0x20   : > { %2705 = sst [smem:[#allocation17_spill]] %s2728_s16  ;;  %s2730_s23 = smov (!%p35_p6, %s37_s23), %s2141_s30 }
  0x21   : > { %s42_s20 = ssub.s32 %s2137_s29, %s2728_s16  ;;  %p2383_p9 = por %p54_p8, %p53_p7 }
  0x22   : > { %p39_p10 = scmp.ge.s32.totalorder %s2730_s23, 2  ;;  %p59_p11 = scmp.ne.s32.totalorder %s2121_s25, %s2117_s24 }
  0x23   : > { %s2707_s9 = sadd.s32 4294967295, %s2145_s8   ;;  %p217_p13 = scmp.eq.s32.totalorder %s1387_s13, 3 }
  0x24   : > { %p211_p12 = scmp.eq.s32.totalorder %s2707_s9, 3  ;;  %s2732_s23 = smov (%p39_p10, %s2730_s23), 0 }
  0x25   : > { %2708 = sst [smem:[#allocation18_spill]] %s2732_s23  ;;  %p2395_p0 = por %p2339_p1, %p59_p11 }
  0x26   : > { %p2399_p2 = por %p211_p12, %p53_p7  ;;  %s41_s11 = ssub.s32 %s2141_s30, %s2732_s23 }
  0x27   : > { %p2405_p4 = por %p217_p13, %p59_p11  ;;  %s43_s18 = sor.u32 %s42_s20, %s41_s11 }
  0x28   : > { %s2710_s22 = scalar_select %p2399_p2, 1, 0 }
  0x29   : > { %s2712_s15 = scalar_select %p2405_p4, 1, 0 }
  0x2a   : > { %2711 = sst [smem:[#allocation19_spill]] %s2710_s22  ;;  %p1515_p5 = scmp.lt.s32.totalorder %s2145_s8, 4 }
  0x2b   : > { %2713 = sst [smem:[#allocation20_spill]] %s2712_s15  ;;  %p44_p6 = scmp.eq.s32.totalorder %s43_s18, 0 }
  0x2c   : > { %s288_s19 = sand.u32 1, %s2125_s26   ;;  %s1394_s1 = sshll.u32 %s2141_s30, 1 }
  0x2d   : > { %s1393_s13 = sshll.u32 %s288_s19, 3  ;;  %s296_s3 = sadd.s32 %s2137_s29, %s1394_s1 }
  0x2e   : > { %s2412_s9 = scalar_select %p44_p6, %s2125_s26, %s46_s12  }
  0x2f   : > { %s292_s5 = scalar_lea.vmem [#allocation3], %s1393_s13  ;;  %s1395_s24 = sshll.u32 %s296_s3, 3 }
  0x30   : > { %s302_s16 = sshll.u32 %s292_s5, 4  ;;  %s298_s23 = scalar_lea.hbm %s2679_s0, %s1395_s24  ;;  %s303_s16 = int_to_ptr.vmem [resolvable:$true] %s302_s16 }
  0x31   : > { %p1505_p7 = pnand %p1515_p5, %p2383_p9  ;;  %s300_s15 = sshll.u32 %s298_s23, 4  ;;  %s301_s15 = int_to_ptr.hbm [resolvable:$true] %s300_s15 }
  0x32   : > { %s289_s20 = scalar_lea.sflag [#allocation4], %s288_s19  ;;  %311 = sbr.rel (%p2347_p3) target bundleno = 3838 (0xefe), region = 48 }
  0x33   : > { %1507 = dma.hbm_to_vmem [thread:$0]  (!%p1505_p7), %s301_s15, 128, %s303_s16, %s289_s20  }
  0x34   : > { %s2424_s1 = sand.u32 (!%p2347_p3), 1, %s2121_s25  }
  0x35   : > { %s1397_s3 = sshll.u32 (!%p2347_p3), %s2424_s1, 3  ;;  %s314_s5 = scalar_lea.sflag (!%p2347_p3), [#allocation4], %s2424_s1 }
  0x36   : > { %s317_s6 = scalar_lea.vmem (!%p2347_p3), [#allocation3], %s1397_s3 }
  0x37   : > { %2100 = dma.done.wait (%p2395_p0), %s314_s5, 128  }
  0x38   : > { %2102 = vsyncadd (%p2395_p0), %s314_s5, 4294967168 }
  0x39   : > { %2104 = dma.done.wait (%p2339_p1), [#allocation7], 1024  }
  0x3a   : > { %2106 = vsyncadd (%p2339_p1), [#allocation7], 4294966272 }
  0x3b   : > { %2108 = dma.done.wait (%p2339_p1), [#allocation10], 512  }
  0x3c   : > { %2110 = vsyncadd (%p2339_p1), [#allocation10], 4294966784  ;;  %v369_v0 = vld [vmem:[#allocation8 + $0x18] sm:$0xff]  ;;  %v368_v1 = vld [vmem:[#allocation8 + $0x10] sm:$0xff]  ;;  %vm374_vm0 = vcmask 261120   ;;  %s1402_s14 = sshll.u32 %s2129_s27, 3  ;;  %v473_v23 = vlaneseq }
  0x3d   : > { %390 = vmatpush.msra.mxu0 %v369_v0  ;;  %v447_v2 = vld [vmem:[#allocation6 + $0x18] sm:$0xff]  ;;  %v367_v3 = vld [vmem:[#allocation8 + $0x8] sm:$0xff]  ;;  %v446_v4 = vld [vmem:[#allocation6 + $0x10] sm:$0xff]  ;;  %vm399_vm1 = vcmask 64512   ;;  %s2248_s16 = smov 112   ;;  %s2249_s23 = smov 120  }
  0x3e   : > { %464 = vmatpush.msra.mxu1 %v447_v2  ;;  %v445_v5 = vld [vmem:[#allocation6 + $0x8] sm:$0xff]  ;;  %v366_v6 = vld [vmem:[#allocation8] sm:$0xff]  ;;  %v364_v7 = vld [vmem:[%s317_s6] sm:$0xff]  ;;  %s2453_s21 = scalar_lea.vmem [#allocation2], %s1402_s14  ;;  %s2250_s22 = smov 80   ;;  %v2476_v24 = vshrl.u32 %v473_v23, 7 }
  0x3f   : > { %391 = vmatpush.msra.mxu0 %v368_v1  ;;  %v444_v8 = vld [vmem:[#allocation6] sm:$0xff]  ;;  %v1788_v9 = vld [vmem:[%s2683_s4] ss:$0 sm:$0xff]  ;;  %s2251_s11 = smov 88   ;;  %s2252_s15 = smov 72   ;;  %v2478_v25 = vand.u32 127, %v473_v23 }
  0x40   : > { %465 = vmatpush.msra.mxu1 %v446_v4  ;;  %v1789_v12 = vld [vmem:[%s2681_s2] ss:$0 sm:$0xff]  ;;  %s2253_s18 = smov 104   ;;  %s2254_s19 = smov 96  }
  0x41   : > { %392 = vmatpush.msra.mxu0 %v367_v3  ;;  %vm477_vm2 = vcmp.le.s32.totalorder %v2478_v25, %v2476_v24  ;;  %s2493_s13 = scalar_lea.vmem [#allocation11], %s1397_s3  ;;  %p1423_p1 = scmp.le.s32.totalorder %s2129_s27, 0 }
  0x42   : > { %466 = vmatpush.msra.mxu1 %v445_v5  ;;  %s2498_s20 = smov (!%p1423_p1), 0  }
  0x43   : > { %393 = vmatpush.msra.mxu0 %v366_v6 }
  0x44   : > { %1403 = vmatmul.msk.f32.vlgmr.msra.gmra.mxu0 %vm374_vm0, %v364_v7  ;;  %467 = vmatpush.msra.mxu1 %v444_v8 }
  0x45   : > { %1418 = vmatmul.msk.f32.vlgmr.msra.gmra.mxu1 %vm374_vm0, %v364_v7 }
  0xc1   : > { %v395_v10 = vpop.f32.mrf.mxu0 }
  0xc2   : > { %v396_v11 = vadd.f32 %v1788_v9, %v395_v10  ;;  %v469_v13 = vpop.f32.mrf.mxu1 }
  0xc3   : > { %v470_v14 = vadd.f32 %v1789_v12, %v469_v13 }
  0xc4   : > { %420 = vrot.lane.b32.xlu2 %v396_v11, %s2248_s16  ;;  %408 = vrot.lane.b32.xlu1 %v396_v11, %s2249_s23  ;;  %400 = vst.msk [vmem:[%s2453_s21] sm:$0xff] %vm399_vm1, %v396_v11 }
  0xc5   : > { %v2458_v16 = vmul.f32 0.35355338, %v470_v14 }
  0xcb   : > { %v478_v15 = vld [vmem:[%s2453_s21] sm:$0xff] }
  0xcc   : > { %426 = vrot.lane.b32.xlu2 %v396_v11, %s2250_s22  ;;  %414 = vrot.lane.b32.xlu1 %v396_v11, %s2251_s11 }
  0xcd   : > { %1420 = vmatpush.xpose.msk.msra.mxu2 %vm399_vm1, %v478_v15 }
  0xd0   : > { %1421 = vmatmul.msk.f32.vlgmr.msra.gmra.mxu2 %vm399_vm1, %v2458_v16 }
  0xd4   : > { %438 = vrot.lane.b32.xlu2 %v396_v11, %s2252_s15  ;;  %432 = vrot.lane.b32.xlu1 %v396_v11, %s2253_s18 }
 0x11e   : > { %v421_v17 = vpop.permute.xlu2 %420 }
 0x11f   : > { %1411 = vst.msk [vmem:[%s2453_s21 + $0x20] sm:$0xff] %vm399_vm1, %v421_v17 }
 0x126   : > { %v427_v18 = vpop.permute.xlu2 %426 }
 0x127   : > { %1413 = vst.msk [vmem:[%s2453_s21 + $0x60] sm:$0xff] %vm399_vm1, %v427_v18 }
 0x12e   : > { %v439_v19 = vpop.permute.xlu2 %438 }
 0x12f   : > { %1417 = vst.msk [vmem:[%s2453_s21 + $0x70] sm:$0xff] %vm399_vm1, %v439_v19 }
 0x136   : > { %v409_v20 = vpop.permute.xlu1 %408 }
 0x137   : > { %1407 = vst.msk [vmem:[%s2453_s21 + $0x10] sm:$0xff] %vm399_vm1, %v409_v20 }
 0x13e   : > { %v415_v21 = vpop.permute.xlu1 %414 }
 0x13f   : > { %1409 = vst.msk [vmem:[%s2453_s21 + $0x50] sm:$0xff] %vm399_vm1, %v415_v21 }
 0x146   : > { %v433_v22 = vpop.permute.xlu1 %432 }
 0x147   : > { %1415 = vst.msk [vmem:[%s2453_s21 + $0x30] sm:$0xff] %vm399_vm1, %v433_v22 }
 0x153   : > { %v503_v26 = vpop.f32.mrf.mxu2 }
 0x154   : > { %v506_v27 = vsel %vm477_vm2, %v503_v26, -3.4028235e+38 }
 0x155   : > { %v507_v28 = vsel %vm399_vm1, %v506_v27, -inf }
 0x156   : > { %508 = vmax.xlane.f32.xlu0 %v507_v28 }
 0x16a   : > { %402 = vrot.lane.b32.xlu0 %v396_v11, %s2254_s19 }
 0x1c9   : > { %v509_v29 = vpop.xlane.xlu0 %508  }
 0x1ca   : > { %v510_v30 = vsub.f32 %v506_v27, %v509_v29 }
 0x1cc   : > { %v511_v31 = vmul.f32 1.442695, %v510_v30 }
 0x1ce   : > { %1790 = vpow2.f32 %v511_v31 }
 0x1d4   : > { %v1791_v32 = vpop.eup %1790 }
 0x1d5   : > { %v513_v33 = vsel %vm399_vm1, %v1791_v32, 0.0 }
 0x1d6   : > { %514 = vadd.xlane.f32.xlu1 %v513_v33 }
 0x1dc   : > { %v403_v34 = vpop.permute.xlu0 %402 }
 0x1dd   : > { %1405 = vst.msk [vmem:[%s2453_s21 + $0x40] sm:$0xff] %vm399_vm1, %v403_v34 }
 0x1e4   : > { %v1419_v35 = vld [vmem:[%s2453_s21 + $0x40] sm:$0xff] }
 0x1e5   : > { %534 = vmatpush.msra.mxu3 %v1419_v35 }
 0x1e6   : > { %1422 = vmatmul.msk.f32.vlgmr.msra.gmra.mxu3 %vm399_vm1, %v1791_v32 }
 0x249   : > { %v515_v36 = vpop.xlane.xlu1 %514  }
 0x24a   : > { %v2167_v39 = vmov %v515_v36  }
 0x266   : > { %1273 = sbr.rel (%p1423_p1) target bundleno = 1011 (0x3f3), region = 143 }
 0x269   : > { %v536_v37 = vpop.f32.mrf.mxu3  }
 0x26a   : > { %v2163_v38 = vmov %v536_v37  }
 0x26b   : > { %v2147_v40 = vmov %v536_v37   ;;  %v2151_v41 = vmov %v515_v36   ;;  %v2155_v42 = vmov %v509_v29  }
 0x26c LB: >> { %s1424_s3 = sshll.u32 %s2161_s20, 3  ;;  %s542_s20 = sadd.s32 1, %s2161_s20   ;;  %s2161_s20 = sphi %s2498_s20, %s542_s20   ;;  %v2157_v42 = vphi %v2155_v42, %v2156_v42   ;;  %v2153_v41 = vphi %v2151_v41, %v2152_v41   ;;  %v2149_v40 = vphi %v2147_v40, %v2148_v40  }
 0x26d   : >> { %s549_s5 = scalar_lea.vmem [#allocation2], %s1424_s3  ;;  %p541_p3 = scmp.ge.s32.totalorder %s542_s20, %s2129_s27 }
 0x26e   : >> { %v550_v43 = vld [vmem:[%s549_s5] sm:$0xff] }
 0x26f   : >> { %1427 = vmatpush.xpose.msk.msra.mxu0 %vm399_vm1, %v550_v43  ;;  %v1426_v46 = vld [vmem:[%s549_s5 + $0x40] sm:$0xff] }
 0x270   : >> { %611 = vmatpush.msra.mxu1 %v1426_v46 }
 0x272   : >> { %1428 = vmatmul.msk.f32.vlgmr.msra.gmra.mxu0 %vm399_vm1, %v2458_v16 }
 0x2ef   : >> { %v574_v44 = vpop.f32.mrf.mxu0 }
 0x2f0   : >> { %v577_v45 = vsel %vm399_vm1, %v574_v44, -inf }
 0x2f1   : >> { %578 = vmax.xlane.f32.xlu0 %v577_v45 }
 0x364   : >> { %v579_v47 = vpop.xlane.xlu0 %578 }
 0x365   : >> { %v580_v48 = vmax.f32 %v2157_v42, %v579_v47  }
 0x367   : >> { %v581_v49 = vsub.f32 %v2157_v42, %v580_v48  ;;  %v584_v50 = vsub.f32 %v574_v44, %v580_v48  ;;  %v2156_v42 = vmov %v580_v48  }
 0x369   : >> { %v585_v51 = vmul.f32 1.442695, %v584_v50  ;;  %v582_v54 = vmul.f32 1.442695, %v581_v49 }
 0x36b   : >> { %1792 = vpow2.f32 %v585_v51 }
 0x36c   : >> { %1794 = vpow2.f32 %v582_v54 }
 0x371   : >> { %v1793_v52 = vpop.eup %1792 }
 0x372   : >> { %1429 = vmatmul.msk.f32.vlgmr.msra.gmra.mxu1 %vm399_vm1, %v1793_v52  ;;  %v588_v53 = vsel %vm399_vm1, %v1793_v52, 0.0  ;;  %v1795_v55 = vpop.eup %1794 }
 0x373   : >> { %589 = vadd.xlane.f32.xlu0 %v588_v53  ;;  %v587_v56 = vmul.f32 %v2153_v41, %v1795_v55  ;;  %v592_v59 = vmul.f32 %v2149_v40, %v1795_v55 }
 0x3e6   : >> { %v590_v57 = vpop.xlane.xlu0 %589 }
 0x3e7   : >> { %v591_v58 = vadd.f32 %v590_v57, %v587_v56  }
 0x3e9   : >> { %v2152_v41 = vmov %v591_v58   ;;  %v2168_v39 = vmov (%p541_p3), %v591_v58  }
 0x3ee   : > { %544 = sbr.rel (!%p541_p3) target bundleno = 620 (0x26c), region = 149 }
 0x3ef   : >> { %v613_v60 = vpop.f32.mrf.mxu1 }
 0x3f0   : >> { %v616_v61 = vadd.f32 %v613_v60, %v592_v59  }
 0x3f2   : >> { %v2148_v40 = vmov %v616_v61   ;;  %v2164_v38 = vmov (%p541_p3), %v616_v61  }
 0x3f3 PF: > { %622 = vrot.lane.b32.xlu0 %v2458_v16, %s2249_s23  ;;  %1796 = vrcp.f32 %v2169_v39  ;;  %v2516_v62 = vld [vmem:[#allocation9] sm:$0xff]  ;;  %s2535_s6 = smov (!%p1423_p1), 0   ;;  %v2169_v39 = vphi %v2167_v39, %v2168_v39   ;;  %v2165_v38 = vphi %v2163_v38, %v2164_v38  }
 0x3f4   : > { %v1430_v63 = vld [vmem:[%s2453_s21 + $0x10] sm:$0xff] }
 0x3f5   : > { %1432 = vmatpush.xpose.msk.msra.mxu0 %vm399_vm1, %v1430_v63  ;;  %v1431_v6 = vld [vmem:[%s2453_s21 + $0x50] sm:$0xff] }
 0x3f6   : > { %677 = vmatpush.msra.mxu1 %v1431_v6 }
 0x3f9   : > { %v1797_v0 = vpop.eup %1796 }
 0x3fa   : > { %v2520_v1 = vmul.f32 %v2165_v38, %v1797_v0 }
 0x465   : > { %v2522_v2 = vpop.permute.xlu0 %622 }
 0x466   : > { %1433 = vmatmul.msk.f32.vlgmr.msra.gmra.mxu0 %vm399_vm1, %v2522_v2 }
 0x4e3   : > { %v646_v3 = vpop.f32.mrf.mxu0 }
 0x4e4   : > { %v649_v4 = vsel %vm477_vm2, %v646_v3, -3.4028235e+38 }
 0x4e5   : > { %v650_v5 = vsel %vm399_vm1, %v649_v4, -inf }
 0x4e6   : > { %651 = vmax.xlane.f32.xlu0 %v650_v5 }
 0x559   : > { %v652_v7 = vpop.xlane.xlu0 %651  }
 0x55a   : > { %v653_v8 = vsub.f32 %v649_v4, %v652_v7 }
 0x55c   : > { %v654_v9 = vmul.f32 1.442695, %v653_v8 }
 0x55e   : > { %1798 = vpow2.f32 %v654_v9 }
 0x564   : > { %v1799_v10 = vpop.eup %1798 }
 0x565   : > { %1434 = vmatmul.msk.f32.vlgmr.msra.gmra.mxu1 %vm399_vm1, %v1799_v10  ;;  %v656_v11 = vsel %vm399_vm1, %v1799_v10, 0.0 }
 0x566   : > { %657 = vadd.xlane.f32.xlu1 %v656_v11 }
 0x5d9   : > { %v658_v12 = vpop.xlane.xlu1 %657  }
 0x5da   : > { %v2191_v15 = vmov %v658_v12  }
 0x5df   : > { %1287 = sbr.rel (%p1423_p1) target bundleno = 1900 (0x76c), region = 154 }
 0x5e2   : > { %v679_v13 = vpop.f32.mrf.mxu1  }
 0x5e3   : > { %v2187_v14 = vmov %v679_v13  }
 0x5e4   : > { %v2171_v17 = vmov %v679_v13   ;;  %v2175_v18 = vmov %v658_v12   ;;  %v2179_v19 = vmov %v652_v7  }
 0x5e5 LB: >> { %s1436_s24 = sshll.u32 %s2185_s6, 3  ;;  %s685_s6 = sadd.s32 1, %s2185_s6   ;;  %s2185_s6 = sphi %s2535_s6, %s685_s6   ;;  %v2181_v19 = vphi %v2179_v19, %v2180_v19   ;;  %v2177_v18 = vphi %v2175_v18, %v2176_v18   ;;  %v2173_v17 = vphi %v2171_v17, %v2172_v17  }
 0x5e6   : >> { %s1241_s10 = scalar_lea.vmem [#allocation2], %s1436_s24  ;;  %p684_p8 = scmp.ge.s32.totalorder %s685_s6, %s2129_s27 }
 0x5e7   : >> { %v1437_v20 = vld [vmem:[%s1241_s10 + $0x10] sm:$0xff] }
 0x5e8   : >> { %1440 = vmatpush.xpose.msk.msra.mxu0 %vm399_vm1, %v1437_v20  ;;  %v1439_v23 = vld [vmem:[%s1241_s10 + $0x50] sm:$0xff] }
 0x5e9   : >> { %755 = vmatpush.msra.mxu1 %v1439_v23 }
 0x5eb   : >> { %1441 = vmatmul.msk.f32.vlgmr.msra.gmra.mxu0 %vm399_vm1, %v2522_v2 }
 0x668   : >> { %v718_v21 = vpop.f32.mrf.mxu0 }
 0x669   : >> { %v721_v22 = vsel %vm399_vm1, %v718_v21, -inf }
 0x66a   : >> { %722 = vmax.xlane.f32.xlu0 %v721_v22 }
 0x6dd   : >> { %v723_v26 = vpop.xlane.xlu0 %722 }
 0x6de   : >> { %v724_v27 = vmax.f32 %v2181_v19, %v723_v26  }
 0x6e0   : >> { %v725_v28 = vsub.f32 %v2181_v19, %v724_v27  ;;  %v728_v29 = vsub.f32 %v718_v21, %v724_v27  ;;  %v2180_v19 = vmov %v724_v27  }
 0x6e2   : >> { %v729_v30 = vmul.f32 1.442695, %v728_v29  ;;  %v726_v33 = vmul.f32 1.442695, %v725_v28 }
 0x6e4   : >> { %1800 = vpow2.f32 %v729_v30 }
 0x6e5   : >> { %1802 = vpow2.f32 %v726_v33 }
 0x6ea   : >> { %v1801_v31 = vpop.eup %1800 }
 0x6eb   : >> { %1442 = vmatmul.msk.f32.vlgmr.msra.gmra.mxu1 %vm399_vm1, %v1801_v31  ;;  %v732_v32 = vsel %vm399_vm1, %v1801_v31, 0.0  ;;  %v1803_v34 = vpop.eup %1802 }
 0x6ec   : >> { %733 = vadd.xlane.f32.xlu0 %v732_v32  ;;  %v731_v35 = vmul.f32 %v2177_v18, %v1803_v34  ;;  %v736_v38 = vmul.f32 %v2173_v17, %v1803_v34 }
 0x75f   : >> { %v734_v36 = vpop.xlane.xlu0 %733 }
 0x760   : >> { %v735_v37 = vadd.f32 %v734_v36, %v731_v35  }
 0x762   : >> { %v2176_v18 = vmov %v735_v37   ;;  %v2192_v15 = vmov (%p684_p8), %v735_v37  }
 0x767   : > { %687 = sbr.rel (!%p684_p8) target bundleno = 1509 (0x5e5), region = 160 }
 0x768   : >> { %v757_v39 = vpop.f32.mrf.mxu1 }
 0x769   : >> { %v760_v40 = vadd.f32 %v757_v39, %v736_v38  }
 0x76b   : >> { %v2172_v17 = vmov %v760_v40   ;;  %v2188_v14 = vmov (%p684_p8), %v760_v40  }
 0x76c PF: > { %812 = vrot.lane.b32.xlu0 %v2458_v16, %s2248_s16  ;;  %v1445_v41 = vld [vmem:[%s2453_s21 + $0x20] sm:$0xff]  ;;  %805 = vmatpush.msra.mxu1 %v2516_v62  ;;  %1804 = vrcp.f32 %v2193_v15  ;;  %v763_v47 = vld [vmem:[#allocation9 + $0x8] sm:$0xff]  ;;  %s2574_s14 = smov (!%p1423_p1), 0   ;;  %v2193_v15 = vphi %v2191_v15, %v2192_v15   ;;  %v2189_v14 = vphi %v2187_v14, %v2188_v14  }
 0x76d   : > { %1447 = vmatpush.xpose.msk.msra.mxu2 %vm399_vm1, %v1445_v41  ;;  %1444 = vmatmul.msk.f32.vlgmr.msra.gmra.mxu1 %vm399_vm1, %v2520_v1  ;;  %v1446_v46 = vld [vmem:[%s2453_s21 + $0x60] sm:$0xff] }
 0x76e   : > { %867 = vmatpush.msra.mxu3 %v1446_v46  ;;  %782 = vmatpush.msra.mxu0 %v763_v47 }
 0x772   : > { %v1805_v48 = vpop.eup %1804 }
 0x773   : > { %v762_v49 = vmul.f32 %v2189_v14, %v1805_v48 }
 0x775   : > { %1443 = vmatmul.msk.f32.vlgmr.msra.gmra.mxu0 %vm399_vm1, %v762_v49 }
 0x7de   : > { %v2558_v42 = vpop.permute.xlu0 %812 }
 0x7df   : > { %1448 = vmatmul.msk.f32.vlgmr.msra.gmra.mxu2 %vm399_vm1, %v2558_v42 }
 0x7ea   : > { %v807_v55 = vpop.f32.mrf.mxu1 }
 0x7f2   : > { %v784_v56 = vpop.f32.mrf.mxu0 }
 0x7f3   : > { %v2570_v57 = vadd.f32 %v807_v55, %v784_v56 }
 0x862   : > { %v836_v43 = vpop.f32.mrf.mxu2 }
 0x863   : > { %v839_v44 = vsel %vm477_vm2, %v836_v43, -3.4028235e+38 }
 0x864   : > { %v840_v45 = vsel %vm399_vm1, %v839_v44, -inf }
 0x865   : > { %841 = vmax.xlane.f32.xlu0 %v840_v45 }
 0x8d8   : > { %v842_v50 = vpop.xlane.xlu0 %841  }
 0x8d9   : > { %v843_v51 = vsub.f32 %v839_v44, %v842_v50 }
 0x8db   : > { %v844_v52 = vmul.f32 1.442695, %v843_v51 }
 0x8dd   : > { %1806 = vpow2.f32 %v844_v52 }
 0x8e3   : > { %v1807_v53 = vpop.eup %1806 }
 0x8e4   : > { %1449 = vmatmul.msk.f32.vlgmr.msra.gmra.mxu3 %vm399_vm1, %v1807_v53  ;;  %v846_v54 = vsel %vm399_vm1, %v1807_v53, 0.0 }
 0x8e5   : > { %847 = vadd.xlane.f32.xlu1 %v846_v54 }
 0x958   : > { %v848_v58 = vpop.xlane.xlu1 %847  }
 0x959   : > { %v2215_v61 = vmov %v848_v58  }
 0x964   : > { %1301 = sbr.rel (%p1423_p1) target bundleno = 2801 (0xaf1), region = 165 }
 0x967   : > { %v869_v59 = vpop.f32.mrf.mxu3  }
 0x968   : > { %v2211_v60 = vmov %v869_v59  }
 0x969   : > { %v2195_v62 = vmov %v869_v59   ;;  %v2199_v63 = vmov %v848_v58   ;;  %v2203_v0 = vmov %v842_v50  }
 0x96a LB: >> { %s1451_s16 = sshll.u32 %s2209_s14, 3  ;;  %s875_s14 = sadd.s32 1, %s2209_s14   ;;  %s2209_s14 = sphi %s2574_s14, %s875_s14   ;;  %v2205_v0 = vphi %v2203_v0, %v2204_v0   ;;  %v2201_v63 = vphi %v2199_v63, %v2200_v63   ;;  %v2197_v62 = vphi %v2195_v62, %v2196_v62  }
 0x96b   : >> { %s1247_s23 = scalar_lea.vmem [#allocation2], %s1451_s16  ;;  %p874_p9 = scmp.ge.s32.totalorder %s875_s14, %s2129_s27 }
 0x96c   : >> { %v1452_v1 = vld [vmem:[%s1247_s23 + $0x20] sm:$0xff] }
 0x96d   : >> { %1455 = vmatpush.xpose.msk.msra.mxu0 %vm399_vm1, %v1452_v1  ;;  %v1454_v4 = vld [vmem:[%s1247_s23 + $0x60] sm:$0xff] }
 0x96e   : >> { %945 = vmatpush.msra.mxu1 %v1454_v4 }
 0x970   : >> { %1456 = vmatmul.msk.f32.vlgmr.msra.gmra.mxu0 %vm399_vm1, %v2558_v42 }
 0x9ed   : >> { %v908_v2 = vpop.f32.mrf.mxu0 }
 0x9ee   : >> { %v911_v3 = vsel %vm399_vm1, %v908_v2, -inf }
 0x9ef   : >> { %912 = vmax.xlane.f32.xlu0 %v911_v3 }
 0xa62   : >> { %v913_v5 = vpop.xlane.xlu0 %912 }
 0xa63   : >> { %v914_v6 = vmax.f32 %v2205_v0, %v913_v5  }
 0xa65   : >> { %v915_v7 = vsub.f32 %v2205_v0, %v914_v6  ;;  %v918_v8 = vsub.f32 %v908_v2, %v914_v6  ;;  %v2204_v0 = vmov %v914_v6  }
 0xa67   : >> { %v919_v9 = vmul.f32 1.442695, %v918_v8  ;;  %v916_v12 = vmul.f32 1.442695, %v915_v7 }
 0xa69   : >> { %1808 = vpow2.f32 %v919_v9 }
 0xa6a   : >> { %1810 = vpow2.f32 %v916_v12 }
 0xa6f   : >> { %v1809_v10 = vpop.eup %1808 }
 0xa70   : >> { %1457 = vmatmul.msk.f32.vlgmr.msra.gmra.mxu1 %vm399_vm1, %v1809_v10  ;;  %v922_v11 = vsel %vm399_vm1, %v1809_v10, 0.0  ;;  %v1811_v13 = vpop.eup %1810 }
 0xa71   : >> { %923 = vadd.xlane.f32.xlu0 %v922_v11  ;;  %v921_v14 = vmul.f32 %v2201_v63, %v1811_v13  ;;  %v926_v18 = vmul.f32 %v2197_v62, %v1811_v13 }
 0xae4   : >> { %v924_v15 = vpop.xlane.xlu0 %923 }
 0xae5   : >> { %v925_v17 = vadd.f32 %v924_v15, %v921_v14  }
 0xae7   : >> { %v2200_v63 = vmov %v925_v17   ;;  %v2216_v61 = vmov (%p874_p9), %v925_v17  }
 0xaec   : > { %877 = sbr.rel (!%p874_p9) target bundleno = 2410 (0x96a), region = 171 }
 0xaed   : >> { %v947_v19 = vpop.f32.mrf.mxu1 }
 0xaee   : >> { %v950_v20 = vadd.f32 %v947_v19, %v926_v18  }
 0xaf0   : >> { %v2196_v62 = vmov %v950_v20   ;;  %v2212_v60 = vmov (%p874_p9), %v950_v20  }
 0xaf1 PF: > { %980 = vrot.lane.b32.xlu0 %v2458_v16, %s2253_s18  ;;  %v1459_v21 = vld [vmem:[%s2453_s21 + $0x30] sm:$0xff]  ;;  %1812 = vrcp.f32 %v2217_v61  ;;  %v953_v16 = vld [vmem:[#allocation9 + $0x10] sm:$0xff]  ;;  %s2611_s12 = smov (!%p1423_p1), 0   ;;  %v2217_v61 = vphi %v2215_v61, %v2216_v61   ;;  %v2213_v60 = vphi %v2211_v60, %v2212_v60  }
 0xaf2   : > { %1461 = vmatpush.xpose.msk.msra.mxu1 %vm399_vm1, %v1459_v21  ;;  %v1460_v28 = vld [vmem:[%s2453_s21 + $0x70] sm:$0xff]  ;;  %972 = vmatpush.msra.mxu0 %v953_v16 }
 0xaf3   : > { %1035 = vmatpush.msra.mxu2 %v1460_v28 }
 0xaf7   : > { %v1813_v29 = vpop.eup %1812 }
 0xaf8   : > { %v952_v30 = vmul.f32 %v2213_v60, %v1813_v29 }
 0xafa   : > { %1458 = vmatmul.msk.f32.vlgmr.msra.gmra.mxu0 %vm399_vm1, %v952_v30 }
 0xb63   : > { %v2594_v22 = vpop.permute.xlu0 %980 }
 0xb64   : > { %1462 = vmatmul.msk.f32.vlgmr.msra.gmra.mxu1 %vm399_vm1, %v2594_v22 }
 0xb77   : > { %v974_v25 = vpop.f32.mrf.mxu0 }
 0xb78   : > { %v2607_v35 = vadd.f32 %v974_v25, %v2570_v57 }
 0xbe1   : > { %v1004_v23 = vpop.f32.mrf.mxu1 }
 0xbe2   : > { %v1007_v26 = vsel %vm477_vm2, %v1004_v23, -3.4028235e+38 }
 0xbe3   : > { %v1008_v27 = vsel %vm399_vm1, %v1007_v26, -inf }
 0xbe4   : > { %1009 = vmax.xlane.f32.xlu0 %v1008_v27 }
 0xc57   : > { %v1010_v31 = vpop.xlane.xlu0 %1009  }
 0xc58   : > { %v1011_v32 = vsub.f32 %v1007_v26, %v1010_v31 }
 0xc5a   : > { %v1012_v33 = vmul.f32 1.442695, %v1011_v32 }
 0xc5c   : > { %1814 = vpow2.f32 %v1012_v33 }
 0xc62   : > { %v1815_v34 = vpop.eup %1814 }
 0xc63   : > { %1463 = vmatmul.msk.f32.vlgmr.msra.gmra.mxu2 %vm399_vm1, %v1815_v34  ;;  %v1014_v24 = vsel %vm399_vm1, %v1815_v34, 0.0 }
 0xc64   : > { %1015 = vadd.xlane.f32.xlu1 %v1014_v24 }
 0xcd7   : > { %v1016_v36 = vpop.xlane.xlu1 %1015  }
 0xcd8   : > { %v2239_v39 = vmov %v1016_v36  }
 0xce3   : > { %1315 = sbr.rel (%p1423_p1) target bundleno = 3696 (0xe70), region = 176 }
 0xce6   : > { %v1037_v37 = vpop.f32.mrf.mxu2  }
 0xce7   : > { %v2235_v38 = vmov %v1037_v37  }
 0xce8   : > { %v2219_v40 = vmov %v1037_v37   ;;  %v2223_v41 = vmov %v1016_v36   ;;  %v2227_v42 = vmov %v1010_v31  }
 0xce9 LB: >> { %s1465_s17 = sshll.u32 %s2233_s12, 3  ;;  %s1043_s12 = sadd.s32 1, %s2233_s12   ;;  %s2233_s12 = sphi %s2611_s12, %s1043_s12   ;;  %v2229_v42 = vphi %v2227_v42, %v2228_v42   ;;  %v2225_v41 = vphi %v2223_v41, %v2224_v41   ;;  %v2221_v40 = vphi %v2219_v40, %v2220_v40  }
 0xcea   : >> { %s1253_s21 = scalar_lea.vmem [#allocation2], %s1465_s17  ;;  %p1042_p10 = scmp.ge.s32.totalorder %s1043_s12, %s2129_s27 }
 0xceb   : >> { %v1466_v43 = vld [vmem:[%s1253_s21 + $0x30] sm:$0xff] }
 0xcec   : >> { %1469 = vmatpush.xpose.msk.msra.mxu0 %vm399_vm1, %v1466_v43  ;;  %v1468_v46 = vld [vmem:[%s1253_s21 + $0x70] sm:$0xff] }
 0xced   : >> { %1113 = vmatpush.msra.mxu1 %v1468_v46 }
 0xcef   : >> { %1470 = vmatmul.msk.f32.vlgmr.msra.gmra.mxu0 %vm399_vm1, %v2594_v22 }
 0xd6c   : >> { %v1076_v44 = vpop.f32.mrf.mxu0 }
 0xd6d   : >> { %v1079_v45 = vsel %vm399_vm1, %v1076_v44, -inf }
 0xd6e   : >> { %1080 = vmax.xlane.f32.xlu0 %v1079_v45 }
 0xde1   : >> { %v1081_v47 = vpop.xlane.xlu0 %1080 }
 0xde2   : >> { %v1082_v48 = vmax.f32 %v2229_v42, %v1081_v47  }
 0xde4   : >> { %v1083_v49 = vsub.f32 %v2229_v42, %v1082_v48  ;;  %v1086_v50 = vsub.f32 %v1076_v44, %v1082_v48  ;;  %v2228_v42 = vmov %v1082_v48  }
 0xde6   : >> { %v1087_v51 = vmul.f32 1.442695, %v1086_v50  ;;  %v1084_v54 = vmul.f32 1.442695, %v1083_v49 }
 0xde8   : >> { %1816 = vpow2.f32 %v1087_v51 }
 0xde9   : >> { %1818 = vpow2.f32 %v1084_v54 }
 0xdee   : >> { %v1817_v52 = vpop.eup %1816 }
 0xdef   : >> { %1471 = vmatmul.msk.f32.vlgmr.msra.gmra.mxu1 %vm399_vm1, %v1817_v52  ;;  %v1090_v53 = vsel %vm399_vm1, %v1817_v52, 0.0  ;;  %v1819_v55 = vpop.eup %1818 }
 0xdf0   : >> { %1091 = vadd.xlane.f32.xlu0 %v1090_v53  ;;  %v1089_v56 = vmul.f32 %v2225_v41, %v1819_v55  ;;  %v1094_v59 = vmul.f32 %v2221_v40, %v1819_v55 }
 0xe63   : >> { %v1092_v57 = vpop.xlane.xlu0 %1091 }
 0xe64   : >> { %v1093_v58 = vadd.f32 %v1092_v57, %v1089_v56  }
 0xe66   : >> { %v2224_v41 = vmov %v1093_v58   ;;  %v2240_v39 = vmov (%p1042_p10), %v1093_v58  }
 0xe6b   : > { %1045 = sbr.rel (!%p1042_p10) target bundleno = 3305 (0xce9), region = 182 }
 0xe6c   : >> { %v1115_v60 = vpop.f32.mrf.mxu1 }
 0xe6d   : >> { %v1118_v61 = vadd.f32 %v1115_v60, %v1094_v59  }
 0xe6f   : >> { %v2220_v40 = vmov %v1118_v61   ;;  %v2236_v38 = vmov (%p1042_p10), %v1118_v61  }
 0xe70 PF: > { %v1121_v62 = vld [vmem:[#allocation9 + $0x18] sm:$0xff]  ;;  %1821 = vrcp.f32 %v2241_v39  ;;  %s1474_s22 = sshll.u32 %s2133_s28, 1  ;;  %s2715_s24 = sld [smem:[#allocation24_spill]]  ;;  %v2241_v39 = vphi %v2239_v39, %v2240_v39   ;;  %v2237_v38 = vphi %v2235_v38, %v2236_v38  }
 0xe71   : > { %1140 = vmatpush.msra.mxu0 %v1121_v62  ;;  %s1163_s11 = sadd.s32 %s2129_s27, %s1474_s22  ;;  %s1167_s10 = sshll.u32 %s2493_s13, 4  ;;  %s1168_s10 = int_to_ptr.vmem [resolvable:$true] %s1167_s10 }
 0xe72   : > { %s1475_s15 = sshll.u32 %s1163_s11, 3  ;;  %s1153_s27 = scalar_lea.sflag [#allocation5], %s2424_s1 }
 0xe73   : > { %s1165_s3 = scalar_lea.hbm %s2686_s7, %s1475_s15  ;;  %s1963_s17 = scalar_lea.hbm %s2686_s7, 32 }
 0xe74   : > { %s1169_s14 = sshll.u32 %s1165_s3, 4  ;;  %s1170_s14 = int_to_ptr.hbm [resolvable:$true] %s1169_s14 }
 0xe75   : > { %s1957_s28 = sshra.s32 %s1170_s14, 4  ;;  %s1958_s28 = int_to_ptr.hbm [resolvable:$true] %s1957_s28 }
 0xe76   : > { %v1822_v63 = vpop.eup %1821  ;;  %v1820_v1 = vld [vmem:[%s2715_s24] ss:$0 sm:$0xff]  ;;  %s1959_s16 = scalar_lea.hbm %s1958_s28, 8  ;;  %p1964_p0 = scmp.lt.s32.totalorder %s1958_s28, %s2686_s7 }
 0xe77   : > { %v1120_v0 = vmul.f32 %v2237_v38, %v1822_v63  ;;  %p1960_p11 = scmp.ne.s32.totalorder %s1958_s28, %s1959_s16  ;;  %p1965_p5 = scmp.lt.s32.totalorder %s1963_s17, %s1959_s16 }
 0xe79   : > { %1472 = vmatmul.msk.f32.vlgmr.msra.gmra.mxu0 %vm399_vm1, %v1120_v0  ;;  %p1961_p12 = pnand %p1960_p11, %p2399_p2  ;;  %p1966_p6 = por %p1965_p5, %p1964_p0 }
 0xe7b   : > { %p1962_p13 = pneg %p1961_p12 }
 0xe7d   : > { %p1967_p7 = pnand %p1966_p6, %p1962_p13 }
 0xef6   : > { %v1142_v2 = vpop.f32.mrf.mxu0 }
 0xef7   : > { %v1145_v3 = vadd.f32 %v1142_v2, %v2607_v35 }
 0xef9   : > { %v1150_v4 = vadd.f32 %v1820_v1, %v1145_v3 }
 0xefb   : > { %1151 = vst.msk [vmem:[%s2493_s13] sm:$0xff] %vm374_vm0, %v1150_v4 }
 0xefc   : > { %1970 = shalt.err (!%p1967_p7)
}
 0xefd   : > { %1492 = dma.vmem_to_hbm [thread:$0]  (%p2399_p2), %s1168_s10, 128, %s1170_s14, %s1153_s27  }
 0xefe PF: > { %s2716_s1 = sld [smem:[#allocation16_spill]]  ;;  %p1519_p1 = scmp.ge.s32.totalorder %s2145_s8, 2 }
 0xf00   : > { %p1509_p3 = pnand %p1519_p1, %p2405_p4 }
 0xf02   : > { %p1510_p8 = pneg %p1509_p3 }
 0xf04   : > { %s1181_s11 = sand.u32 1, %s2716_s1  }
 0xf05   : > { %s1182_s15 = scalar_lea.sflag [#allocation5], %s1181_s11 }
 0xf06   : > { %2112 = dma.done.wait (%p1510_p8), %s1182_s15, 128  }
 0xf07   : > { %2114 = vsyncadd (%p1510_p8), %s1182_s15, 4294967168  ;;  %s25_s8 = sadd.s32 1, %s2145_s8   ;;  %s2718_s18 = sld [smem:[#allocation17_spill]] }
 0xf08   : > { %p22_p9 = scmp.ge.s32.totalorder %s25_s8, 6   ;;  %s2719_s19 = sld [smem:[#allocation18_spill]] }
 0xf09   : > { %s2720_s24 = smov %s2121_s25  ;;  %s2721_s25 = smov %s2125_s26 }
 0xf0a   : > { %s2722_s26 = smov %s2412_s9  ;;  %s2723_s27 = smov %s2137_s29 }
 0xf0b   : > { %s2724_s28 = smov %s2141_s30  ;;  %24 = sbr.rel (!%p22_p9) target bundleno = 14 (0xe), region = 193 }
 0xf0d   : > { %s2725_s29 = smov %s2718_s18 }
 0xf0e   : > { %s2726_s30 = smov %s2719_s19 }
 0xf10   :  { %1188 = vsyncpa [#allocation4], 1 }
 0xf11   :  { %1190 = vsyncpa [#allocation4 + $0x1], 1 }
 0xf12   :  { %1191 = vsyncpa [#allocation7], 1 }
 0xf13   :  { %1192 = vsyncpa [#allocation10], 1 }
 0xf14   :  { %1193 = vsyncpa [#allocation5], 1 }
 0xf15   :  { %1195 = vsyncpa [#allocation5 + $0x1], 1 }

// kernel: tpu_custom_call.1
= control target key start
LH: loop header
LB: loop body
LE: loop exit
PB: predicated region body
PF: predicated region fallthrough
CT: control target
= control target key end

     0   :  { %s2679_s0 = inlined_call_operand.hbm [shape: f32[2,16,32], index: 0, kind: input, shape index: {}]   ;;  %s2680_s1 = inlined_call_operand.hbm [shape: f32[32,32], index: 1, kind: input, shape index: {}]   ;;  %s2681_s2 = inlined_call_operand.vmem [shape: f32[1,32], index: 2, kind: input, shape index: {}]   ;;  %s2682_s3 = inlined_call_operand.hbm [shape: f32[32,64], index: 3, kind: input, shape index: {}]   ;;  %s2683_s4 = inlined_call_operand.vmem [shape: f32[1,64], index: 4, kind: input, shape index: {}]   ;;  %s2684_s5 = inlined_call_operand.hbm [shape: f32[32,32], index: 5, kind: input, shape index: {}]   ;;  %s2685_s6 = inlined_call_operand.vmem [shape: f32[1,32], index: 6, kind: input, shape index: {}]   ;;  %s2686_s7 = inlined_call_operand.hbm [shape: f32[2,16,32], index: 7, kind: output, shape index: {}]  }
   0x1   :  { %2694 = sst [smem:[#allocation21_spill]] %s2680_s1 }
   0x2   :  { %2695 = sst [smem:[#allocation22_spill]] %s2682_s3 }
   0x3   :  { %2696 = sst [smem:[#allocation23_spill]] %s2684_s5 }
   0x4   :  { %2697 = sst [smem:[#allocation24_spill]] %s2685_s6 }
   0x5   :  { %12 = vsyncpa [#allocation4], 0 }
   0x6   :  { %14 = vsyncpa [#allocation4 + $0x1], 0 }
   0x7   :  { %15 = vsyncpa [#allocation7], 0 }
   0x8   :  { %16 = vsyncpa [#allocation10], 0 }
   0x9   :  { %17 = vsyncpa [#allocation5], 0 }
   0xa   :  { %19 = vsyncpa [#allocation5 + $0x1], 0  ;;  %s2295_s24 = smov 0   ;;  %s2297_s25 = smov 0  }
   0xb   :  { %s2299_s26 = smov 0   ;;  %s2301_s27 = smov 0  }
   0xc   :  { %s2303_s28 = smov 0   ;;  %s2305_s29 = smov 0  }
   0xd   :  { %s2307_s30 = smov 0   ;;  %s2309_s8 = smov 0  }
   0xe LB: > { %2698 = sst [smem:[#allocation16_spill]] %s2117_s24  ;;  %s2687_s9 = sadd.s32 4294967295, %s2145_s8   ;;  %s2145_s8 = sphi %s2309_s8, %s25_s8   ;;  %s2141_s30 = sphi %s2307_s30, %s2726_s30   ;;  %s2137_s29 = sphi %s2305_s29, %s2725_s29   ;;  %s2133_s28 = sphi %s2303_s28, %s2724_s28   ;;  %s2129_s27 = sphi %s2301_s27, %s2723_s27   ;;  %s2125_s26 = sphi %s2299_s26, %s2722_s26   ;;  %s2121_s25 = sphi %s2297_s25, %s2721_s25   ;;  %s2117_s24 = sphi %s2295_s24, %s2720_s24  }
   0xf   : > { %p1388_p0 = scmp.ge.s32.totalorder %s2145_s8, 1  ;;  %p2339_p1 = scmp.eq.s32.totalorder %s2687_s9, 0 }
  0x10   : > { %p224_p2 = scmp.lt.s32.totalorder %s2145_s8, 5  ;;  %s2700_s1 = sld [smem:[#allocation21_spill]] }
  0x11   : > { %s2243_s15 = smov [#allocation6]   ;;  %s2703_s3 = sld [smem:[#allocation22_spill]] }
  0x12   : > { %p2347_p3 = pnand %p1388_p0, %p224_p2  ;;  %s237_s16 = sshll.u32 %s2243_s15, 4  ;;  %s238_s16 = int_to_ptr.vmem [resolvable:$true] %s237_s16 }
  0x13   : > { %s2244_s21 = smov 128   ;;  %s2245_s22 = smov 8  }
  0x14   : > { %p1494_p4 = pneg %p2347_p3  ;;  %s2246_s23 = smov [#allocation8]  }
  0x15   : > { %s254_s11 = sshll.u32 %s2246_s23, 4  ;;  %s2704_s5 = sld [smem:[#allocation23_spill]]  ;;  %s255_s11 = int_to_ptr.vmem [resolvable:$true] %s254_s11 }
  0x16   : > { %s235_s13 = sshll.u32 %s2700_s1, 4  ;;  %p2355_p5 = pnand %p1494_p4, %p2339_p1  ;;  %s236_s13 = int_to_ptr.hbm [resolvable:$true] %s235_s13 }
  0x17   : > { %s252_s20 = sshll.u32 %s2703_s3, 4  ;;  %s2247_s19 = smov [#allocation9]   ;;  %s253_s20 = int_to_ptr.hbm [resolvable:$true] %s252_s20 }
  0x18   : > { %1497 = dma.hbm_to_vmem [thread:$0]  (!%p2355_p5), %s236_s13, 512, %s238_s16, [#allocation7], %s2244_s21, %s2244_s21, %s2245_s22  }
  0x19   : > { %1500 = dma.hbm_to_vmem [thread:$0]  (!%p2355_p5), %s253_s20, 512, %s255_s11, [#allocation7], %s2244_s21, %s2244_s21, %s2245_s22  }
  0x1a   : > { %s271_s9 = sshll.u32 %s2247_s19, 4  ;;  %s1387_s13 = sadd.s32 4294967294, %s2145_s8   ;;  %s272_s9 = int_to_ptr.vmem [resolvable:$true] %s271_s9 }
  0x1b   : > { %s269_s18 = sshll.u32 %s2704_s5, 4  ;;  %s34_s16 = sadd.s32 1, %s2137_s29  ;;  %s270_s18 = int_to_ptr.hbm [resolvable:$true] %s269_s18 }
  0x1c   : > { %1503 = dma.hbm_to_vmem [thread:$0]  (!%p2355_p5), %s270_s18, 512, %s272_s9, [#allocation10], %s2244_s21, %s2244_s21, %s2245_s22  }
  0x1d   : > { %s37_s23 = sadd.s32 1, %s2141_s30  ;;  %p35_p6 = scmp.ge.s32.totalorder %s34_s16, 2 }
  0x1e   : > { %s46_s12 = sadd.s32 1, %s2125_s26  ;;  %p53_p7 = scmp.ne.s32.totalorder %s2125_s26, %s2121_s25 }
  0x1f   : > { %p54_p8 = scmp.eq.s32.totalorder %s2145_s8, 0  ;;  %s2728_s16 = smov (%p35_p6, %s34_s16), 0 }
  0x20   : > { %2705 = sst [smem:[#allocation17_spill]] %s2728_s16  ;;  %s2730_s23 = smov (!%p35_p6, %s37_s23), %s2141_s30 }
  0x21   : > { %s42_s20 = ssub.s32 %s2137_s29, %s2728_s16  ;;  %p2383_p9 = por %p54_p8, %p53_p7 }
  0x22   : > { %p39_p10 = scmp.ge.s32.totalorder %s2730_s23, 2  ;;  %p59_p11 = scmp.ne.s32.totalorder %s2121_s25, %s2117_s24 }
  0x23   : > { %s2707_s9 = sadd.s32 4294967295, %s2145_s8   ;;  %p217_p13 = scmp.eq.s32.totalorder %s1387_s13, 3 }
  0x24   : > { %p211_p12 = scmp.eq.s32.totalorder %s2707_s9, 3  ;;  %s2732_s23 = smov (%p39_p10, %s2730_s23), 0 }
  0x25   : > { %2708 = sst [smem:[#allocation18_spill]] %s2732_s23  ;;  %p2395_p0 = por %p2339_p1, %p59_p11 }
  0x26   : > { %p2399_p2 = por %p211_p12, %p53_p7  ;;  %s41_s11 = ssub.s32 %s2141_s30, %s2732_s23 }
  0x27   : > { %p2405_p4 = por %p217_p13, %p59_p11  ;;  %s43_s18 = sor.u32 %s42_s20, %s41_s11 }
  0x28   : > { %s2710_s22 = scalar_select %p2399_p2, 1, 0 }
  0x29   : > { %s2712_s15 = scalar_select %p2405_p4, 1, 0 }
  0x2a   : > { %2711 = sst [smem:[#allocation19_spill]] %s2710_s22  ;;  %p1515_p5 = scmp.lt.s32.totalorder %s2145_s8, 4 }
  0x2b   : > { %2713 = sst [smem:[#allocation20_spill]] %s2712_s15  ;;  %p44_p6 = scmp.eq.s32.totalorder %s43_s18, 0 }
  0x2c   : > { %s288_s19 = sand.u32 1, %s2125_s26   ;;  %s1394_s1 = sshll.u32 %s2141_s30, 1 }
  0x2d   : > { %s1393_s13 = sshll.u32 %s288_s19, 3  ;;  %s296_s3 = sadd.s32 %s2137_s29, %s1394_s1 }
  0x2e   : > { %s2412_s9 = scalar_select %p44_p6, %s2125_s26, %s46_s12  }
  0x2f   : > { %s292_s5 = scalar_lea.vmem [#allocation3], %s1393_s13  ;;  %s1395_s24 = sshll.u32 %s296_s3, 3 }
  0x30   : > { %s302_s16 = sshll.u32 %s292_s5, 4  ;;  %s298_s23 = scalar_lea.hbm %s2679_s0, %s1395_s24  ;;  %s303_s16 = int_to_ptr.vmem [resolvable:$true] %s302_s16 }
  0x31   : > { %p1505_p7 = pnand %p1515_p5, %p2383_p9  ;;  %s300_s15 = sshll.u32 %s298_s23, 4  ;;  %s301_s15 = int_to_ptr.hbm [resolvable:$true] %s300_s15 }
  0x32   : > { %s289_s20 = scalar_lea.sflag [#allocation4], %s288_s19  ;;  %311 = sbr.rel (%p2347_p3) target bundleno = 3838 (0xefe), region = 48 }
  0x33   : > { %1507 = dma.hbm_to_vmem [thread:$0]  (!%p1505_p7), %s301_s15, 128, %s303_s16, %s289_s20  }
  0x34   : > { %s2424_s1 = sand.u32 (!%p2347_p3), 1, %s2121_s25  }
  0x35   : > { %s1397_s3 = sshll.u32 (!%p2347_p3), %s2424_s1, 3  ;;  %s314_s5 = scalar_lea.sflag (!%p2347_p3), [#allocation4], %s2424_s1 }
  0x36   : > { %s317_s6 = scalar_lea.vmem (!%p2347_p3), [#allocation3], %s1397_s3 }
  0x37   : > { %2100 = dma.done.wait (%p2395_p0), %s314_s5, 128  }
  0x38   : > { %2102 = vsyncadd (%p2395_p0), %s314_s5, 4294967168 }
  0x39   : > { %2104 = dma.done.wait (%p2339_p1), [#allocation7], 1024  }
  0x3a   : > { %2106 = vsyncadd (%p2339_p1), [#allocation7], 4294966272 }
  0x3b   : > { %2108 = dma.done.wait (%p2339_p1), [#allocation10], 512  }
  0x3c   : > { %2110 = vsyncadd (%p2339_p1), [#allocation10], 4294966784  ;;  %v369_v0 = vld [vmem:[#allocation8 + $0x18] sm:$0xff]  ;;  %v368_v1 = vld [vmem:[#allocation8 + $0x10] sm:$0xff]  ;;  %vm374_vm0 = vcmask 261120   ;;  %s1402_s14 = sshll.u32 %s2129_s27, 3  ;;  %v473_v23 = vlaneseq }
  0x3d   : > { %390 = vmatpush.msra.mxu0 %v369_v0  ;;  %v447_v2 = vld [vmem:[#allocation6 + $0x18] sm:$0xff]  ;;  %v367_v3 = vld [vmem:[#allocation8 + $0x8] sm:$0xff]  ;;  %v446_v4 = vld [vmem:[#allocation6 + $0x10] sm:$0xff]  ;;  %vm399_vm1 = vcmask 64512   ;;  %s2248_s16 = smov 112   ;;  %s2249_s23 = smov 120  }
  0x3e   : > { %464 = vmatpush.msra.mxu1 %v447_v2  ;;  %v445_v5 = vld [vmem:[#allocation6 + $0x8] sm:$0xff]  ;;  %v366_v6 = vld [vmem:[#allocation8] sm:$0xff]  ;;  %v364_v7 = vld [vmem:[%s317_s6] sm:$0xff]  ;;  %s2453_s21 = scalar_lea.vmem [#allocation2], %s1402_s14  ;;  %s2250_s22 = smov 80   ;;  %v2476_v24 = vshrl.u32 %v473_v23, 7 }
  0x3f   : > { %391 = vmatpush.msra.mxu0 %v368_v1  ;;  %v444_v8 = vld [vmem:[#allocation6] sm:$0xff]  ;;  %v1788_v9 = vld [vmem:[%s2683_s4] ss:$0 sm:$0xff]  ;;  %s2251_s11 = smov 88   ;;  %s2252_s15 = smov 72   ;;  %v2478_v25 = vand.u32 127, %v473_v23 }
  0x40   : > { %465 = vmatpush.msra.mxu1 %v446_v4  ;;  %v1789_v12 = vld [vmem:[%s2681_s2] ss:$0 sm:$0xff]  ;;  %s2253_s18 = smov 104   ;;  %s2254_s19 = smov 96  }
  0x41   : > { %392 = vmatpush.msra.mxu0 %v367_v3  ;;  %vm477_vm2 = vcmp.le.s32.totalorder %v2478_v25, %v2476_v24  ;;  %s2493_s13 = scalar_lea.vmem [#allocation11], %s1397_s3  ;;  %p1423_p1 = scmp.le.s32.totalorder %s2129_s27, 0 }
  0x42   : > { %466 = vmatpush.msra.mxu1 %v445_v5  ;;  %s2498_s20 = smov (!%p1423_p1), 0  }
  0x43   : > { %393 = vmatpush.msra.mxu0 %v366_v6 }
  0x44   : > { %1403 = vmatmul.msk.f32.vlgmr.msra.gmra.mxu0 %vm374_vm0, %v364_v7  ;;  %467 = vmatpush.msra.mxu1 %v444_v8 }
  0x45   : > { %1418 = vmatmul.msk.f32.vlgmr.msra.gmra.mxu1 %vm374_vm0, %v364_v7 }
  0xc1   : > { %v395_v10 = vpop.f32.mrf.mxu0 }
  0xc2   : > { %v396_v11 = vadd.f32 %v1788_v9, %v395_v10  ;;  %v469_v13 = vpop.f32.mrf.mxu1 }
  0xc3   : > { %v470_v14 = vadd.f32 %v1789_v12, %v469_v13 }
  0xc4   : > { %420 = vrot.lane.b32.xlu2 %v396_v11, %s2248_s16  ;;  %408 = vrot.lane.b32.xlu1 %v396_v11, %s2249_s23  ;;  %400 = vst.msk [vmem:[%s2453_s21] sm:$0xff] %vm399_vm1, %v396_v11 }
  0xc5   : > { %v2458_v16 = vmul.f32 0.35355338, %v470_v14 }
  0xcb   : > { %v478_v15 = vld [vmem:[%s2453_s21] sm:$0xff] }
  0xcc   : > { %426 = vrot.lane.b32.xlu2 %v396_v11, %s2250_s22  ;;  %414 = vrot.lane.b32.xlu1 %v396_v11, %s2251_s11 }
  0xcd   : > { %1420 = vmatpush.xpose.msk.msra.mxu2 %vm399_vm1, %v478_v15 }
  0xd0   : > { %1421 = vmatmul.msk.f32.vlgmr.msra.gmra.mxu2 %vm399_vm1, %v2458_v16 }
  0xd4   : > { %438 = vrot.lane.b32.xlu2 %v396_v11, %s2252_s15  ;;  %432 = vrot.lane.b32.xlu1 %v396_v11, %s2253_s18 }
 0x11e   : > { %v421_v17 = vpop.permute.xlu2 %420 }
 0x11f   : > { %1411 = vst.msk [vmem:[%s2453_s21 + $0x20] sm:$0xff] %vm399_vm1, %v421_v17 }
 0x126   : > { %v427_v18 = vpop.permute.xlu2 %426 }
 0x127   : > { %1413 = vst.msk [vmem:[%s2453_s21 + $0x60] sm:$0xff] %vm399_vm1, %v427_v18 }
 0x12e   : > { %v439_v19 = vpop.permute.xlu2 %438 }
 0x12f   : > { %1417 = vst.msk [vmem:[%s2453_s21 + $0x70] sm:$0xff] %vm399_vm1, %v439_v19 }
 0x136   : > { %v409_v20 = vpop.permute.xlu1 %408 }
 0x137   : > { %1407 = vst.msk [vmem:[%s2453_s21 + $0x10] sm:$0xff] %vm399_vm1, %v409_v20 }
 0x13e   : > { %v415_v21 = vpop.permute.xlu1 %414 }
 0x13f   : > { %1409 = vst.msk [vmem:[%s2453_s21 + $0x50] sm:$0xff] %vm399_vm1, %v415_v21 }
 0x146   : > { %v433_v22 = vpop.permute.xlu1 %432 }
 0x147   : > { %1415 = vst.msk [vmem:[%s2453_s21 + $0x30] sm:$0xff] %vm399_vm1, %v433_v22 }
 0x153   : > { %v503_v26 = vpop.f32.mrf.mxu2 }
 0x154   : > { %v506_v27 = vsel %vm477_vm2, %v503_v26, -3.4028235e+38 }
 0x155   : > { %v507_v28 = vsel %vm399_vm1, %v506_v27, -inf }
 0x156   : > { %508 = vmax.xlane.f32.xlu0 %v507_v28 }
 0x16a   : > { %402 = vrot.lane.b32.xlu0 %v396_v11, %s2254_s19 }
 0x1c9   : > { %v509_v29 = vpop.xlane.xlu0 %508  }
 0x1ca   : > { %v510_v30 = vsub.f32 %v506_v27, %v509_v29 }
 0x1cc   : > { %v511_v31 = vmul.f32 1.442695, %v510_v30 }
 0x1ce   : > { %1790 = vpow2.f32 %v511_v31 }
 0x1d4   : > { %v1791_v32 = vpop.eup %1790 }
 0x1d5   : > { %v513_v33 = vsel %vm399_vm1, %v1791_v32, 0.0 }
 0x1d6   : > { %514 = vadd.xlane.f32.xlu1 %v513_v33 }
 0x1dc   : > { %v403_v34 = vpop.permute.xlu0 %402 }
 0x1dd   : > { %1405 = vst.msk [vmem:[%s2453_s21 + $0x40] sm:$0xff] %vm399_vm1, %v403_v34 }
 0x1e4   : > { %v1419_v35 = vld [vmem:[%s2453_s21 + $0x40] sm:$0xff] }
 0x1e5   : > { %534 = vmatpush.msra.mxu3 %v1419_v35 }
 0x1e6   : > { %1422 = vmatmul.msk.f32.vlgmr.msra.gmra.mxu3 %vm399_vm1, %v1791_v32 }
 0x249   : > { %v515_v36 = vpop.xlane.xlu1 %514  }
 0x24a   : > { %v2167_v39 = vmov %v515_v36  }
 0x266   : > { %1273 = sbr.rel (%p1423_p1) target bundleno = 1011 (0x3f3), region = 143 }
 0x269   : > { %v536_v37 = vpop.f32.mrf.mxu3  }
 0x26a   : > { %v2163_v38 = vmov %v536_v37  }
 0x26b   : > { %v2147_v40 = vmov %v536_v37   ;;  %v2151_v41 = vmov %v515_v36   ;;  %v2155_v42 = vmov %v509_v29  }
 0x26c LB: >> { %s1424_s3 = sshll.u32 %s2161_s20, 3  ;;  %s542_s20 = sadd.s32 1, %s2161_s20   ;;  %s2161_s20 = sphi %s2498_s20, %s542_s20   ;;  %v2157_v42 = vphi %v2155_v42, %v2156_v42   ;;  %v2153_v41 = vphi %v2151_v41, %v2152_v41   ;;  %v2149_v40 = vphi %v2147_v40, %v2148_v40  }
 0x26d   : >> { %s549_s5 = scalar_lea.vmem [#allocation2], %s1424_s3  ;;  %p541_p3 = scmp.ge.s32.totalorder %s542_s20, %s2129_s27 }
 0x26e   : >> { %v550_v43 = vld [vmem:[%s549_s5] sm:$0xff] }
 0x26f   : >> { %1427 = vmatpush.xpose.msk.msra.mxu0 %vm399_vm1, %v550_v43  ;;  %v1426_v46 = vld [vmem:[%s549_s5 + $0x40] sm:$0xff] }
 0x270   : >> { %611 = vmatpush.msra.mxu1 %v1426_v46 }
 0x272   : >> { %1428 = vmatmul.msk.f32.vlgmr.msra.gmra.mxu0 %vm399_vm1, %v2458_v16 }
 0x2ef   : >> { %v574_v44 = vpop.f32.mrf.mxu0 }
 0x2f0   : >> { %v577_v45 = vsel %vm399_vm1, %v574_v44, -inf }
 0x2f1   : >> { %578 = vmax.xlane.f32.xlu0 %v577_v45 }
 0x364   : >> { %v579_v47 = vpop.xlane.xlu0 %578 }
 0x365   : >> { %v580_v48 = vmax.f32 %v2157_v42, %v579_v47  }
 0x367   : >> { %v581_v49 = vsub.f32 %v2157_v42, %v580_v48  ;;  %v584_v50 = vsub.f32 %v574_v44, %v580_v48  ;;  %v2156_v42 = vmov %v580_v48  }
 0x369   : >> { %v585_v51 = vmul.f32 1.442695, %v584_v50  ;;  %v582_v54 = vmul.f32 1.442695, %v581_v49 }
 0x36b   : >> { %1792 = vpow2.f32 %v585_v51 }
 0x36c   : >> { %1794 = vpow2.f32 %v582_v54 }
 0x371   : >> { %v1793_v52 = vpop.eup %1792 }
 0x372   : >> { %1429 = vmatmul.msk.f32.vlgmr.msra.gmra.mxu1 %vm399_vm1, %v1793_v52  ;;  %v588_v53 = vsel %vm399_vm1, %v1793_v52, 0.0  ;;  %v1795_v55 = vpop.eup %1794 }
 0x373   : >> { %589 = vadd.xlane.f32.xlu0 %v588_v53  ;;  %v587_v56 = vmul.f32 %v2153_v41, %v1795_v55  ;;  %v592_v59 = vmul.f32 %v2149_v40, %v1795_v55 }
 0x3e6   : >> { %v590_v57 = vpop.xlane.xlu0 %589 }
 0x3e7   : >> { %v591_v58 = vadd.f32 %v590_v57, %v587_v56  }
 0x3e9   : >> { %v2152_v41 = vmov %v591_v58   ;;  %v2168_v39 = vmov (%p541_p3), %v591_v58  }
 0x3ee   : > { %544 = sbr.rel (!%p541_p3) target bundleno = 620 (0x26c), region = 149 }
 0x3ef   : >> { %v613_v60 = vpop.f32.mrf.mxu1 }
 0x3f0   : >> { %v616_v61 = vadd.f32 %v613_v60, %v592_v59  }
 0x3f2   : >> { %v2148_v40 = vmov %v616_v61   ;;  %v2164_v38 = vmov (%p541_p3), %v616_v61  }
 0x3f3 PF: > { %622 = vrot.lane.b32.xlu0 %v2458_v16, %s2249_s23  ;;  %1796 = vrcp.f32 %v2169_v39  ;;  %v2516_v62 = vld [vmem:[#allocation9] sm:$0xff]  ;;  %s2535_s6 = smov (!%p1423_p1), 0   ;;  %v2169_v39 = vphi %v2167_v39, %v2168_v39   ;;  %v2165_v38 = vphi %v2163_v38, %v2164_v38  }
 0x3f4   : > { %v1430_v63 = vld [vmem:[%s2453_s21 + $0x10] sm:$0xff] }
 0x3f5   : > { %1432 = vmatpush.xpose.msk.msra.mxu0 %vm399_vm1, %v1430_v63  ;;  %v1431_v6 = vld [vmem:[%s2453_s21 + $0x50] sm:$0xff] }
 0x3f6   : > { %677 = vmatpush.msra.mxu1 %v1431_v6 }
 0x3f9   : > { %v1797_v0 = vpop.eup %1796 }
 0x3fa   : > { %v2520_v1 = vmul.f32 %v2165_v38, %v1797_v0 }
 0x465   : > { %v2522_v2 = vpop.permute.xlu0 %622 }
 0x466   : > { %1433 = vmatmul.msk.f32.vlgmr.msra.gmra.mxu0 %vm399_vm1, %v2522_v2 }
 0x4e3   : > { %v646_v3 = vpop.f32.mrf.mxu0 }
 0x4e4   : > { %v649_v4 = vsel %vm477_vm2, %v646_v3, -3.4028235e+38 }
 0x4e5   : > { %v650_v5 = vsel %vm399_vm1, %v649_v4, -inf }
 0x4e6   : > { %651 = vmax.xlane.f32.xlu0 %v650_v5 }
 0x559   : > { %v652_v7 = vpop.xlane.xlu0 %651  }
 0x55a   : > { %v653_v8 = vsub.f32 %v649_v4, %v652_v7 }
 0x55c   : > { %v654_v9 = vmul.f32 1.442695, %v653_v8 }
 0x55e   : > { %1798 = vpow2.f32 %v654_v9 }
 0x564   : > { %v1799_v10 = vpop.eup %1798 }
 0x565   : > { %1434 = vmatmul.msk.f32.vlgmr.msra.gmra.mxu1 %vm399_vm1, %v1799_v10  ;;  %v656_v11 = vsel %vm399_vm1, %v1799_v10, 0.0 }
 0x566   : > { %657 = vadd.xlane.f32.xlu1 %v656_v11 }
 0x5d9   : > { %v658_v12 = vpop.xlane.xlu1 %657  }
 0x5da   : > { %v2191_v15 = vmov %v658_v12  }
 0x5df   : > { %1287 = sbr.rel (%p1423_p1) target bundleno = 1900 (0x76c), region = 154 }
 0x5e2   : > { %v679_v13 = vpop.f32.mrf.mxu1  }
 0x5e3   : > { %v2187_v14 = vmov %v679_v13  }
 0x5e4   : > { %v2171_v17 = vmov %v679_v13   ;;  %v2175_v18 = vmov %v658_v12   ;;  %v2179_v19 = vmov %v652_v7  }
 0x5e5 LB: >> { %s1436_s24 = sshll.u32 %s2185_s6, 3  ;;  %s685_s6 = sadd.s32 1, %s2185_s6   ;;  %s2185_s6 = sphi %s2535_s6, %s685_s6   ;;  %v2181_v19 = vphi %v2179_v19, %v2180_v19   ;;  %v2177_v18 = vphi %v2175_v18, %v2176_v18   ;;  %v2173_v17 = vphi %v2171_v17, %v2172_v17  }
 0x5e6   : >> { %s1241_s10 = scalar_lea.vmem [#allocation2], %s1436_s24  ;;  %p684_p8 = scmp.ge.s32.totalorder %s685_s6, %s2129_s27 }
 0x5e7   : >> { %v1437_v20 = vld [vmem:[%s1241_s10 + $0x10] sm:$0xff] }
 0x5e8   : >> { %1440 = vmatpush.xpose.msk.msra.mxu0 %vm399_vm1, %v1437_v20  ;;  %v1439_v23 = vld [vmem:[%s1241_s10 + $0x50] sm:$0xff] }
 0x5e9   : >> { %755 = vmatpush.msra.mxu1 %v1439_v23 }
 0x5eb   : >> { %1441 = vmatmul.msk.f32.vlgmr.msra.gmra.mxu0 %vm399_vm1, %v2522_v2 }
 0x668   : >> { %v718_v21 = vpop.f32.mrf.mxu0 }
 0x669   : >> { %v721_v22 = vsel %vm399_vm1, %v718_v21, -inf }
 0x66a   : >> { %722 = vmax.xlane.f32.xlu0 %v721_v22 }
 0x6dd   : >> { %v723_v26 = vpop.xlane.xlu0 %722 }
 0x6de   : >> { %v724_v27 = vmax.f32 %v2181_v19, %v723_v26  }
 0x6e0   : >> { %v725_v28 = vsub.f32 %v2181_v19, %v724_v27  ;;  %v728_v29 = vsub.f32 %v718_v21, %v724_v27  ;;  %v2180_v19 = vmov %v724_v27  }
 0x6e2   : >> { %v729_v30 = vmul.f32 1.442695, %v728_v29  ;;  %v726_v33 = vmul.f32 1.442695, %v725_v28 }
 0x6e4   : >> { %1800 = vpow2.f32 %v729_v30 }
 0x6e5   : >> { %1802 = vpow2.f32 %v726_v33 }
 0x6ea   : >> { %v1801_v31 = vpop.eup %1800 }
 0x6eb   : >> { %1442 = vmatmul.msk.f32.vlgmr.msra.gmra.mxu1 %vm399_vm1, %v1801_v31  ;;  %v732_v32 = vsel %vm399_vm1, %v1801_v31, 0.0  ;;  %v1803_v34 = vpop.eup %1802 }
 0x6ec   : >> { %733 = vadd.xlane.f32.xlu0 %v732_v32  ;;  %v731_v35 = vmul.f32 %v2177_v18, %v1803_v34  ;;  %v736_v38 = vmul.f32 %v2173_v17, %v1803_v34 }
 0x75f   : >> { %v734_v36 = vpop.xlane.xlu0 %733 }
 0x760   : >> { %v735_v37 = vadd.f32 %v734_v36, %v731_v35  }
 0x762   : >> { %v2176_v18 = vmov %v735_v37   ;;  %v2192_v15 = vmov (%p684_p8), %v735_v37  }
 0x767   : > { %687 = sbr.rel (!%p684_p8) target bundleno = 1509 (0x5e5), region = 160 }
 0x768   : >> { %v757_v39 = vpop.f32.mrf.mxu1 }
 0x769   : >> { %v760_v40 = vadd.f32 %v757_v39, %v736_v38  }
 0x76b   : >> { %v2172_v17 = vmov %v760_v40   ;;  %v2188_v14 = vmov (%p684_p8), %v760_v40  }
 0x76c PF: > { %812 = vrot.lane.b32.xlu0 %v2458_v16, %s2248_s16  ;;  %v1445_v41 = vld [vmem:[%s2453_s21 + $0x20] sm:$0xff]  ;;  %805 = vmatpush.msra.mxu1 %v2516_v62  ;;  %1804 = vrcp.f32 %v2193_v15  ;;  %v763_v47 = vld [vmem:[#allocation9 + $0x8] sm:$0xff]  ;;  %s2574_s14 = smov (!%p1423_p1), 0   ;;  %v2193_v15 = vphi %v2191_v15, %v2192_v15   ;;  %v2189_v14 = vphi %v2187_v14, %v2188_v14  }
 0x76d   : > { %1447 = vmatpush.xpose.msk.msra.mxu2 %vm399_vm1, %v1445_v41  ;;  %1444 = vmatmul.msk.f32.vlgmr.msra.gmra.mxu1 %vm399_vm1, %v2520_v1  ;;  %v1446_v46 = vld [vmem:[%s2453_s21 + $0x60] sm:$0xff] }
 0x76e   : > { %867 = vmatpush.msra.mxu3 %v1446_v46  ;;  %782 = vmatpush.msra.mxu0 %v763_v47 }
 0x772   : > { %v1805_v48 = vpop.eup %1804 }
 0x773   : > { %v762_v49 = vmul.f32 %v2189_v14, %v1805_v48 }
 0x775   : > { %1443 = vmatmul.msk.f32.vlgmr.msra.gmra.mxu0 %vm399_vm1, %v762_v49 }
 0x7de   : > { %v2558_v42 = vpop.permute.xlu0 %812 }
 0x7df   : > { %1448 = vmatmul.msk.f32.vlgmr.msra.gmra.mxu2 %vm399_vm1, %v2558_v42 }
 0x7ea   : > { %v807_v55 = vpop.f32.mrf.mxu1 }
 0x7f2   : > { %v784_v56 = vpop.f32.mrf.mxu0 }
 0x7f3   : > { %v2570_v57 = vadd.f32 %v807_v55, %v784_v56 }
 0x862   : > { %v836_v43 = vpop.f32.mrf.mxu2 }
 0x863   : > { %v839_v44 = vsel %vm477_vm2, %v836_v43, -3.4028235e+38 }
 0x864   : > { %v840_v45 = vsel %vm399_vm1, %v839_v44, -inf }
 0x865   : > { %841 = vmax.xlane.f32.xlu0 %v840_v45 }
 0x8d8   : > { %v842_v50 = vpop.xlane.xlu0 %841  }
 0x8d9   : > { %v843_v51 = vsub.f32 %v839_v44, %v842_v50 }
 0x8db   : > { %v844_v52 = vmul.f32 1.442695, %v843_v51 }
 0x8dd   : > { %1806 = vpow2.f32 %v844_v52 }
 0x8e3   : > { %v1807_v53 = vpop.eup %1806 }
 0x8e4   : > { %1449 = vmatmul.msk.f32.vlgmr.msra.gmra.mxu3 %vm399_vm1, %v1807_v53  ;;  %v846_v54 = vsel %vm399_vm1, %v1807_v53, 0.0 }
 0x8e5   : > { %847 = vadd.xlane.f32.xlu1 %v846_v54 }
 0x958   : > { %v848_v58 = vpop.xlane.xlu1 %847  }
 0x959   : > { %v2215_v61 = vmov %v848_v58  }
 0x964   : > { %1301 = sbr.rel (%p1423_p1) target bundleno = 2801 (0xaf1), region = 165 }
 0x967   : > { %v869_v59 = vpop.f32.mrf.mxu3  }
 0x968   : > { %v2211_v60 = vmov %v869_v59  }
 0x969   : > { %v2195_v62 = vmov %v869_v59   ;;  %v2199_v63 = vmov %v848_v58   ;;  %v2203_v0 = vmov %v842_v50  }
 0x96a LB: >> { %s1451_s16 = sshll.u32 %s2209_s14, 3  ;;  %s875_s14 = sadd.s32 1, %s2209_s14   ;;  %s2209_s14 = sphi %s2574_s14, %s875_s14   ;;  %v2205_v0 = vphi %v2203_v0, %v2204_v0   ;;  %v2201_v63 = vphi %v2199_v63, %v2200_v63   ;;  %v2197_v62 = vphi %v2195_v62, %v2196_v62  }
 0x96b   : >> { %s1247_s23 = scalar_lea.vmem [#allocation2], %s1451_s16  ;;  %p874_p9 = scmp.ge.s32.totalorder %s875_s14, %s2129_s27 }
 0x96c   : >> { %v1452_v1 = vld [vmem:[%s1247_s23 + $0x20] sm:$0xff] }
 0x96d   : >> { %1455 = vmatpush.xpose.msk.msra.mxu0 %vm399_vm1, %v1452_v1  ;;  %v1454_v4 = vld [vmem:[%s1247_s23 + $0x60] sm:$0xff] }
 0x96e   : >> { %945 = vmatpush.msra.mxu1 %v1454_v4 }
 0x970   : >> { %1456 = vmatmul.msk.f32.vlgmr.msra.gmra.mxu0 %vm399_vm1, %v2558_v42 }
 0x9ed   : >> { %v908_v2 = vpop.f32.mrf.mxu0 }
 0x9ee   : >> { %v911_v3 = vsel %vm399_vm1, %v908_v2, -inf }
 0x9ef   : >> { %912 = vmax.xlane.f32.xlu0 %v911_v3 }
 0xa62   : >> { %v913_v5 = vpop.xlane.xlu0 %912 }
 0xa63   : >> { %v914_v6 = vmax.f32 %v2205_v0, %v913_v5  }
 0xa65   : >> { %v915_v7 = vsub.f32 %v2205_v0, %v914_v6  ;;  %v918_v8 = vsub.f32 %v908_v2, %v914_v6  ;;  %v2204_v0 = vmov %v914_v6  }
 0xa67   : >> { %v919_v9 = vmul.f32 1.442695, %v918_v8  ;;  %v916_v12 = vmul.f32 1.442695, %v915_v7 }
 0xa69   : >> { %1808 = vpow2.f32 %v919_v9 }
 0xa6a   : >> { %1810 = vpow2.f32 %v916_v12 }
 0xa6f   : >> { %v1809_v10 = vpop.eup %1808 }
 0xa70   : >> { %1457 = vmatmul.msk.f32.vlgmr.msra.gmra.mxu1 %vm399_vm1, %v1809_v10  ;;  %v922_v11 = vsel %vm399_vm1, %v1809_v10, 0.0  ;;  %v1811_v13 = vpop.eup %1810 }
 0xa71   : >> { %923 = vadd.xlane.f32.xlu0 %v922_v11  ;;  %v921_v14 = vmul.f32 %v2201_v63, %v1811_v13  ;;  %v926_v18 = vmul.f32 %v2197_v62, %v1811_v13 }
 0xae4   : >> { %v924_v15 = vpop.xlane.xlu0 %923 }
 0xae5   : >> { %v925_v17 = vadd.f32 %v924_v15, %v921_v14  }
 0xae7   : >> { %v2200_v63 = vmov %v925_v17   ;;  %v2216_v61 = vmov (%p874_p9), %v925_v17  }
 0xaec   : > { %877 = sbr.rel (!%p874_p9) target bundleno = 2410 (0x96a), region = 171 }
 0xaed   : >> { %v947_v19 = vpop.f32.mrf.mxu1 }
 0xaee   : >> { %v950_v20 = vadd.f32 %v947_v19, %v926_v18  }
 0xaf0   : >> { %v2196_v62 = vmov %v950_v20   ;;  %v2212_v60 = vmov (%p874_p9), %v950_v20  }
 0xaf1 PF: > { %980 = vrot.lane.b32.xlu0 %v2458_v16, %s2253_s18  ;;  %v1459_v21 = vld [vmem:[%s2453_s21 + $0x30] sm:$0xff]  ;;  %1812 = vrcp.f32 %v2217_v61  ;;  %v953_v16 = vld [vmem:[#allocation9 + $0x10] sm:$0xff]  ;;  %s2611_s12 = smov (!%p1423_p1), 0   ;;  %v2217_v61 = vphi %v2215_v61, %v2216_v61   ;;  %v2213_v60 = vphi %v2211_v60, %v2212_v60  }
 0xaf2   : > { %1461 = vmatpush.xpose.msk.msra.mxu1 %vm399_vm1, %v1459_v21  ;;  %v1460_v28 = vld [vmem:[%s2453_s21 + $0x70] sm:$0xff]  ;;  %972 = vmatpush.msra.mxu0 %v953_v16 }
 0xaf3   : > { %1035 = vmatpush.msra.mxu2 %v1460_v28 }
 0xaf7   : > { %v1813_v29 = vpop.eup %1812 }
 0xaf8   : > { %v952_v30 = vmul.f32 %v2213_v60, %v1813_v29 }
 0xafa   : > { %1458 = vmatmul.msk.f32.vlgmr.msra.gmra.mxu0 %vm399_vm1, %v952_v30 }
 0xb63   : > { %v2594_v22 = vpop.permute.xlu0 %980 }
 0xb64   : > { %1462 = vmatmul.msk.f32.vlgmr.msra.gmra.mxu1 %vm399_vm1, %v2594_v22 }
 0xb77   : > { %v974_v25 = vpop.f32.mrf.mxu0 }
 0xb78   : > { %v2607_v35 = vadd.f32 %v974_v25, %v2570_v57 }
 0xbe1   : > { %v1004_v23 = vpop.f32.mrf.mxu1 }
 0xbe2   : > { %v1007_v26 = vsel %vm477_vm2, %v1004_v23, -3.4028235e+38 }
 0xbe3   : > { %v1008_v27 = vsel %vm399_vm1, %v1007_v26, -inf }
 0xbe4   : > { %1009 = vmax.xlane.f32.xlu0 %v1008_v27 }
 0xc57   : > { %v1010_v31 = vpop.xlane.xlu0 %1009  }
 0xc58   : > { %v1011_v32 = vsub.f32 %v1007_v26, %v1010_v31 }
 0xc5a   : > { %v1012_v33 = vmul.f32 1.442695, %v1011_v32 }
 0xc5c   : > { %1814 = vpow2.f32 %v1012_v33 }
 0xc62   : > { %v1815_v34 = vpop.eup %1814 }
 0xc63   : > { %1463 = vmatmul.msk.f32.vlgmr.msra.gmra.mxu2 %vm399_vm1, %v1815_v34  ;;  %v1014_v24 = vsel %vm399_vm1, %v1815_v34, 0.0 }
 0xc64   : > { %1015 = vadd.xlane.f32.xlu1 %v1014_v24 }
 0xcd7   : > { %v1016_v36 = vpop.xlane.xlu1 %1015  }
 0xcd8   : > { %v2239_v39 = vmov %v1016_v36  }
 0xce3   : > { %1315 = sbr.rel (%p1423_p1) target bundleno = 3696 (0xe70), region = 176 }
 0xce6   : > { %v1037_v37 = vpop.f32.mrf.mxu2  }
 0xce7   : > { %v2235_v38 = vmov %v1037_v37  }
 0xce8   : > { %v2219_v40 = vmov %v1037_v37   ;;  %v2223_v41 = vmov %v1016_v36   ;;  %v2227_v42 = vmov %v1010_v31  }
 0xce9 LB: >> { %s1465_s17 = sshll.u32 %s2233_s12, 3  ;;  %s1043_s12 = sadd.s32 1, %s2233_s12   ;;  %s2233_s12 = sphi %s2611_s12, %s1043_s12   ;;  %v2229_v42 = vphi %v2227_v42, %v2228_v42   ;;  %v2225_v41 = vphi %v2223_v41, %v2224_v41   ;;  %v2221_v40 = vphi %v2219_v40, %v2220_v40  }
 0xcea   : >> { %s1253_s21 = scalar_lea.vmem [#allocation2], %s1465_s17  ;;  %p1042_p10 = scmp.ge.s32.totalorder %s1043_s12, %s2129_s27 }
 0xceb   : >> { %v1466_v43 = vld [vmem:[%s1253_s21 + $0x30] sm:$0xff] }
 0xcec   : >> { %1469 = vmatpush.xpose.msk.msra.mxu0 %vm399_vm1, %v1466_v43  ;;  %v1468_v46 = vld [vmem:[%s1253_s21 + $0x70] sm:$0xff] }
 0xced   : >> { %1113 = vmatpush.msra.mxu1 %v1468_v46 }
 0xcef   : >> { %1470 = vmatmul.msk.f32.vlgmr.msra.gmra.mxu0 %vm399_vm1, %v2594_v22 }
 0xd6c   : >> { %v1076_v44 = vpop.f32.mrf.mxu0 }
 0xd6d   : >> { %v1079_v45 = vsel %vm399_vm1, %v1076_v44, -inf }
 0xd6e   : >> { %1080 = vmax.xlane.f32.xlu0 %v1079_v45 }
 0xde1   : >> { %v1081_v47 = vpop.xlane.xlu0 %1080 }
 0xde2   : >> { %v1082_v48 = vmax.f32 %v2229_v42, %v1081_v47  }
 0xde4   : >> { %v1083_v49 = vsub.f32 %v2229_v42, %v1082_v48  ;;  %v1086_v50 = vsub.f32 %v1076_v44, %v1082_v48  ;;  %v2228_v42 = vmov %v1082_v48  }
 0xde6   : >> { %v1087_v51 = vmul.f32 1.442695, %v1086_v50  ;;  %v1084_v54 = vmul.f32 1.442695, %v1083_v49 }
 0xde8   : >> { %1816 = vpow2.f32 %v1087_v51 }
 0xde9   : >> { %1818 = vpow2.f32 %v1084_v54 }
 0xdee   : >> { %v1817_v52 = vpop.eup %1816 }
 0xdef   : >> { %1471 = vmatmul.msk.f32.vlgmr.msra.gmra.mxu1 %vm399_vm1, %v1817_v52  ;;  %v1090_v53 = vsel %vm399_vm1, %v1817_v52, 0.0  ;;  %v1819_v55 = vpop.eup %1818 }
 0xdf0   : >> { %1091 = vadd.xlane.f32.xlu0 %v1090_v53  ;;  %v1089_v56 = vmul.f32 %v2225_v41, %v1819_v55  ;;  %v1094_v59 = vmul.f32 %v2221_v40, %v1819_v55 }
 0xe63   : >> { %v1092_v57 = vpop.xlane.xlu0 %1091 }
 0xe64   : >> { %v1093_v58 = vadd.f32 %v1092_v57, %v1089_v56  }
 0xe66   : >> { %v2224_v41 = vmov %v1093_v58   ;;  %v2240_v39 = vmov (%p1042_p10), %v1093_v58  }
 0xe6b   : > { %1045 = sbr.rel (!%p1042_p10) target bundleno = 3305 (0xce9), region = 182 }
 0xe6c   : >> { %v1115_v60 = vpop.f32.mrf.mxu1 }
 0xe6d   : >> { %v1118_v61 = vadd.f32 %v1115_v60, %v1094_v59  }
 0xe6f   : >> { %v2220_v40 = vmov %v1118_v61   ;;  %v2236_v38 = vmov (%p1042_p10), %v1118_v61  }
 0xe70 PF: > { %v1121_v62 = vld [vmem:[#allocation9 + $0x18] sm:$0xff]  ;;  %1821 = vrcp.f32 %v2241_v39  ;;  %s1474_s22 = sshll.u32 %s2133_s28, 1  ;;  %s2715_s24 = sld [smem:[#allocation24_spill]]  ;;  %v2241_v39 = vphi %v2239_v39, %v2240_v39   ;;  %v2237_v38 = vphi %v2235_v38, %v2236_v38  }
 0xe71   : > { %1140 = vmatpush.msra.mxu0 %v1121_v62  ;;  %s1163_s11 = sadd.s32 %s2129_s27, %s1474_s22  ;;  %s1167_s10 = sshll.u32 %s2493_s13, 4  ;;  %s1168_s10 = int_to_ptr.vmem [resolvable:$true] %s1167_s10 }
 0xe72   : > { %s1475_s15 = sshll.u32 %s1163_s11, 3  ;;  %s1153_s27 = scalar_lea.sflag [#allocation5], %s2424_s1 }
 0xe73   : > { %s1165_s3 = scalar_lea.hbm %s2686_s7, %s1475_s15  ;;  %s1963_s17 = scalar_lea.hbm %s2686_s7, 32 }
 0xe74   : > { %s1169_s14 = sshll.u32 %s1165_s3, 4  ;;  %s1170_s14 = int_to_ptr.hbm [resolvable:$true] %s1169_s14 }
 0xe75   : > { %s1957_s28 = sshra.s32 %s1170_s14, 4  ;;  %s1958_s28 = int_to_ptr.hbm [resolvable:$true] %s1957_s28 }
 0xe76   : > { %v1822_v63 = vpop.eup %1821  ;;  %v1820_v1 = vld [vmem:[%s2715_s24] ss:$0 sm:$0xff]  ;;  %s1959_s16 = scalar_lea.hbm %s1958_s28, 8  ;;  %p1964_p0 = scmp.lt.s32.totalorder %s1958_s28, %s2686_s7 }
 0xe77   : > { %v1120_v0 = vmul.f32 %v2237_v38, %v1822_v63  ;;  %p1960_p11 = scmp.ne.s32.totalorder %s1958_s28, %s1959_s16  ;;  %p1965_p5 = scmp.lt.s32.totalorder %s1963_s17, %s1959_s16 }
 0xe79   : > { %1472 = vmatmul.msk.f32.vlgmr.msra.gmra.mxu0 %vm399_vm1, %v1120_v0  ;;  %p1961_p12 = pnand %p1960_p11, %p2399_p2  ;;  %p1966_p6 = por %p1965_p5, %p1964_p0 }
 0xe7b   : > { %p1962_p13 = pneg %p1961_p12 }
 0xe7d   : > { %p1967_p7 = pnand %p1966_p6, %p1962_p13 }
 0xef6   : > { %v1142_v2 = vpop.f32.mrf.mxu0 }
 0xef7   : > { %v1145_v3 = vadd.f32 %v1142_v2, %v2607_v35 }
 0xef9   : > { %v1150_v4 = vadd.f32 %v1820_v1, %v1145_v3 }
 0xefb   : > { %1151 = vst.msk [vmem:[%s2493_s13] sm:$0xff] %vm374_vm0, %v1150_v4 }
 0xefc   : > { %1970 = shalt.err (!%p1967_p7)
}
 0xefd   : > { %1492 = dma.vmem_to_hbm [thread:$0]  (%p2399_p2), %s1168_s10, 128, %s1170_s14, %s1153_s27  }
 0xefe PF: > { %s2716_s1 = sld [smem:[#allocation16_spill]]  ;;  %p1519_p1 = scmp.ge.s32.totalorder %s2145_s8, 2 }
 0xf00   : > { %p1509_p3 = pnand %p1519_p1, %p2405_p4 }
 0xf02   : > { %p1510_p8 = pneg %p1509_p3 }
 0xf04   : > { %s1181_s11 = sand.u32 1, %s2716_s1  }
 0xf05   : > { %s1182_s15 = scalar_lea.sflag [#allocation5], %s1181_s11 }
 0xf06   : > { %2112 = dma.done.wait (%p1510_p8), %s1182_s15, 128  }
 0xf07   : > { %2114 = vsyncadd (%p1510_p8), %s1182_s15, 4294967168  ;;  %s25_s8 = sadd.s32 1, %s2145_s8   ;;  %s2718_s18 = sld [smem:[#allocation17_spill]] }
 0xf08   : > { %p22_p9 = scmp.ge.s32.totalorder %s25_s8, 6   ;;  %s2719_s19 = sld [smem:[#allocation18_spill]] }
 0xf09   : > { %s2720_s24 = smov %s2121_s25  ;;  %s2721_s25 = smov %s2125_s26 }
 0xf0a   : > { %s2722_s26 = smov %s2412_s9  ;;  %s2723_s27 = smov %s2137_s29 }
 0xf0b   : > { %s2724_s28 = smov %s2141_s30  ;;  %24 = sbr.rel (!%p22_p9) target bundleno = 14 (0xe), region = 193 }
 0xf0d   : > { %s2725_s29 = smov %s2718_s18 }
 0xf0e   : > { %s2726_s30 = smov %s2719_s19 }
 0xf10   :  { %1188 = vsyncpa [#allocation4], 1 }
 0xf11   :  { %1190 = vsyncpa [#allocation4 + $0x1], 1 }
 0xf12   :  { %1191 = vsyncpa [#allocation7], 1 }
 0xf13   :  { %1192 = vsyncpa [#allocation10], 1 }
 0xf14   :  { %1193 = vsyncpa [#allocation5], 1 }
 0xf15   :  { %1195 = vsyncpa [#allocation5 + $0x1], 1 }

</bundles_post_ra>
